<compile_context>
chip_gen: v7x
topology: tpu7x:2x2x1
jax: 0.10.0
libtpu: 0.0.40
codegen_flags: <defaults>
</compile_context>

<pallas_src>
import functools

import numpy as np
import jax
import jax.numpy as jnp
from jax.experimental import pallas as pl
from jax.experimental.pallas import tpu as pltpu

KSIZE = 5
STRIDE = 2
N_CONV = 3


def conv_size_out(size, kernel_size=KSIZE, stride=STRIDE):
    return (size - (kernel_size - 1) - 1) // stride + 1


# ---------------------------------------------------------------------------
# Static schedule (pure Python, derived from shapes at trace time):
# which (kernel-row i, input-phase r, row-offset d) terms feed each
# output-row-phase plane of each conv layer.
# ---------------------------------------------------------------------------
def make_schedule(h):
    sched = []
    H = h
    s = 2 ** N_CONV                                    # input row phases for conv1
    in_lens = [len(range(r, H, s)) for r in range(s)]
    for _ in range(N_CONV):
        Ho = conv_size_out(H)
        t = s // 2                                     # output row phases
        out_lens = [len(range(q, Ho, t)) for q in range(t)]
        layer = []
        for q in range(t):
            Lq = out_lens[q]
            terms = []
            for i in range(KSIZE):
                idx = STRIDE * q + i
                r, d = idx % s, idx // s
                assert Lq >= 1 and d + Lq <= in_lens[r], "invalid conv geometry"
                terms.append((i, r, d))
            layer.append((Lq, tuple(terms)))
        sched.append(tuple(layer))
        H, s, in_lens = Ho, t, out_lens
    return tuple(sched)


# ---------------------------------------------------------------------------
# One-time host-side parameter preparation (BN/bias folding + layout prep).
# ---------------------------------------------------------------------------
def _lowered_conv_weight(w_oihw, bn_scale, w_in):
    """Fold the BN scale and the W/stride direction into one matmul weight per
    kernel row.  Returns float32 array of shape (k, w_in*Cin, Wo*Cout)."""
    cout, cin, k, _ = w_oihw.shape
    wo = conv_size_out(w_in)
    wnp = (np.asarray(w_oihw, np.float32)
           * np.asarray(bn_scale, np.float32)[:, None, None, None])
    t = np.zeros((k, w_in, cin, wo, cout), np.float32)
    for i in range(k):
        for j in range(k):
            for o in range(wo):
                t[i, STRIDE * o + j, :, o, :] = wnp[:, :, i, j].T
    return t.reshape(k, w_in * cin, wo * cout)


def prepare_params(params, h, w):
    p = params
    convw1, convh1 = conv_size_out(w), conv_size_out(h)
    convw2, convh2 = conv_size_out(convw1), conv_size_out(convh1)
    convw3, convh3 = conv_size_out(convw2), conv_size_out(convh2)

    def shift_row(bias, scale, shift, wo):
        per_c = (np.asarray(bias, np.float32) * np.asarray(scale, np.float32)
                 + np.asarray(shift, np.float32))
        return np.tile(per_c, wo)[None, :]             # (1, wo*cout), co fastest

    bf16 = jnp.bfloat16
    prepped = {
        # Matmul operands in bf16 (f32 accumulation inside the kernel).
        "w1": jnp.asarray(_lowered_conv_weight(p["w1"], p["s1"], w), bf16),
        "sh1": jnp.asarray(shift_row(p["b1"], p["s1"], p["t1"], convw1)),
        "w2": jnp.asarray(_lowered_conv_weight(p["w2"], p["s2"], convw1), bf16),
        "sh2": jnp.asarray(shift_row(p["b2"], p["s2"], p["t2"], convw2)),
        "w3": jnp.asarray(_lowered_conv_weight(p["w3"], p["s3"], convw2), bf16),
        "sh3": jnp.asarray(shift_row(p["b3"], p["s3"], p["t3"], convw3)),
    }
    # Head: torch flattens NCHW (c, h, w); kernel activations are (h, w, c).
    outputs = p["wh"].shape[0]
    cout3 = p["w3"].shape[0]
    wh = np.asarray(p["wh"], np.float32).reshape(outputs, cout3, convh3, convw3)
    wh = wh.transpose(2, 3, 1, 0).reshape(convh3, convw3 * cout3, outputs)
    prepped["wh"] = jnp.asarray(wh, bf16)
    prepped["bh"] = jnp.asarray(np.asarray(p["bh"], np.float32)[None, :])
    return prepped


# ---------------------------------------------------------------------------
# Fused Pallas kernel: 3x (conv + folded BN/bias + ReLU) + linear head.
# All intermediates stay in VMEM scratch; w2/w3 DMA'd behind conv1 compute.
# ---------------------------------------------------------------------------
def _dqn_fused_kernel(xp_ref, w1_ref, sh1_ref, w2_hbm, sh2_ref, w3_hbm, sh3_ref,
                      wh_ref, bh_ref, out_ref,
                      a1_ref, a2_ref, a3_ref, w2_ref, w3_ref, dma_sem,
                      *, schedule, batch, convh):
    # Kick off w2/w3 HBM->VMEM copies; they land while conv1 runs.
    cp_w2 = pltpu.make_async_copy(w2_hbm, w2_ref, dma_sem.at[0])
    cp_w3 = pltpu.make_async_copy(w3_hbm, w3_ref, dma_sem.at[1])
    cp_w2.start()
    cp_w3.start()

    def conv_layer(in_ref, w_ref, sh_ref, scr_ref, layer_plan):
        # Kernel-row i OUTER / output-phase q INNER: the (K, N) RHS slab is
        # loaded once per kernel row and reused by every phase's matmul.
        accs = [None] * len(layer_plan)
        for i in range(KSIZE):
            wi = w_ref[i]                              # hoisted RHS (bf16)
            for q, (n_rows, terms) in enumerate(layer_plan):
                _, r, d = terms[i]
                rows = n_rows * batch
                a = in_ref[r, d * batch:d * batch + rows, :]
                y = jnp.dot(a, wi, preferred_element_type=jnp.float32)
                accs[q] = y if accs[q] is None else accs[q] + y
        sh = sh_ref[...]                               # f32 shift; epilogue in f32
        for q, (n_rows, _) in enumerate(layer_plan):
            rows = n_rows * batch
            scr_ref[q, 0:rows, :] = jnp.maximum(accs[q] + sh, 0.0).astype(scr_ref.dtype)

    conv_layer(xp_ref, w1_ref, sh1_ref, a1_ref, schedule[0])
    cp_w2.wait()
    conv_layer(a1_ref, w2_ref, sh2_ref, a2_ref, schedule[1])
    cp_w3.wait()
    conv_layer(a2_ref, w3_ref, sh3_ref, a3_ref, schedule[2])

    head = None
    for hh in range(convh):                            # linear head, fused
        a = a3_ref[0, hh * batch:(hh + 1) * batch, :]
        y = jnp.dot(a, wh_ref[hh], preferred_element_type=jnp.float32)
        head = y if head is None else head + y
    out_ref[...] = (head + bh_ref[...]).astype(out_ref.dtype)


@jax.jit
def dqn_forward(prepped, x):
    """x: (B, 3, H, W) NCHW float32 -> (B, outputs) float32."""
    B, C, H, W = x.shape
    schedule = make_schedule(H)
    n_phases = 2 ** N_CONV

    # 8-way row-parity phase split as ONE reshape/transpose/reshape (bf16).
    xb = x.astype(jnp.bfloat16)
    pad = (-H) % n_phases
    if pad:
        xb = jnp.pad(xb, ((0, 0), (0, 0), (0, pad), (0, 0)))
    m = (H + pad) // n_phases
    xp = xb.reshape(B, C, m, n_phases, W)
    xp = jnp.transpose(xp, (3, 2, 0, 4, 1)).reshape(n_phases, m * B, W * C)

    outputs = prepped["bh"].shape[1]
    convh = prepped["wh"].shape[0]
    n1 = prepped["w1"].shape[2]
    n2 = prepped["w2"].shape[2]
    n3 = prepped["w3"].shape[2]
    rows1 = max(nr for nr, _ in schedule[0]) * B
    rows2 = max(nr for nr, _ in schedule[1]) * B
    rows3 = max(nr for nr, _ in schedule[2]) * B

    kernel = functools.partial(_dqn_fused_kernel, schedule=schedule,
                               batch=B, convh=convh)
    vmem = pltpu.MemorySpace.VMEM
    return pl.pallas_call(
        kernel,
        out_shape=jax.ShapeDtypeStruct((B, outputs), jnp.float32),
        in_specs=[
            pl.BlockSpec(memory_space=vmem),     # xp
            pl.BlockSpec(memory_space=vmem),     # w1 (needed first)
            pl.BlockSpec(memory_space=vmem),     # sh1
            pl.BlockSpec(memory_space=pl.ANY),   # w2 -> manual DMA behind conv1
            pl.BlockSpec(memory_space=vmem),     # sh2
            pl.BlockSpec(memory_space=pl.ANY),   # w3 -> manual DMA behind conv1/2
            pl.BlockSpec(memory_space=vmem),     # sh3
            pl.BlockSpec(memory_space=vmem),     # wh (tiny)
            pl.BlockSpec(memory_space=vmem),     # bh
        ],
        out_specs=pl.BlockSpec(memory_space=vmem),
        scratch_shapes=[
            pltpu.VMEM((len(schedule[0]), rows1, n1), jnp.bfloat16),   # a1
            pltpu.VMEM((len(schedule[1]), rows2, n2), jnp.bfloat16),   # a2
            pltpu.VMEM((len(schedule[2]), rows3, n3), jnp.bfloat16),   # a3
            pltpu.VMEM(prepped["w2"].shape, jnp.bfloat16),             # w2 VMEM dst
            pltpu.VMEM(prepped["w3"].shape, jnp.bfloat16),             # w3 VMEM dst
            pltpu.SemaphoreType.DMA((2,)),
        ],
    )(xp, prepped["w1"], prepped["sh1"], prepped["w2"], prepped["sh2"],
      prepped["w3"], prepped["sh3"], prepped["wh"], prepped["bh"])


# ---------------------------------------------------------------------------
# Deterministic synthetic parameters (torch-layout) + pure-JAX reference.
# ---------------------------------------------------------------------------
def make_params(key, h, w, outputs):
    ks = jax.random.split(key, 20)
    eps = 1e-5

    def bn_fold(kg, kb, km, kv, c):
        gamma = 1.0 + 0.1 * jax.random.normal(kg, (c,), jnp.float32)
        beta = 0.1 * jax.random.normal(kb, (c,), jnp.float32)
        mean = 0.1 * jax.random.normal(km, (c,), jnp.float32)
        var = jnp.abs(1.0 + 0.1 * jax.random.normal(kv, (c,), jnp.float32))
        scale = gamma / jnp.sqrt(var + eps)
        shift = beta - mean * scale
        return scale, shift

    p = {}
    p["w1"] = 0.05 * jax.random.normal(ks[0], (16, 3, 5, 5), jnp.float32)
    p["b1"] = 0.05 * jax.random.normal(ks[1], (16,), jnp.float32)
    p["s1"], p["t1"] = bn_fold(ks[2], ks[3], ks[4], ks[5], 16)

    p["w2"] = 0.05 * jax.random.normal(ks[6], (32, 16, 5, 5), jnp.float32)
    p["b2"] = 0.05 * jax.random.normal(ks[7], (32,), jnp.float32)
    p["s2"], p["t2"] = bn_fold(ks[8], ks[9], ks[10], ks[11], 32)

    p["w3"] = 0.05 * jax.random.normal(ks[12], (32, 32, 5, 5), jnp.float32)
    p["b3"] = 0.05 * jax.random.normal(ks[13], (32,), jnp.float32)
    p["s3"], p["t3"] = bn_fold(ks[14], ks[15], ks[16], ks[17], 32)

    convw = conv_size_out(conv_size_out(conv_size_out(w)))
    convh = conv_size_out(conv_size_out(conv_size_out(h)))
    lin_in = convw * convh * 32
    p["wh"] = 0.05 * jax.random.normal(ks[18], (outputs, lin_in), jnp.float32)
    p["bh"] = 0.05 * jax.random.normal(ks[19], (outputs,), jnp.float32)
    return p


def dqn_reference(params, x):
    p = params

    def layer(x, w, b, s, t):
        y = jax.lax.conv_general_dilated(
            x, w, window_strides=(2, 2), padding="VALID",
            dimension_numbers=("NCHW", "OIHW", "NCHW"))
        y = y + b.reshape(1, -1, 1, 1)
        y = y * s.reshape(1, -1, 1, 1) + t.reshape(1, -1, 1, 1)
        return jnp.maximum(y, 0.0)

    x = layer(x, p["w1"], p["b1"], p["s1"], p["t1"])
    x = layer(x, p["w2"], p["b2"], p["s2"], p["t2"])
    x = layer(x, p["w3"], p["b3"], p["s3"], p["t3"])
    flat = x.reshape(x.shape[0], -1)
    return flat @ p["wh"].T + p["bh"]


if __name__ == "__main__":
    B, C, H, W = 2, 3, 40, 40       # 40 -> 18 -> 7 -> 2 spatial; linear_in = 2*2*32 = 128
    OUTPUTS = 2                     # flappy bird: 2 actions

    key = jax.random.PRNGKey(0)
    kx, kp = jax.random.split(key)
    x = jax.random.normal(kx, (B, C, H, W), jnp.float32)
    params = make_params(kp, H, W, OUTPUTS)
    prepped = prepare_params(params, H, W)    # one-time weight prep (BN/bias folded, bf16)

    out = dqn_forward(prepped, x)
    out = jax.block_until_ready(out)

    ref = dqn_reference(params, x)
    assert out.shape == (B, OUTPUTS), out.shape
    # bf16 matmul operands (f32 accumulation) vs the pure-f32 reference.
    assert jnp.allclose(out, ref, atol=5e-2, rtol=5e-2), (out, ref)

    print("KERNEL_OK")
</pallas_src>

<mosaic_0001>
module attributes {stable_mosaic.version = 11 : i64} {
  func.func @_dqn_fused_kernel(%arg0: memref<8x10x120xbf16, #tpu.memory_space<vmem>>, %arg1: memref<5x120x288xbf16, #tpu.memory_space<vmem>>, %arg2: memref<1x288xf32, #tpu.memory_space<vmem>>, %arg3: memref<5x288x224xbf16, #tpu.memory_space<any>>, %arg4: memref<1x224xf32, #tpu.memory_space<vmem>>, %arg5: memref<5x224x64xbf16, #tpu.memory_space<any>>, %arg6: memref<1x64xf32, #tpu.memory_space<vmem>>, %arg7: memref<2x64x2xbf16, #tpu.memory_space<vmem>>, %arg8: memref<1x2xf32, #tpu.memory_space<vmem>>, %arg9: memref<2x2xf32, #tpu.memory_space<vmem>>, %arg10: memref<4x10x288xbf16, #tpu.memory_space<vmem>>, %arg11: memref<2x8x224xbf16, #tpu.memory_space<vmem>>, %arg12: memref<1x4x64xbf16, #tpu.memory_space<vmem>>, %arg13: memref<5x288x224xbf16, #tpu.memory_space<vmem>>, %arg14: memref<5x224x64xbf16, #tpu.memory_space<vmem>>, %arg15: memref<2x!tpu.dma_semaphore, #tpu.memory_space<semaphore_mem>>) attributes {dimension_semantics = [], scalar_prefetch = 0 : i64, scratch_operands = 6 : i64, tpu.core_type = #tpu.core_type<tc>} {
    %c0_i32 = arith.constant 0 : i32
    %0 = tpu.memref_slice %arg15[%c0_i32] : memref<2x!tpu.dma_semaphore, #tpu.memory_space<semaphore_mem>> -> memref<1x!tpu.dma_semaphore, #tpu.memory_space<semaphore_mem>>
    %1 = tpu.memref_squeeze %0 : memref<1x!tpu.dma_semaphore, #tpu.memory_space<semaphore_mem>> -> memref<!tpu.dma_semaphore, #tpu.memory_space<semaphore_mem>>
    tpu.enqueue_dma source(%arg3 : memref<5x288x224xbf16, #tpu.memory_space<any>>) target(%arg13 : memref<5x288x224xbf16, #tpu.memory_space<vmem>>) target_semaphore(%1 : memref<!tpu.dma_semaphore, #tpu.memory_space<semaphore_mem>>)
    %c1_i32 = arith.constant 1 : i32
    %2 = tpu.memref_slice %arg15[%c1_i32] : memref<2x!tpu.dma_semaphore, #tpu.memory_space<semaphore_mem>> -> memref<1x!tpu.dma_semaphore, #tpu.memory_space<semaphore_mem>>
    %3 = tpu.memref_squeeze %2 : memref<1x!tpu.dma_semaphore, #tpu.memory_space<semaphore_mem>> -> memref<!tpu.dma_semaphore, #tpu.memory_space<semaphore_mem>>
    tpu.enqueue_dma source(%arg5 : memref<5x224x64xbf16, #tpu.memory_space<any>>) target(%arg14 : memref<5x224x64xbf16, #tpu.memory_space<vmem>>) target_semaphore(%3 : memref<!tpu.dma_semaphore, #tpu.memory_space<semaphore_mem>>)
    %c0 = arith.constant 0 : index
    %c0_0 = arith.constant 0 : index
    %c0_1 = arith.constant 0 : index
    %4 = vector.load %arg1[%c0, %c0_0, %c0_1] : memref<5x120x288xbf16, #tpu.memory_space<vmem>>, vector<1x120x288xbf16>
    %5 = vector.shape_cast %4 : vector<1x120x288xbf16> to vector<120x288xbf16>
    %c0_2 = arith.constant 0 : index
    %c0_3 = arith.constant 0 : index
    %c0_4 = arith.constant 0 : index
    %6 = vector.load %arg0[%c0_2, %c0_3, %c0_4] : memref<8x10x120xbf16, #tpu.memory_space<vmem>>, vector<1x10x120xbf16>
    %7 = vector.shape_cast %6 : vector<1x10x120xbf16> to vector<10x120xbf16>
    %cst = arith.constant dense<0.000000e+00> : vector<10x288xf32>
    %8 = tpu.matmul %7, %5, %cst {dimension_numbers = #tpu.dot_dimension_numbers<[1], [0], [0], [1], [0, 0, 1, 1], [], []>} : vector<10x120xbf16>, vector<120x288xbf16>, vector<10x288xf32> -> vector<10x288xf32>
    %c2 = arith.constant 2 : index
    %c0_5 = arith.constant 0 : index
    %c0_6 = arith.constant 0 : index
    %9 = vector.load %arg0[%c2, %c0_5, %c0_6] : memref<8x10x120xbf16, #tpu.memory_space<vmem>>, vector<1x10x120xbf16>
    %10 = vector.shape_cast %9 : vector<1x10x120xbf16> to vector<10x120xbf16>
    %cst_7 = arith.constant dense<0.000000e+00> : vector<10x288xf32>
    %11 = tpu.matmul %10, %5, %cst_7 {dimension_numbers = #tpu.dot_dimension_numbers<[1], [0], [0], [1], [0, 0, 1, 1], [], []>} : vector<10x120xbf16>, vector<120x288xbf16>, vector<10x288xf32> -> vector<10x288xf32>
    %c4 = arith.constant 4 : index
    %c0_8 = arith.constant 0 : index
    %c0_9 = arith.constant 0 : index
    %12 = vector.load %arg0[%c4, %c0_8, %c0_9] : memref<8x10x120xbf16, #tpu.memory_space<vmem>>, vector<1x8x120xbf16>
    %13 = vector.shape_cast %12 : vector<1x8x120xbf16> to vector<8x120xbf16>
    %cst_10 = arith.constant dense<0.000000e+00> : vector<8x288xf32>
    %14 = tpu.matmul %13, %5, %cst_10 {dimension_numbers = #tpu.dot_dimension_numbers<[1], [0], [0], [1], [0, 0, 1, 1], [], []>} : vector<8x120xbf16>, vector<120x288xbf16>, vector<8x288xf32> -> vector<8x288xf32>
    %c6 = arith.constant 6 : index
    %c0_11 = arith.constant 0 : index
    %c0_12 = arith.constant 0 : index
    %15 = vector.load %arg0[%c6, %c0_11, %c0_12] : memref<8x10x120xbf16, #tpu.memory_space<vmem>>, vector<1x8x120xbf16>
    %16 = vector.shape_cast %15 : vector<1x8x120xbf16> to vector<8x120xbf16>
    %cst_13 = arith.constant dense<0.000000e+00> : vector<8x288xf32>
    %17 = tpu.matmul %16, %5, %cst_13 {dimension_numbers = #tpu.dot_dimension_numbers<[1], [0], [0], [1], [0, 0, 1, 1], [], []>} : vector<8x120xbf16>, vector<120x288xbf16>, vector<8x288xf32> -> vector<8x288xf32>
    %c1 = arith.constant 1 : index
    %c0_14 = arith.constant 0 : index
    %c0_15 = arith.constant 0 : index
    %18 = vector.load %arg1[%c1, %c0_14, %c0_15] : memref<5x120x288xbf16, #tpu.memory_space<vmem>>, vector<1x120x288xbf16>
    %19 = vector.shape_cast %18 : vector<1x120x288xbf16> to vector<120x288xbf16>
    %c1_16 = arith.constant 1 : index
    %c0_17 = arith.constant 0 : index
    %c0_18 = arith.constant 0 : index
    %20 = vector.load %arg0[%c1_16, %c0_17, %c0_18] : memref<8x10x120xbf16, #tpu.memory_space<vmem>>, vector<1x10x120xbf16>
    %21 = vector.shape_cast %20 : vector<1x10x120xbf16> to vector<10x120xbf16>
    %cst_19 = arith.constant dense<0.000000e+00> : vector<10x288xf32>
    %22 = tpu.matmul %21, %19, %cst_19 {dimension_numbers = #tpu.dot_dimension_numbers<[1], [0], [0], [1], [0, 0, 1, 1], [], []>} : vector<10x120xbf16>, vector<120x288xbf16>, vector<10x288xf32> -> vector<10x288xf32>
    %23 = arith.addf %8, %22 : vector<10x288xf32>
    %c3 = arith.constant 3 : index
    %c0_20 = arith.constant 0 : index
    %c0_21 = arith.constant 0 : index
    %24 = vector.load %arg0[%c3, %c0_20, %c0_21] : memref<8x10x120xbf16, #tpu.memory_space<vmem>>, vector<1x10x120xbf16>
    %25 = vector.shape_cast %24 : vector<1x10x120xbf16> to vector<10x120xbf16>
    %cst_22 = arith.constant dense<0.000000e+00> : vector<10x288xf32>
    %26 = tpu.matmul %25, %19, %cst_22 {dimension_numbers = #tpu.dot_dimension_numbers<[1], [0], [0], [1], [0, 0, 1, 1], [], []>} : vector<10x120xbf16>, vector<120x288xbf16>, vector<10x288xf32> -> vector<10x288xf32>
    %27 = arith.addf %11, %26 : vector<10x288xf32>
    %c5 = arith.constant 5 : index
    %c0_23 = arith.constant 0 : index
    %c0_24 = arith.constant 0 : index
    %28 = vector.load %arg0[%c5, %c0_23, %c0_24] : memref<8x10x120xbf16, #tpu.memory_space<vmem>>, vector<1x8x120xbf16>
    %29 = vector.shape_cast %28 : vector<1x8x120xbf16> to vector<8x120xbf16>
    %cst_25 = arith.constant dense<0.000000e+00> : vector<8x288xf32>
    %30 = tpu.matmul %29, %19, %cst_25 {dimension_numbers = #tpu.dot_dimension_numbers<[1], [0], [0], [1], [0, 0, 1, 1], [], []>} : vector<8x120xbf16>, vector<120x288xbf16>, vector<8x288xf32> -> vector<8x288xf32>
    %31 = arith.addf %14, %30 : vector<8x288xf32>
    %c7 = arith.constant 7 : index
    %c0_26 = arith.constant 0 : index
    %c0_27 = arith.constant 0 : index
    %32 = vector.load %arg0[%c7, %c0_26, %c0_27] : memref<8x10x120xbf16, #tpu.memory_space<vmem>>, vector<1x8x120xbf16>
    %33 = vector.shape_cast %32 : vector<1x8x120xbf16> to vector<8x120xbf16>
    %cst_28 = arith.constant dense<0.000000e+00> : vector<8x288xf32>
    %34 = tpu.matmul %33, %19, %cst_28 {dimension_numbers = #tpu.dot_dimension_numbers<[1], [0], [0], [1], [0, 0, 1, 1], [], []>} : vector<8x120xbf16>, vector<120x288xbf16>, vector<8x288xf32> -> vector<8x288xf32>
    %35 = arith.addf %17, %34 : vector<8x288xf32>
    %c2_29 = arith.constant 2 : index
    %c0_30 = arith.constant 0 : index
    %c0_31 = arith.constant 0 : index
    %36 = vector.load %arg1[%c2_29, %c0_30, %c0_31] : memref<5x120x288xbf16, #tpu.memory_space<vmem>>, vector<1x120x288xbf16>
    %37 = vector.shape_cast %36 : vector<1x120x288xbf16> to vector<120x288xbf16>
    %c2_32 = arith.constant 2 : index
    %c0_33 = arith.constant 0 : index
    %c0_34 = arith.constant 0 : index
    %38 = vector.load %arg0[%c2_32, %c0_33, %c0_34] : memref<8x10x120xbf16, #tpu.memory_space<vmem>>, vector<1x10x120xbf16>
    %39 = vector.shape_cast %38 : vector<1x10x120xbf16> to vector<10x120xbf16>
    %cst_35 = arith.constant dense<0.000000e+00> : vector<10x288xf32>
    %40 = tpu.matmul %39, %37, %cst_35 {dimension_numbers = #tpu.dot_dimension_numbers<[1], [0], [0], [1], [0, 0, 1, 1], [], []>} : vector<10x120xbf16>, vector<120x288xbf16>, vector<10x288xf32> -> vector<10x288xf32>
    %41 = arith.addf %23, %40 : vector<10x288xf32>
    %c4_36 = arith.constant 4 : index
    %c0_37 = arith.constant 0 : index
    %c0_38 = arith.constant 0 : index
    %42 = vector.load %arg0[%c4_36, %c0_37, %c0_38] : memref<8x10x120xbf16, #tpu.memory_space<vmem>>, vector<1x10x120xbf16>
    %43 = vector.shape_cast %42 : vector<1x10x120xbf16> to vector<10x120xbf16>
    %cst_39 = arith.constant dense<0.000000e+00> : vector<10x288xf32>
    %44 = tpu.matmul %43, %37, %cst_39 {dimension_numbers = #tpu.dot_dimension_numbers<[1], [0], [0], [1], [0, 0, 1, 1], [], []>} : vector<10x120xbf16>, vector<120x288xbf16>, vector<10x288xf32> -> vector<10x288xf32>
    %45 = arith.addf %27, %44 : vector<10x288xf32>
    %c6_40 = arith.constant 6 : index
    %c0_41 = arith.constant 0 : index
    %c0_42 = arith.constant 0 : index
    %46 = vector.load %arg0[%c6_40, %c0_41, %c0_42] : memref<8x10x120xbf16, #tpu.memory_space<vmem>>, vector<1x8x120xbf16>
    %47 = vector.shape_cast %46 : vector<1x8x120xbf16> to vector<8x120xbf16>
    %cst_43 = arith.constant dense<0.000000e+00> : vector<8x288xf32>
    %48 = tpu.matmul %47, %37, %cst_43 {dimension_numbers = #tpu.dot_dimension_numbers<[1], [0], [0], [1], [0, 0, 1, 1], [], []>} : vector<8x120xbf16>, vector<120x288xbf16>, vector<8x288xf32> -> vector<8x288xf32>
    %49 = arith.addf %31, %48 : vector<8x288xf32>
    %c0_44 = arith.constant 0 : index
    %c2_45 = arith.constant 2 : index
    %c0_46 = arith.constant 0 : index
    %50 = vector.load %arg0[%c0_44, %c2_45, %c0_46] : memref<8x10x120xbf16, #tpu.memory_space<vmem>>, vector<1x8x120xbf16>
    %51 = vector.shape_cast %50 : vector<1x8x120xbf16> to vector<8x120xbf16>
    %cst_47 = arith.constant dense<0.000000e+00> : vector<8x288xf32>
    %52 = tpu.matmul %51, %37, %cst_47 {dimension_numbers = #tpu.dot_dimension_numbers<[1], [0], [0], [1], [0, 0, 1, 1], [], []>} : vector<8x120xbf16>, vector<120x288xbf16>, vector<8x288xf32> -> vector<8x288xf32>
    %53 = arith.addf %35, %52 : vector<8x288xf32>
    %c3_48 = arith.constant 3 : index
    %c0_49 = arith.constant 0 : index
    %c0_50 = arith.constant 0 : index
    %54 = vector.load %arg1[%c3_48, %c0_49, %c0_50] : memref<5x120x288xbf16, #tpu.memory_space<vmem>>, vector<1x120x288xbf16>
    %55 = vector.shape_cast %54 : vector<1x120x288xbf16> to vector<120x288xbf16>
    %c3_51 = arith.constant 3 : index
    %c0_52 = arith.constant 0 : index
    %c0_53 = arith.constant 0 : index
    %56 = vector.load %arg0[%c3_51, %c0_52, %c0_53] : memref<8x10x120xbf16, #tpu.memory_space<vmem>>, vector<1x10x120xbf16>
    %57 = vector.shape_cast %56 : vector<1x10x120xbf16> to vector<10x120xbf16>
    %cst_54 = arith.constant dense<0.000000e+00> : vector<10x288xf32>
    %58 = tpu.matmul %57, %55, %cst_54 {dimension_numbers = #tpu.dot_dimension_numbers<[1], [0], [0], [1], [0, 0, 1, 1], [], []>} : vector<10x120xbf16>, vector<120x288xbf16>, vector<10x288xf32> -> vector<10x288xf32>
    %59 = arith.addf %41, %58 : vector<10x288xf32>
    %c5_55 = arith.constant 5 : index
    %c0_56 = arith.constant 0 : index
    %c0_57 = arith.constant 0 : index
    %60 = vector.load %arg0[%c5_55, %c0_56, %c0_57] : memref<8x10x120xbf16, #tpu.memory_space<vmem>>, vector<1x10x120xbf16>
    %61 = vector.shape_cast %60 : vector<1x10x120xbf16> to vector<10x120xbf16>
    %cst_58 = arith.constant dense<0.000000e+00> : vector<10x288xf32>
    %62 = tpu.matmul %61, %55, %cst_58 {dimension_numbers = #tpu.dot_dimension_numbers<[1], [0], [0], [1], [0, 0, 1, 1], [], []>} : vector<10x120xbf16>, vector<120x288xbf16>, vector<10x288xf32> -> vector<10x288xf32>
    %63 = arith.addf %45, %62 : vector<10x288xf32>
    %c7_59 = arith.constant 7 : index
    %c0_60 = arith.constant 0 : index
    %c0_61 = arith.constant 0 : index
    %64 = vector.load %arg0[%c7_59, %c0_60, %c0_61] : memref<8x10x120xbf16, #tpu.memory_space<vmem>>, vector<1x8x120xbf16>
    %65 = vector.shape_cast %64 : vector<1x8x120xbf16> to vector<8x120xbf16>
    %cst_62 = arith.constant dense<0.000000e+00> : vector<8x288xf32>
    %66 = tpu.matmul %65, %55, %cst_62 {dimension_numbers = #tpu.dot_dimension_numbers<[1], [0], [0], [1], [0, 0, 1, 1], [], []>} : vector<8x120xbf16>, vector<120x288xbf16>, vector<8x288xf32> -> vector<8x288xf32>
    %67 = arith.addf %49, %66 : vector<8x288xf32>
    %c1_63 = arith.constant 1 : index
    %c2_64 = arith.constant 2 : index
    %c0_65 = arith.constant 0 : index
    %68 = vector.load %arg0[%c1_63, %c2_64, %c0_65] : memref<8x10x120xbf16, #tpu.memory_space<vmem>>, vector<1x8x120xbf16>
    %69 = vector.shape_cast %68 : vector<1x8x120xbf16> to vector<8x120xbf16>
    %cst_66 = arith.constant dense<0.000000e+00> : vector<8x288xf32>
    %70 = tpu.matmul %69, %55, %cst_66 {dimension_numbers = #tpu.dot_dimension_numbers<[1], [0], [0], [1], [0, 0, 1, 1], [], []>} : vector<8x120xbf16>, vector<120x288xbf16>, vector<8x288xf32> -> vector<8x288xf32>
    %71 = arith.addf %53, %70 : vector<8x288xf32>
    %c4_67 = arith.constant 4 : index
    %c0_68 = arith.constant 0 : index
    %c0_69 = arith.constant 0 : index
    %72 = vector.load %arg1[%c4_67, %c0_68, %c0_69] : memref<5x120x288xbf16, #tpu.memory_space<vmem>>, vector<1x120x288xbf16>
    %73 = vector.shape_cast %72 : vector<1x120x288xbf16> to vector<120x288xbf16>
    %c4_70 = arith.constant 4 : index
    %c0_71 = arith.constant 0 : index
    %c0_72 = arith.constant 0 : index
    %74 = vector.load %arg0[%c4_70, %c0_71, %c0_72] : memref<8x10x120xbf16, #tpu.memory_space<vmem>>, vector<1x10x120xbf16>
    %75 = vector.shape_cast %74 : vector<1x10x120xbf16> to vector<10x120xbf16>
    %cst_73 = arith.constant dense<0.000000e+00> : vector<10x288xf32>
    %76 = tpu.matmul %75, %73, %cst_73 {dimension_numbers = #tpu.dot_dimension_numbers<[1], [0], [0], [1], [0, 0, 1, 1], [], []>} : vector<10x120xbf16>, vector<120x288xbf16>, vector<10x288xf32> -> vector<10x288xf32>
    %77 = arith.addf %59, %76 : vector<10x288xf32>
    %c6_74 = arith.constant 6 : index
    %c0_75 = arith.constant 0 : index
    %c0_76 = arith.constant 0 : index
    %78 = vector.load %arg0[%c6_74, %c0_75, %c0_76] : memref<8x10x120xbf16, #tpu.memory_space<vmem>>, vector<1x10x120xbf16>
    %79 = vector.shape_cast %78 : vector<1x10x120xbf16> to vector<10x120xbf16>
    %cst_77 = arith.constant dense<0.000000e+00> : vector<10x288xf32>
    %80 = tpu.matmul %79, %73, %cst_77 {dimension_numbers = #tpu.dot_dimension_numbers<[1], [0], [0], [1], [0, 0, 1, 1], [], []>} : vector<10x120xbf16>, vector<120x288xbf16>, vector<10x288xf32> -> vector<10x288xf32>
    %81 = arith.addf %63, %80 : vector<10x288xf32>
    %c0_78 = arith.constant 0 : index
    %c2_79 = arith.constant 2 : index
    %c0_80 = arith.constant 0 : index
    %82 = vector.load %arg0[%c0_78, %c2_79, %c0_80] : memref<8x10x120xbf16, #tpu.memory_space<vmem>>, vector<1x8x120xbf16>
    %83 = vector.shape_cast %82 : vector<1x8x120xbf16> to vector<8x120xbf16>
    %cst_81 = arith.constant dense<0.000000e+00> : vector<8x288xf32>
    %84 = tpu.matmul %83, %73, %cst_81 {dimension_numbers = #tpu.dot_dimension_numbers<[1], [0], [0], [1], [0, 0, 1, 1], [], []>} : vector<8x120xbf16>, vector<120x288xbf16>, vector<8x288xf32> -> vector<8x288xf32>
    %85 = arith.addf %67, %84 : vector<8x288xf32>
    %c2_82 = arith.constant 2 : index
    %c2_83 = arith.constant 2 : index
    %c0_84 = arith.constant 0 : index
    %86 = vector.load %arg0[%c2_82, %c2_83, %c0_84] : memref<8x10x120xbf16, #tpu.memory_space<vmem>>, vector<1x8x120xbf16>
    %87 = vector.shape_cast %86 : vector<1x8x120xbf16> to vector<8x120xbf16>
    %cst_85 = arith.constant dense<0.000000e+00> : vector<8x288xf32>
    %88 = tpu.matmul %87, %73, %cst_85 {dimension_numbers = #tpu.dot_dimension_numbers<[1], [0], [0], [1], [0, 0, 1, 1], [], []>} : vector<8x120xbf16>, vector<120x288xbf16>, vector<8x288xf32> -> vector<8x288xf32>
    %89 = arith.addf %71, %88 : vector<8x288xf32>
    %c0_86 = arith.constant 0 : index
    %c0_87 = arith.constant 0 : index
    %90 = vector.load %arg2[%c0_86, %c0_87] : memref<1x288xf32, #tpu.memory_space<vmem>>, vector<1x288xf32>
    %91 = vector.broadcast %90 : vector<1x288xf32> to vector<10x288xf32>
    %92 = arith.addf %77, %91 : vector<10x288xf32>
    %cst_88 = arith.constant 0.000000e+00 : f32
    %93 = vector.broadcast %cst_88 : f32 to vector<10x288xf32>
    %94 = arith.maximumf %92, %93 : vector<10x288xf32>
    %95 = arith.truncf %94 : vector<10x288xf32> to vector<10x288xbf16>
    %c0_89 = arith.constant 0 : index
    %c0_90 = arith.constant 0 : index
    %c0_91 = arith.constant 0 : index
    %96 = vector.load %arg10[%c0_89, %c0_90, %c0_91] : memref<4x10x288xbf16, #tpu.memory_space<vmem>>, vector<1x10x288xbf16>
    %97 = vector.shape_cast %96 : vector<1x10x288xbf16> to vector<10x288xbf16>
    %98 = vector.shape_cast %95 : vector<10x288xbf16> to vector<1x10x288xbf16>
    tpu.vector_store %arg10[%c0_89, %c0_90, %c0_91], %98 {strides = array<i32>} : memref<4x10x288xbf16, #tpu.memory_space<vmem>>, vector<1x10x288xbf16>,
    %99 = vector.broadcast %90 : vector<1x288xf32> to vector<10x288xf32>
    %100 = arith.addf %81, %99 : vector<10x288xf32>
    %cst_92 = arith.constant 0.000000e+00 : f32
    %101 = vector.broadcast %cst_92 : f32 to vector<10x288xf32>
    %102 = arith.maximumf %100, %101 : vector<10x288xf32>
    %103 = arith.truncf %102 : vector<10x288xf32> to vector<10x288xbf16>
    %c1_93 = arith.constant 1 : index
    %c0_94 = arith.constant 0 : index
    %c0_95 = arith.constant 0 : index
    %104 = vector.load %arg10[%c1_93, %c0_94, %c0_95] : memref<4x10x288xbf16, #tpu.memory_space<vmem>>, vector<1x10x288xbf16>
    %105 = vector.shape_cast %104 : vector<1x10x288xbf16> to vector<10x288xbf16>
    %106 = vector.shape_cast %103 : vector<10x288xbf16> to vector<1x10x288xbf16>
    tpu.vector_store %arg10[%c1_93, %c0_94, %c0_95], %106 {strides = array<i32>} : memref<4x10x288xbf16, #tpu.memory_space<vmem>>, vector<1x10x288xbf16>,
    %107 = vector.broadcast %90 : vector<1x288xf32> to vector<8x288xf32>
    %108 = arith.addf %85, %107 : vector<8x288xf32>
    %cst_96 = arith.constant 0.000000e+00 : f32
    %109 = vector.broadcast %cst_96 : f32 to vector<8x288xf32>
    %110 = arith.maximumf %108, %109 : vector<8x288xf32>
    %111 = arith.truncf %110 : vector<8x288xf32> to vector<8x288xbf16>
    %c2_97 = arith.constant 2 : index
    %c0_98 = arith.constant 0 : index
    %c0_99 = arith.constant 0 : index
    %112 = vector.load %arg10[%c2_97, %c0_98, %c0_99] : memref<4x10x288xbf16, #tpu.memory_space<vmem>>, vector<1x8x288xbf16>
    %113 = vector.shape_cast %112 : vector<1x8x288xbf16> to vector<8x288xbf16>
    %114 = vector.shape_cast %111 : vector<8x288xbf16> to vector<1x8x288xbf16>
    tpu.vector_store %arg10[%c2_97, %c0_98, %c0_99], %114 {strides = array<i32>} : memref<4x10x288xbf16, #tpu.memory_space<vmem>>, vector<1x8x288xbf16>,
    %115 = vector.broadcast %90 : vector<1x288xf32> to vector<8x288xf32>
    %116 = arith.addf %89, %115 : vector<8x288xf32>
    %cst_100 = arith.constant 0.000000e+00 : f32
    %117 = vector.broadcast %cst_100 : f32 to vector<8x288xf32>
    %118 = arith.maximumf %116, %117 : vector<8x288xf32>
    %119 = arith.truncf %118 : vector<8x288xf32> to vector<8x288xbf16>
    %c3_101 = arith.constant 3 : index
    %c0_102 = arith.constant 0 : index
    %c0_103 = arith.constant 0 : index
    %120 = vector.load %arg10[%c3_101, %c0_102, %c0_103] : memref<4x10x288xbf16, #tpu.memory_space<vmem>>, vector<1x8x288xbf16>
    %121 = vector.shape_cast %120 : vector<1x8x288xbf16> to vector<8x288xbf16>
    %122 = vector.shape_cast %119 : vector<8x288xbf16> to vector<1x8x288xbf16>
    tpu.vector_store %arg10[%c3_101, %c0_102, %c0_103], %122 {strides = array<i32>} : memref<4x10x288xbf16, #tpu.memory_space<vmem>>, vector<1x8x288xbf16>,
    %c0_i32_104 = arith.constant 0 : i32
    %123 = tpu.memref_slice %arg15[%c0_i32_104] : memref<2x!tpu.dma_semaphore, #tpu.memory_space<semaphore_mem>> -> memref<1x!tpu.dma_semaphore, #tpu.memory_space<semaphore_mem>>
    %124 = tpu.memref_squeeze %123 : memref<1x!tpu.dma_semaphore, #tpu.memory_space<semaphore_mem>> -> memref<!tpu.dma_semaphore, #tpu.memory_space<semaphore_mem>>
    tpu.wait_dma2 semaphore(%124 : memref<!tpu.dma_semaphore, #tpu.memory_space<semaphore_mem>>) src(%arg3 : memref<5x288x224xbf16, #tpu.memory_space<any>>) dst(%arg13 : memref<5x288x224xbf16, #tpu.memory_space<vmem>>)
    %c0_105 = arith.constant 0 : index
    %c0_106 = arith.constant 0 : index
    %c0_107 = arith.constant 0 : index
    %125 = vector.load %arg13[%c0_105, %c0_106, %c0_107] : memref<5x288x224xbf16, #tpu.memory_space<vmem>>, vector<1x288x224xbf16>
    %126 = vector.shape_cast %125 : vector<1x288x224xbf16> to vector<288x224xbf16>
    %c0_108 = arith.constant 0 : index
    %c0_109 = arith.constant 0 : index
    %c0_110 = arith.constant 0 : index
    %127 = vector.load %arg10[%c0_108, %c0_109, %c0_110] : memref<4x10x288xbf16, #tpu.memory_space<vmem>>, vector<1x8x288xbf16>
    %128 = vector.shape_cast %127 : vector<1x8x288xbf16> to vector<8x288xbf16>
    %cst_111 = arith.constant dense<0.000000e+00> : vector<8x224xf32>
    %129 = tpu.matmul %128, %126, %cst_111 {dimension_numbers = #tpu.dot_dimension_numbers<[1], [0], [0], [1], [0, 0, 1, 1], [], []>} : vector<8x288xbf16>, vector<288x224xbf16>, vector<8x224xf32> -> vector<8x224xf32>
    %c2_112 = arith.constant 2 : index
    %c0_113 = arith.constant 0 : index
    %c0_114 = arith.constant 0 : index
    %130 = vector.load %arg10[%c2_112, %c0_113, %c0_114] : memref<4x10x288xbf16, #tpu.memory_space<vmem>>, vector<1x6x288xbf16>
    %131 = vector.shape_cast %130 : vector<1x6x288xbf16> to vector<6x288xbf16>
    %cst_115 = arith.constant dense<0.000000e+00> : vector<6x224xf32>
    %132 = tpu.matmul %131, %126, %cst_115 {dimension_numbers = #tpu.dot_dimension_numbers<[1], [0], [0], [1], [0, 0, 1, 1], [], []>} : vector<6x288xbf16>, vector<288x224xbf16>, vector<6x224xf32> -> vector<6x224xf32>
    %c1_116 = arith.constant 1 : index
    %c0_117 = arith.constant 0 : index
    %c0_118 = arith.constant 0 : index
    %133 = vector.load %arg13[%c1_116, %c0_117, %c0_118] : memref<5x288x224xbf16, #tpu.memory_space<vmem>>, vector<1x288x224xbf16>
    %134 = vector.shape_cast %133 : vector<1x288x224xbf16> to vector<288x224xbf16>
    %c1_119 = arith.constant 1 : index
    %c0_120 = arith.constant 0 : index
    %c0_121 = arith.constant 0 : index
    %135 = vector.load %arg10[%c1_119, %c0_120, %c0_121] : memref<4x10x288xbf16, #tpu.memory_space<vmem>>, vector<1x8x288xbf16>
    %136 = vector.shape_cast %135 : vector<1x8x288xbf16> to vector<8x288xbf16>
    %cst_122 = arith.constant dense<0.000000e+00> : vector<8x224xf32>
    %137 = tpu.matmul %136, %134, %cst_122 {dimension_numbers = #tpu.dot_dimension_numbers<[1], [0], [0], [1], [0, 0, 1, 1], [], []>} : vector<8x288xbf16>, vector<288x224xbf16>, vector<8x224xf32> -> vector<8x224xf32>
    %138 = arith.addf %129, %137 : vector<8x224xf32>
    %c3_123 = arith.constant 3 : index
    %c0_124 = arith.constant 0 : index
    %c0_125 = arith.constant 0 : index
    %139 = vector.load %arg10[%c3_123, %c0_124, %c0_125] : memref<4x10x288xbf16, #tpu.memory_space<vmem>>, vector<1x6x288xbf16>
    %140 = vector.shape_cast %139 : vector<1x6x288xbf16> to vector<6x288xbf16>
    %cst_126 = arith.constant dense<0.000000e+00> : vector<6x224xf32>
    %141 = tpu.matmul %140, %134, %cst_126 {dimension_numbers = #tpu.dot_dimension_numbers<[1], [0], [0], [1], [0, 0, 1, 1], [], []>} : vector<6x288xbf16>, vector<288x224xbf16>, vector<6x224xf32> -> vector<6x224xf32>
    %142 = arith.addf %132, %141 : vector<6x224xf32>
    %c2_127 = arith.constant 2 : index
    %c0_128 = arith.constant 0 : index
    %c0_129 = arith.constant 0 : index
    %143 = vector.load %arg13[%c2_127, %c0_128, %c0_129] : memref<5x288x224xbf16, #tpu.memory_space<vmem>>, vector<1x288x224xbf16>
    %144 = vector.shape_cast %143 : vector<1x288x224xbf16> to vector<288x224xbf16>
    %c2_130 = arith.constant 2 : index
    %c0_131 = arith.constant 0 : index
    %c0_132 = arith.constant 0 : index
    %145 = vector.load %arg10[%c2_130, %c0_131, %c0_132] : memref<4x10x288xbf16, #tpu.memory_space<vmem>>, vector<1x8x288xbf16>
    %146 = vector.shape_cast %145 : vector<1x8x288xbf16> to vector<8x288xbf16>
    %cst_133 = arith.constant dense<0.000000e+00> : vector<8x224xf32>
    %147 = tpu.matmul %146, %144, %cst_133 {dimension_numbers = #tpu.dot_dimension_numbers<[1], [0], [0], [1], [0, 0, 1, 1], [], []>} : vector<8x288xbf16>, vector<288x224xbf16>, vector<8x224xf32> -> vector<8x224xf32>
    %148 = arith.addf %138, %147 : vector<8x224xf32>
    %c0_134 = arith.constant 0 : index
    %c2_135 = arith.constant 2 : index
    %c0_136 = arith.constant 0 : index
    %149 = vector.load %arg10[%c0_134, %c2_135, %c0_136] : memref<4x10x288xbf16, #tpu.memory_space<vmem>>, vector<1x6x288xbf16>
    %150 = vector.shape_cast %149 : vector<1x6x288xbf16> to vector<6x288xbf16>
    %cst_137 = arith.constant dense<0.000000e+00> : vector<6x224xf32>
    %151 = tpu.matmul %150, %144, %cst_137 {dimension_numbers = #tpu.dot_dimension_numbers<[1], [0], [0], [1], [0, 0, 1, 1], [], []>} : vector<6x288xbf16>, vector<288x224xbf16>, vector<6x224xf32> -> vector<6x224xf32>
    %152 = arith.addf %142, %151 : vector<6x224xf32>
    %c3_138 = arith.constant 3 : index
    %c0_139 = arith.constant 0 : index
    %c0_140 = arith.constant 0 : index
    %153 = vector.load %arg13[%c3_138, %c0_139, %c0_140] : memref<5x288x224xbf16, #tpu.memory_space<vmem>>, vector<1x288x224xbf16>
    %154 = vector.shape_cast %153 : vector<1x288x224xbf16> to vector<288x224xbf16>
    %c3_141 = arith.constant 3 : index
    %c0_142 = arith.constant 0 : index
    %c0_143 = arith.constant 0 : index
    %155 = vector.load %arg10[%c3_141, %c0_142, %c0_143] : memref<4x10x288xbf16, #tpu.memory_space<vmem>>, vector<1x8x288xbf16>
    %156 = vector.shape_cast %155 : vector<1x8x288xbf16> to vector<8x288xbf16>
    %cst_144 = arith.constant dense<0.000000e+00> : vector<8x224xf32>
    %157 = tpu.matmul %156, %154, %cst_144 {dimension_numbers = #tpu.dot_dimension_numbers<[1], [0], [0], [1], [0, 0, 1, 1], [], []>} : vector<8x288xbf16>, vector<288x224xbf16>, vector<8x224xf32> -> vector<8x224xf32>
    %158 = arith.addf %148, %157 : vector<8x224xf32>
    %c1_145 = arith.constant 1 : index
    %c2_146 = arith.constant 2 : index
    %c0_147 = arith.constant 0 : index
    %159 = vector.load %arg10[%c1_145, %c2_146, %c0_147] : memref<4x10x288xbf16, #tpu.memory_space<vmem>>, vector<1x6x288xbf16>
    %160 = vector.shape_cast %159 : vector<1x6x288xbf16> to vector<6x288xbf16>
    %cst_148 = arith.constant dense<0.000000e+00> : vector<6x224xf32>
    %161 = tpu.matmul %160, %154, %cst_148 {dimension_numbers = #tpu.dot_dimension_numbers<[1], [0], [0], [1], [0, 0, 1, 1], [], []>} : vector<6x288xbf16>, vector<288x224xbf16>, vector<6x224xf32> -> vector<6x224xf32>
    %162 = arith.addf %152, %161 : vector<6x224xf32>
    %c4_149 = arith.constant 4 : index
    %c0_150 = arith.constant 0 : index
    %c0_151 = arith.constant 0 : index
    %163 = vector.load %arg13[%c4_149, %c0_150, %c0_151] : memref<5x288x224xbf16, #tpu.memory_space<vmem>>, vector<1x288x224xbf16>
    %164 = vector.shape_cast %163 : vector<1x288x224xbf16> to vector<288x224xbf16>
    %c0_152 = arith.constant 0 : index
    %c2_153 = arith.constant 2 : index
    %c0_154 = arith.constant 0 : index
    %165 = vector.load %arg10[%c0_152, %c2_153, %c0_154] : memref<4x10x288xbf16, #tpu.memory_space<vmem>>, vector<1x8x288xbf16>
    %166 = vector.shape_cast %165 : vector<1x8x288xbf16> to vector<8x288xbf16>
    %cst_155 = arith.constant dense<0.000000e+00> : vector<8x224xf32>
    %167 = tpu.matmul %166, %164, %cst_155 {dimension_numbers = #tpu.dot_dimension_numbers<[1], [0], [0], [1], [0, 0, 1, 1], [], []>} : vector<8x288xbf16>, vector<288x224xbf16>, vector<8x224xf32> -> vector<8x224xf32>
    %168 = arith.addf %158, %167 : vector<8x224xf32>
    %c2_156 = arith.constant 2 : index
    %c2_157 = arith.constant 2 : index
    %c0_158 = arith.constant 0 : index
    %169 = vector.load %arg10[%c2_156, %c2_157, %c0_158] : memref<4x10x288xbf16, #tpu.memory_space<vmem>>, vector<1x6x288xbf16>
    %170 = vector.shape_cast %169 : vector<1x6x288xbf16> to vector<6x288xbf16>
    %cst_159 = arith.constant dense<0.000000e+00> : vector<6x224xf32>
    %171 = tpu.matmul %170, %164, %cst_159 {dimension_numbers = #tpu.dot_dimension_numbers<[1], [0], [0], [1], [0, 0, 1, 1], [], []>} : vector<6x288xbf16>, vector<288x224xbf16>, vector<6x224xf32> -> vector<6x224xf32>
    %172 = arith.addf %162, %171 : vector<6x224xf32>
    %c0_160 = arith.constant 0 : index
    %c0_161 = arith.constant 0 : index
    %173 = vector.load %arg4[%c0_160, %c0_161] : memref<1x224xf32, #tpu.memory_space<vmem>>, vector<1x224xf32>
    %174 = vector.broadcast %173 : vector<1x224xf32> to vector<8x224xf32>
    %175 = arith.addf %168, %174 : vector<8x224xf32>
    %cst_162 = arith.constant 0.000000e+00 : f32
    %176 = vector.broadcast %cst_162 : f32 to vector<8x224xf32>
    %177 = arith.maximumf %175, %176 : vector<8x224xf32>
    %178 = arith.truncf %177 : vector<8x224xf32> to vector<8x224xbf16>
    %c0_163 = arith.constant 0 : index
    %c0_164 = arith.constant 0 : index
    %c0_165 = arith.constant 0 : index
    %179 = vector.load %arg11[%c0_163, %c0_164, %c0_165] : memref<2x8x224xbf16, #tpu.memory_space<vmem>>, vector<1x8x224xbf16>
    %180 = vector.shape_cast %179 : vector<1x8x224xbf16> to vector<8x224xbf16>
    %181 = vector.shape_cast %178 : vector<8x224xbf16> to vector<1x8x224xbf16>
    tpu.vector_store %arg11[%c0_163, %c0_164, %c0_165], %181 {strides = array<i32>} : memref<2x8x224xbf16, #tpu.memory_space<vmem>>, vector<1x8x224xbf16>,
    %182 = vector.broadcast %173 : vector<1x224xf32> to vector<6x224xf32>
    %183 = arith.addf %172, %182 : vector<6x224xf32>
    %cst_166 = arith.constant 0.000000e+00 : f32
    %184 = vector.broadcast %cst_166 : f32 to vector<6x224xf32>
    %185 = arith.maximumf %183, %184 : vector<6x224xf32>
    %186 = arith.truncf %185 : vector<6x224xf32> to vector<6x224xbf16>
    %c1_167 = arith.constant 1 : index
    %c0_168 = arith.constant 0 : index
    %c0_169 = arith.constant 0 : index
    %187 = vector.load %arg11[%c1_167, %c0_168, %c0_169] : memref<2x8x224xbf16, #tpu.memory_space<vmem>>, vector<1x6x224xbf16>
    %188 = vector.shape_cast %187 : vector<1x6x224xbf16> to vector<6x224xbf16>
    %189 = vector.shape_cast %186 : vector<6x224xbf16> to vector<1x6x224xbf16>
    tpu.vector_store %arg11[%c1_167, %c0_168, %c0_169], %189 {strides = array<i32>} : memref<2x8x224xbf16, #tpu.memory_space<vmem>>, vector<1x6x224xbf16>,
    %c1_i32_170 = arith.constant 1 : i32
    %190 = tpu.memref_slice %arg15[%c1_i32_170] : memref<2x!tpu.dma_semaphore, #tpu.memory_space<semaphore_mem>> -> memref<1x!tpu.dma_semaphore, #tpu.memory_space<semaphore_mem>>
    %191 = tpu.memref_squeeze %190 : memref<1x!tpu.dma_semaphore, #tpu.memory_space<semaphore_mem>> -> memref<!tpu.dma_semaphore, #tpu.memory_space<semaphore_mem>>
    tpu.wait_dma2 semaphore(%191 : memref<!tpu.dma_semaphore, #tpu.memory_space<semaphore_mem>>) src(%arg5 : memref<5x224x64xbf16, #tpu.memory_space<any>>) dst(%arg14 : memref<5x224x64xbf16, #tpu.memory_space<vmem>>)
    %c0_171 = arith.constant 0 : index
    %c0_172 = arith.constant 0 : index
    %c0_173 = arith.constant 0 : index
    %192 = vector.load %arg14[%c0_171, %c0_172, %c0_173] : memref<5x224x64xbf16, #tpu.memory_space<vmem>>, vector<1x224x64xbf16>
    %193 = vector.shape_cast %192 : vector<1x224x64xbf16> to vector<224x64xbf16>
    %c0_174 = arith.constant 0 : index
    %c0_175 = arith.constant 0 : index
    %c0_176 = arith.constant 0 : index
    %194 = vector.load %arg11[%c0_174, %c0_175, %c0_176] : memref<2x8x224xbf16, #tpu.memory_space<vmem>>, vector<1x4x224xbf16>
    %195 = vector.shape_cast %194 : vector<1x4x224xbf16> to vector<4x224xbf16>
    %cst_177 = arith.constant dense<0.000000e+00> : vector<4x64xf32>
    %196 = tpu.matmul %195, %193, %cst_177 {dimension_numbers = #tpu.dot_dimension_numbers<[1], [0], [0], [1], [0, 0, 1, 1], [], []>} : vector<4x224xbf16>, vector<224x64xbf16>, vector<4x64xf32> -> vector<4x64xf32>
    %c1_178 = arith.constant 1 : index
    %c0_179 = arith.constant 0 : index
    %c0_180 = arith.constant 0 : index
    %197 = vector.load %arg14[%c1_178, %c0_179, %c0_180] : memref<5x224x64xbf16, #tpu.memory_space<vmem>>, vector<1x224x64xbf16>
    %198 = vector.shape_cast %197 : vector<1x224x64xbf16> to vector<224x64xbf16>
    %c1_181 = arith.constant 1 : index
    %c0_182 = arith.constant 0 : index
    %c0_183 = arith.constant 0 : index
    %199 = vector.load %arg11[%c1_181, %c0_182, %c0_183] : memref<2x8x224xbf16, #tpu.memory_space<vmem>>, vector<1x4x224xbf16>
    %200 = vector.shape_cast %199 : vector<1x4x224xbf16> to vector<4x224xbf16>
    %cst_184 = arith.constant dense<0.000000e+00> : vector<4x64xf32>
    %201 = tpu.matmul %200, %198, %cst_184 {dimension_numbers = #tpu.dot_dimension_numbers<[1], [0], [0], [1], [0, 0, 1, 1], [], []>} : vector<4x224xbf16>, vector<224x64xbf16>, vector<4x64xf32> -> vector<4x64xf32>
    %202 = arith.addf %196, %201 : vector<4x64xf32>
    %c2_185 = arith.constant 2 : index
    %c0_186 = arith.constant 0 : index
    %c0_187 = arith.constant 0 : index
    %203 = vector.load %arg14[%c2_185, %c0_186, %c0_187] : memref<5x224x64xbf16, #tpu.memory_space<vmem>>, vector<1x224x64xbf16>
    %204 = vector.shape_cast %203 : vector<1x224x64xbf16> to vector<224x64xbf16>
    %c0_188 = arith.constant 0 : index
    %c2_189 = arith.constant 2 : index
    %c0_190 = arith.constant 0 : index
    %205 = vector.load %arg11[%c0_188, %c2_189, %c0_190] : memref<2x8x224xbf16, #tpu.memory_space<vmem>>, vector<1x4x224xbf16>
    %206 = vector.shape_cast %205 : vector<1x4x224xbf16> to vector<4x224xbf16>
    %cst_191 = arith.constant dense<0.000000e+00> : vector<4x64xf32>
    %207 = tpu.matmul %206, %204, %cst_191 {dimension_numbers = #tpu.dot_dimension_numbers<[1], [0], [0], [1], [0, 0, 1, 1], [], []>} : vector<4x224xbf16>, vector<224x64xbf16>, vector<4x64xf32> -> vector<4x64xf32>
    %208 = arith.addf %202, %207 : vector<4x64xf32>
    %c3_192 = arith.constant 3 : index
    %c0_193 = arith.constant 0 : index
    %c0_194 = arith.constant 0 : index
    %209 = vector.load %arg14[%c3_192, %c0_193, %c0_194] : memref<5x224x64xbf16, #tpu.memory_space<vmem>>, vector<1x224x64xbf16>
    %210 = vector.shape_cast %209 : vector<1x224x64xbf16> to vector<224x64xbf16>
    %c1_195 = arith.constant 1 : index
    %c2_196 = arith.constant 2 : index
    %c0_197 = arith.constant 0 : index
    %211 = vector.load %arg11[%c1_195, %c2_196, %c0_197] : memref<2x8x224xbf16, #tpu.memory_space<vmem>>, vector<1x4x224xbf16>
    %212 = vector.shape_cast %211 : vector<1x4x224xbf16> to vector<4x224xbf16>
    %cst_198 = arith.constant dense<0.000000e+00> : vector<4x64xf32>
    %213 = tpu.matmul %212, %210, %cst_198 {dimension_numbers = #tpu.dot_dimension_numbers<[1], [0], [0], [1], [0, 0, 1, 1], [], []>} : vector<4x224xbf16>, vector<224x64xbf16>, vector<4x64xf32> -> vector<4x64xf32>
    %214 = arith.addf %208, %213 : vector<4x64xf32>
    %c4_199 = arith.constant 4 : index
    %c0_200 = arith.constant 0 : index
    %c0_201 = arith.constant 0 : index
    %215 = vector.load %arg14[%c4_199, %c0_200, %c0_201] : memref<5x224x64xbf16, #tpu.memory_space<vmem>>, vector<1x224x64xbf16>
    %216 = vector.shape_cast %215 : vector<1x224x64xbf16> to vector<224x64xbf16>
    %c0_202 = arith.constant 0 : index
    %c4_203 = arith.constant 4 : index
    %c0_204 = arith.constant 0 : index
    %217 = vector.load %arg11[%c0_202, %c4_203, %c0_204] : memref<2x8x224xbf16, #tpu.memory_space<vmem>>, vector<1x4x224xbf16>
    %218 = vector.shape_cast %217 : vector<1x4x224xbf16> to vector<4x224xbf16>
    %cst_205 = arith.constant dense<0.000000e+00> : vector<4x64xf32>
    %219 = tpu.matmul %218, %216, %cst_205 {dimension_numbers = #tpu.dot_dimension_numbers<[1], [0], [0], [1], [0, 0, 1, 1], [], []>} : vector<4x224xbf16>, vector<224x64xbf16>, vector<4x64xf32> -> vector<4x64xf32>
    %220 = arith.addf %214, %219 : vector<4x64xf32>
    %c0_206 = arith.constant 0 : index
    %c0_207 = arith.constant 0 : index
    %221 = vector.load %arg6[%c0_206, %c0_207] : memref<1x64xf32, #tpu.memory_space<vmem>>, vector<1x64xf32>
    %222 = vector.broadcast %221 : vector<1x64xf32> to vector<4x64xf32>
    %223 = arith.addf %220, %222 : vector<4x64xf32>
    %cst_208 = arith.constant 0.000000e+00 : f32
    %224 = vector.broadcast %cst_208 : f32 to vector<4x64xf32>
    %225 = arith.maximumf %223, %224 : vector<4x64xf32>
    %226 = arith.truncf %225 : vector<4x64xf32> to vector<4x64xbf16>
    %c0_209 = arith.constant 0 : index
    %c0_210 = arith.constant 0 : index
    %c0_211 = arith.constant 0 : index
    %227 = vector.load %arg12[%c0_209, %c0_210, %c0_211] : memref<1x4x64xbf16, #tpu.memory_space<vmem>>, vector<1x4x64xbf16>
    %228 = vector.shape_cast %227 : vector<1x4x64xbf16> to vector<4x64xbf16>
    %229 = vector.shape_cast %226 : vector<4x64xbf16> to vector<1x4x64xbf16>
    tpu.vector_store %arg12[%c0_209, %c0_210, %c0_211], %229 {strides = array<i32>} : memref<1x4x64xbf16, #tpu.memory_space<vmem>>, vector<1x4x64xbf16>,
    %c0_212 = arith.constant 0 : index
    %c0_213 = arith.constant 0 : index
    %c0_214 = arith.constant 0 : index
    %230 = vector.load %arg12[%c0_212, %c0_213, %c0_214] : memref<1x4x64xbf16, #tpu.memory_space<vmem>>, vector<1x2x64xbf16>
    %231 = vector.shape_cast %230 : vector<1x2x64xbf16> to vector<2x64xbf16>
    %c0_215 = arith.constant 0 : index
    %c0_216 = arith.constant 0 : index
    %c0_217 = arith.constant 0 : index
    %232 = vector.load %arg7[%c0_215, %c0_216, %c0_217] : memref<2x64x2xbf16, #tpu.memory_space<vmem>>, vector<1x64x2xbf16>
    %233 = vector.shape_cast %232 : vector<1x64x2xbf16> to vector<64x2xbf16>
    %cst_218 = arith.constant dense<0.000000e+00> : vector<2x2xf32>
    %234 = tpu.matmul %231, %233, %cst_218 {dimension_numbers = #tpu.dot_dimension_numbers<[1], [0], [0], [1], [0, 0, 1, 1], [], []>} : vector<2x64xbf16>, vector<64x2xbf16>, vector<2x2xf32> -> vector<2x2xf32>
    %c0_219 = arith.constant 0 : index
    %c2_220 = arith.constant 2 : index
    %c0_221 = arith.constant 0 : index
    %235 = vector.load %arg12[%c0_219, %c2_220, %c0_221] : memref<1x4x64xbf16, #tpu.memory_space<vmem>>, vector<1x2x64xbf16>
    %236 = vector.shape_cast %235 : vector<1x2x64xbf16> to vector<2x64xbf16>
    %c1_222 = arith.constant 1 : index
    %c0_223 = arith.constant 0 : index
    %c0_224 = arith.constant 0 : index
    %237 = vector.load %arg7[%c1_222, %c0_223, %c0_224] : memref<2x64x2xbf16, #tpu.memory_space<vmem>>, vector<1x64x2xbf16>
    %238 = vector.shape_cast %237 : vector<1x64x2xbf16> to vector<64x2xbf16>
    %cst_225 = arith.constant dense<0.000000e+00> : vector<2x2xf32>
    %239 = tpu.matmul %236, %238, %cst_225 {dimension_numbers = #tpu.dot_dimension_numbers<[1], [0], [0], [1], [0, 0, 1, 1], [], []>} : vector<2x64xbf16>, vector<64x2xbf16>, vector<2x2xf32> -> vector<2x2xf32>
    %240 = arith.addf %234, %239 : vector<2x2xf32>
    %c0_226 = arith.constant 0 : index
    %c0_227 = arith.constant 0 : index
    %241 = vector.load %arg8[%c0_226, %c0_227] : memref<1x2xf32, #tpu.memory_space<vmem>>, vector<1x2xf32>
    %242 = vector.broadcast %241 : vector<1x2xf32> to vector<2x2xf32>
    %243 = arith.addf %240, %242 : vector<2x2xf32>
    %c0_228 = arith.constant 0 : index
    %c0_229 = arith.constant 0 : index
    %244 = vector.load %arg9[%c0_228, %c0_229] : memref<2x2xf32, #tpu.memory_space<vmem>>, vector<2x2xf32>
    tpu.vector_store %arg9[%c0_228, %c0_229], %243 {strides = array<i32>} : memref<2x2xf32, #tpu.memory_space<vmem>>, vector<2x2xf32>,
    return
  }
}

</mosaic_0001>

<bundles_post_ra>
// kernel: dqn_forward.1
= control target key start
LH: loop header
LB: loop body
LE: loop exit
PB: predicated region body
PF: predicated region fallthrough
CT: control target
= control target key end

     0   :  { %14 = vsyncpa [#allocation9], 0  ;;  %s11074_s0 = inlined_call_operand.vmem [shape: bf16[8,10,120], index: 0, kind: input, shape index: {}]   ;;  %s11075_s1 = inlined_call_operand.vmem [shape: bf16[5,120,288], index: 1, kind: input, shape index: {}]   ;;  %s11076_s2 = inlined_call_operand.vmem [shape: f32[1,288], index: 2, kind: input, shape index: {}]   ;;  %s11077_s3 = inlined_call_operand.vmem [shape: bf16[5,288,224], index: 3, kind: input, shape index: {}]   ;;  %s11078_s4 = inlined_call_operand.vmem [shape: f32[1,224], index: 4, kind: input, shape index: {}]   ;;  %s11079_s5 = inlined_call_operand.vmem [shape: bf16[5,224,64], index: 5, kind: input, shape index: {}]   ;;  %s11080_s6 = inlined_call_operand.vmem [shape: f32[1,64], index: 6, kind: input, shape index: {}]   ;;  %s11081_s7 = inlined_call_operand.vmem [shape: bf16[2,64,2], index: 7, kind: input, shape index: {}]   ;;  %s11082_s8 = inlined_call_operand.vmem [shape: f32[1,2], index: 8, kind: input, shape index: {}]   ;;  %s11083_s9 = inlined_call_operand.hbm [shape: f32[2,2], index: 9, kind: output, shape index: {}]  }
   0x1   :  { %v47_v0 = vld [vmem:[%s11077_s3] sm:$0xf]  ;;  %v49_v1 = vld [vmem:[%s11077_s3 + $0x8] sm:$0xf]  ;;  %v51_v2 = vld [vmem:[%s11077_s3 + $0x4] sm:$0xf] }
   0x2   :  { %48 = vst [vmem:[#allocation5] sm:$0xf] %v47_v0  ;;  %50 = vst [vmem:[#allocation5 + $0x4] sm:$0xf] %v49_v1  ;;  %v53_v3 = vld [vmem:[%s11077_s3 + $0xc] sm:$0xff]   ;;  %v61_v6 = vld [vmem:[%s11077_s3 + $0x1c] sm:$0xff]  }
   0x3   :  { %v57_v4 = vld [vmem:[%s11077_s3 + $0x18] sm:$0xf]  ;;  %52 = vst [vmem:[#allocation5 + $0x8] sm:$0xf] %v51_v2  ;;  %54 = vst [vmem:[#allocation5 + $0xc] sm:$0xff] %v53_v3   ;;  %v69_v9 = vld [vmem:[%s11077_s3 + $0x2c] sm:$0xff]  }
   0x4   :  { %58 = vst [vmem:[#allocation5 + $0x14] sm:$0xf] %v57_v4  ;;  %v59_v5 = vld [vmem:[%s11077_s3 + $0x14] sm:$0xf]  ;;  %v65_v7 = vld [vmem:[%s11077_s3 + $0x28] sm:$0xf] }
   0x5   :  { %60 = vst [vmem:[#allocation5 + $0x18] sm:$0xf] %v59_v5  ;;  %62 = vst [vmem:[#allocation5 + $0x1c] sm:$0xff] %v61_v6   ;;  %v67_v8 = vld [vmem:[%s11077_s3 + $0x24] sm:$0xf]  ;;  %v77_v12 = vld [vmem:[%s11077_s3 + $0x3c] sm:$0xff]  }
   0x6   :  { %66 = vst [vmem:[#allocation5 + $0x24] sm:$0xf] %v65_v7  ;;  %v73_v10 = vld [vmem:[%s11077_s3 + $0x38] sm:$0xf]  ;;  %68 = vst [vmem:[#allocation5 + $0x28] sm:$0xf] %v67_v8 }
   0x7   :  { %70 = vst [vmem:[#allocation5 + $0x2c] sm:$0xff] %v69_v9   ;;  %74 = vst [vmem:[#allocation5 + $0x34] sm:$0xf] %v73_v10  ;;  %v75_v11 = vld [vmem:[%s11077_s3 + $0x34] sm:$0xf]  ;;  %v85_v15 = vld [vmem:[%s11077_s3 + $0x4c] sm:$0xff]  }
   0x8   :  { %v81_v13 = vld [vmem:[%s11077_s3 + $0x48] sm:$0xf]  ;;  %76 = vst [vmem:[#allocation5 + $0x38] sm:$0xf] %v75_v11  ;;  %78 = vst [vmem:[#allocation5 + $0x3c] sm:$0xff] %v77_v12   ;;  %v93_v18 = vld [vmem:[%s11077_s3 + $0x5c] sm:$0xff]  }
   0x9   :  { %82 = vst [vmem:[#allocation5 + $0x44] sm:$0xf] %v81_v13  ;;  %v83_v14 = vld [vmem:[%s11077_s3 + $0x44] sm:$0xf]  ;;  %v89_v16 = vld [vmem:[%s11077_s3 + $0x58] sm:$0xf] }
   0xa   :  { %84 = vst [vmem:[#allocation5 + $0x48] sm:$0xf] %v83_v14  ;;  %86 = vst [vmem:[#allocation5 + $0x4c] sm:$0xff] %v85_v15   ;;  %v91_v17 = vld [vmem:[%s11077_s3 + $0x54] sm:$0xf]  ;;  %v101_v21 = vld [vmem:[%s11077_s3 + $0x6c] sm:$0xff]  }
   0xb   :  { %90 = vst [vmem:[#allocation5 + $0x54] sm:$0xf] %v89_v16  ;;  %v97_v19 = vld [vmem:[%s11077_s3 + $0x68] sm:$0xf]  ;;  %92 = vst [vmem:[#allocation5 + $0x58] sm:$0xf] %v91_v17 }
   0xc   :  { %94 = vst [vmem:[#allocation5 + $0x5c] sm:$0xff] %v93_v18   ;;  %98 = vst [vmem:[#allocation5 + $0x64] sm:$0xf] %v97_v19  ;;  %v99_v20 = vld [vmem:[%s11077_s3 + $0x64] sm:$0xf]  ;;  %v109_v24 = vld [vmem:[%s11077_s3 + $0x7c] sm:$0xff]  }
   0xd   :  { %v105_v22 = vld [vmem:[%s11077_s3 + $0x78] sm:$0xf]  ;;  %100 = vst [vmem:[#allocation5 + $0x68] sm:$0xf] %v99_v20  ;;  %102 = vst [vmem:[#allocation5 + $0x6c] sm:$0xff] %v101_v21   ;;  %v117_v27 = vld [vmem:[%s11077_s3 + $0x8c] sm:$0xff]  }
   0xe   :  { %106 = vst [vmem:[#allocation5 + $0x74] sm:$0xf] %v105_v22  ;;  %v107_v23 = vld [vmem:[%s11077_s3 + $0x74] sm:$0xf]  ;;  %v113_v25 = vld [vmem:[%s11077_s3 + $0x88] sm:$0xf] }
   0xf   :  { %108 = vst [vmem:[#allocation5 + $0x78] sm:$0xf] %v107_v23  ;;  %110 = vst [vmem:[#allocation5 + $0x7c] sm:$0xff] %v109_v24   ;;  %v115_v26 = vld [vmem:[%s11077_s3 + $0x84] sm:$0xf]  ;;  %v125_v30 = vld [vmem:[%s11077_s3 + $0x9c] sm:$0xff]  }
  0x10   :  { %114 = vst [vmem:[#allocation5 + $0x84] sm:$0xf] %v113_v25  ;;  %v121_v28 = vld [vmem:[%s11077_s3 + $0x98] sm:$0xf]  ;;  %116 = vst [vmem:[#allocation5 + $0x88] sm:$0xf] %v115_v26 }
  0x11   :  { %118 = vst [vmem:[#allocation5 + $0x8c] sm:$0xff] %v117_v27   ;;  %122 = vst [vmem:[#allocation5 + $0x94] sm:$0xf] %v121_v28  ;;  %v123_v29 = vld [vmem:[%s11077_s3 + $0x94] sm:$0xf]  ;;  %v133_v33 = vld [vmem:[%s11077_s3 + $0xac] sm:$0xff]  }
  0x12   :  { %v129_v31 = vld [vmem:[%s11077_s3 + $0xa8] sm:$0xf]  ;;  %124 = vst [vmem:[#allocation5 + $0x98] sm:$0xf] %v123_v29  ;;  %126 = vst [vmem:[#allocation5 + $0x9c] sm:$0xff] %v125_v30   ;;  %v141_v36 = vld [vmem:[%s11077_s3 + $0xbc] sm:$0xff]  }
  0x13   :  { %130 = vst [vmem:[#allocation5 + $0xa4] sm:$0xf] %v129_v31  ;;  %v131_v32 = vld [vmem:[%s11077_s3 + $0xa4] sm:$0xf]  ;;  %v137_v34 = vld [vmem:[%s11077_s3 + $0xb8] sm:$0xf] }
  0x14   :  { %132 = vst [vmem:[#allocation5 + $0xa8] sm:$0xf] %v131_v32  ;;  %134 = vst [vmem:[#allocation5 + $0xac] sm:$0xff] %v133_v33   ;;  %v139_v35 = vld [vmem:[%s11077_s3 + $0xb4] sm:$0xf]  ;;  %v149_v39 = vld [vmem:[%s11077_s3 + $0xcc] sm:$0xff]  }
  0x15   :  { %138 = vst [vmem:[#allocation5 + $0xb4] sm:$0xf] %v137_v34  ;;  %v145_v37 = vld [vmem:[%s11077_s3 + $0xc8] sm:$0xf]  ;;  %140 = vst [vmem:[#allocation5 + $0xb8] sm:$0xf] %v139_v35 }
  0x16   :  { %142 = vst [vmem:[#allocation5 + $0xbc] sm:$0xff] %v141_v36   ;;  %146 = vst [vmem:[#allocation5 + $0xc4] sm:$0xf] %v145_v37  ;;  %v147_v38 = vld [vmem:[%s11077_s3 + $0xc4] sm:$0xf]  ;;  %v157_v42 = vld [vmem:[%s11077_s3 + $0xdc] sm:$0xff]  }
  0x17   :  { %v153_v40 = vld [vmem:[%s11077_s3 + $0xd8] sm:$0xf]  ;;  %148 = vst [vmem:[#allocation5 + $0xc8] sm:$0xf] %v147_v38  ;;  %150 = vst [vmem:[#allocation5 + $0xcc] sm:$0xff] %v149_v39   ;;  %v165_v45 = vld [vmem:[%s11077_s3 + $0xec] sm:$0xff]  }
  0x18   :  { %154 = vst [vmem:[#allocation5 + $0xd4] sm:$0xf] %v153_v40  ;;  %v155_v41 = vld [vmem:[%s11077_s3 + $0xd4] sm:$0xf]  ;;  %v161_v43 = vld [vmem:[%s11077_s3 + $0xe8] sm:$0xf] }
  0x19   :  { %156 = vst [vmem:[#allocation5 + $0xd8] sm:$0xf] %v155_v41  ;;  %158 = vst [vmem:[#allocation5 + $0xdc] sm:$0xff] %v157_v42   ;;  %v163_v44 = vld [vmem:[%s11077_s3 + $0xe4] sm:$0xf]  ;;  %v173_v48 = vld [vmem:[%s11077_s3 + $0xfc] sm:$0xff]  }
  0x1a   :  { %162 = vst [vmem:[#allocation5 + $0xe4] sm:$0xf] %v161_v43  ;;  %v169_v46 = vld [vmem:[%s11077_s3 + $0xf8] sm:$0xf]  ;;  %164 = vst [vmem:[#allocation5 + $0xe8] sm:$0xf] %v163_v44 }
  0x1b   :  { %166 = vst [vmem:[#allocation5 + $0xec] sm:$0xff] %v165_v45   ;;  %170 = vst [vmem:[#allocation5 + $0xf4] sm:$0xf] %v169_v46  ;;  %v171_v47 = vld [vmem:[%s11077_s3 + $0xf4] sm:$0xf]  ;;  %v181_v51 = vld [vmem:[%s11077_s3 + $0x10c] sm:$0xff]  }
  0x1c   :  { %v177_v49 = vld [vmem:[%s11077_s3 + $0x108] sm:$0xf]  ;;  %172 = vst [vmem:[#allocation5 + $0xf8] sm:$0xf] %v171_v47  ;;  %174 = vst [vmem:[#allocation5 + $0xfc] sm:$0xff] %v173_v48   ;;  %v189_v54 = vld [vmem:[%s11077_s3 + $0x11c] sm:$0xff]  }
  0x1d   :  { %178 = vst [vmem:[#allocation5 + $0x104] sm:$0xf] %v177_v49  ;;  %v179_v50 = vld [vmem:[%s11077_s3 + $0x104] sm:$0xf]  ;;  %v185_v52 = vld [vmem:[%s11077_s3 + $0x118] sm:$0xf] }
  0x1e   :  { %180 = vst [vmem:[#allocation5 + $0x108] sm:$0xf] %v179_v50  ;;  %182 = vst [vmem:[#allocation5 + $0x10c] sm:$0xff] %v181_v51   ;;  %v187_v53 = vld [vmem:[%s11077_s3 + $0x114] sm:$0xf]  ;;  %v197_v57 = vld [vmem:[%s11077_s3 + $0x12c] sm:$0xff]  }
  0x1f   :  { %186 = vst [vmem:[#allocation5 + $0x114] sm:$0xf] %v185_v52  ;;  %v193_v55 = vld [vmem:[%s11077_s3 + $0x128] sm:$0xf]  ;;  %188 = vst [vmem:[#allocation5 + $0x118] sm:$0xf] %v187_v53 }
  0x20   :  { %190 = vst [vmem:[#allocation5 + $0x11c] sm:$0xff] %v189_v54   ;;  %194 = vst [vmem:[#allocation5 + $0x124] sm:$0xf] %v193_v55  ;;  %v195_v56 = vld [vmem:[%s11077_s3 + $0x124] sm:$0xf]  ;;  %v205_v60 = vld [vmem:[%s11077_s3 + $0x13c] sm:$0xff]  }
  0x21   :  { %v201_v58 = vld [vmem:[%s11077_s3 + $0x138] sm:$0xf]  ;;  %196 = vst [vmem:[#allocation5 + $0x128] sm:$0xf] %v195_v56  ;;  %198 = vst [vmem:[#allocation5 + $0x12c] sm:$0xff] %v197_v57   ;;  %v213_v63 = vld [vmem:[%s11077_s3 + $0x14c] sm:$0xff]  }
  0x22   :  { %202 = vst [vmem:[#allocation5 + $0x134] sm:$0xf] %v201_v58  ;;  %v203_v59 = vld [vmem:[%s11077_s3 + $0x134] sm:$0xf]  ;;  %v209_v61 = vld [vmem:[%s11077_s3 + $0x148] sm:$0xf] }
  0x23   :  { %204 = vst [vmem:[#allocation5 + $0x138] sm:$0xf] %v203_v59  ;;  %206 = vst [vmem:[#allocation5 + $0x13c] sm:$0xff] %v205_v60   ;;  %v211_v62 = vld [vmem:[%s11077_s3 + $0x144] sm:$0xf]  ;;  %v221_v2 = vld [vmem:[%s11077_s3 + $0x15c] sm:$0xff]  }
  0x24   :  { %210 = vst [vmem:[#allocation5 + $0x144] sm:$0xf] %v209_v61  ;;  %v217_v0 = vld [vmem:[%s11077_s3 + $0x158] sm:$0xf]  ;;  %212 = vst [vmem:[#allocation5 + $0x148] sm:$0xf] %v211_v62 }
  0x25   :  { %214 = vst [vmem:[#allocation5 + $0x14c] sm:$0xff] %v213_v63   ;;  %218 = vst [vmem:[#allocation5 + $0x154] sm:$0xf] %v217_v0  ;;  %v219_v1 = vld [vmem:[%s11077_s3 + $0x154] sm:$0xf]  ;;  %v229_v5 = vld [vmem:[%s11077_s3 + $0x16c] sm:$0xff]  }
  0x26   :  { %v225_v3 = vld [vmem:[%s11077_s3 + $0x168] sm:$0xf]  ;;  %220 = vst [vmem:[#allocation5 + $0x158] sm:$0xf] %v219_v1  ;;  %222 = vst [vmem:[#allocation5 + $0x15c] sm:$0xff] %v221_v2   ;;  %v237_v8 = vld [vmem:[%s11077_s3 + $0x17c] sm:$0xff]  }
  0x27   :  { %226 = vst [vmem:[#allocation5 + $0x164] sm:$0xf] %v225_v3  ;;  %v227_v4 = vld [vmem:[%s11077_s3 + $0x164] sm:$0xf]  ;;  %v233_v6 = vld [vmem:[%s11077_s3 + $0x178] sm:$0xf] }
  0x28   :  { %228 = vst [vmem:[#allocation5 + $0x168] sm:$0xf] %v227_v4  ;;  %230 = vst [vmem:[#allocation5 + $0x16c] sm:$0xff] %v229_v5   ;;  %v235_v7 = vld [vmem:[%s11077_s3 + $0x174] sm:$0xf]  ;;  %v245_v11 = vld [vmem:[%s11077_s3 + $0x18c] sm:$0xff]  }
  0x29   :  { %234 = vst [vmem:[#allocation5 + $0x174] sm:$0xf] %v233_v6  ;;  %v241_v9 = vld [vmem:[%s11077_s3 + $0x188] sm:$0xf]  ;;  %236 = vst [vmem:[#allocation5 + $0x178] sm:$0xf] %v235_v7 }
  0x2a   :  { %238 = vst [vmem:[#allocation5 + $0x17c] sm:$0xff] %v237_v8   ;;  %242 = vst [vmem:[#allocation5 + $0x184] sm:$0xf] %v241_v9  ;;  %v243_v10 = vld [vmem:[%s11077_s3 + $0x184] sm:$0xf]  ;;  %v253_v14 = vld [vmem:[%s11077_s3 + $0x19c] sm:$0xff]  }
  0x2b   :  { %v249_v12 = vld [vmem:[%s11077_s3 + $0x198] sm:$0xf]  ;;  %244 = vst [vmem:[#allocation5 + $0x188] sm:$0xf] %v243_v10  ;;  %246 = vst [vmem:[#allocation5 + $0x18c] sm:$0xff] %v245_v11   ;;  %v261_v17 = vld [vmem:[%s11077_s3 + $0x1ac] sm:$0xff]  }
  0x2c   :  { %250 = vst [vmem:[#allocation5 + $0x194] sm:$0xf] %v249_v12  ;;  %v251_v13 = vld [vmem:[%s11077_s3 + $0x194] sm:$0xf]  ;;  %v257_v15 = vld [vmem:[%s11077_s3 + $0x1a8] sm:$0xf] }
  0x2d   :  { %252 = vst [vmem:[#allocation5 + $0x198] sm:$0xf] %v251_v13  ;;  %254 = vst [vmem:[#allocation5 + $0x19c] sm:$0xff] %v253_v14   ;;  %v259_v16 = vld [vmem:[%s11077_s3 + $0x1a4] sm:$0xf]  ;;  %v269_v20 = vld [vmem:[%s11077_s3 + $0x1bc] sm:$0xff]  }
  0x2e   :  { %258 = vst [vmem:[#allocation5 + $0x1a4] sm:$0xf] %v257_v15  ;;  %v265_v18 = vld [vmem:[%s11077_s3 + $0x1b8] sm:$0xf]  ;;  %260 = vst [vmem:[#allocation5 + $0x1a8] sm:$0xf] %v259_v16 }
  0x2f   :  { %262 = vst [vmem:[#allocation5 + $0x1ac] sm:$0xff] %v261_v17   ;;  %266 = vst [vmem:[#allocation5 + $0x1b4] sm:$0xf] %v265_v18  ;;  %v267_v19 = vld [vmem:[%s11077_s3 + $0x1b4] sm:$0xf]  ;;  %v277_v23 = vld [vmem:[%s11077_s3 + $0x1cc] sm:$0xff]  }
  0x30   :  { %v273_v21 = vld [vmem:[%s11077_s3 + $0x1c8] sm:$0xf]  ;;  %268 = vst [vmem:[#allocation5 + $0x1b8] sm:$0xf] %v267_v19  ;;  %270 = vst [vmem:[#allocation5 + $0x1bc] sm:$0xff] %v269_v20   ;;  %v285_v26 = vld [vmem:[%s11077_s3 + $0x1dc] sm:$0xff]  }
  0x31   :  { %274 = vst [vmem:[#allocation5 + $0x1c4] sm:$0xf] %v273_v21  ;;  %v275_v22 = vld [vmem:[%s11077_s3 + $0x1c4] sm:$0xf]  ;;  %v281_v24 = vld [vmem:[%s11077_s3 + $0x1d8] sm:$0xf] }
  0x32   :  { %276 = vst [vmem:[#allocation5 + $0x1c8] sm:$0xf] %v275_v22  ;;  %278 = vst [vmem:[#allocation5 + $0x1cc] sm:$0xff] %v277_v23   ;;  %v283_v25 = vld [vmem:[%s11077_s3 + $0x1d4] sm:$0xf]  ;;  %v293_v29 = vld [vmem:[%s11077_s3 + $0x1ec] sm:$0xff]  }
  0x33   :  { %282 = vst [vmem:[#allocation5 + $0x1d4] sm:$0xf] %v281_v24  ;;  %v289_v27 = vld [vmem:[%s11077_s3 + $0x1e8] sm:$0xf]  ;;  %284 = vst [vmem:[#allocation5 + $0x1d8] sm:$0xf] %v283_v25 }
  0x34   :  { %286 = vst [vmem:[#allocation5 + $0x1dc] sm:$0xff] %v285_v26   ;;  %290 = vst [vmem:[#allocation5 + $0x1e4] sm:$0xf] %v289_v27  ;;  %v291_v28 = vld [vmem:[%s11077_s3 + $0x1e4] sm:$0xf]  ;;  %v301_v32 = vld [vmem:[%s11077_s3 + $0x1fc] sm:$0xff]  }
  0x35   :  { %v297_v30 = vld [vmem:[%s11077_s3 + $0x1f8] sm:$0xf]  ;;  %292 = vst [vmem:[#allocation5 + $0x1e8] sm:$0xf] %v291_v28  ;;  %294 = vst [vmem:[#allocation5 + $0x1ec] sm:$0xff] %v293_v29   ;;  %v309_v35 = vld [vmem:[%s11077_s3 + $0x20c] sm:$0xff]  }
  0x36   :  { %298 = vst [vmem:[#allocation5 + $0x1f4] sm:$0xf] %v297_v30  ;;  %v299_v31 = vld [vmem:[%s11077_s3 + $0x1f4] sm:$0xf]  ;;  %v305_v33 = vld [vmem:[%s11077_s3 + $0x208] sm:$0xf] }
  0x37   :  { %300 = vst [vmem:[#allocation5 + $0x1f8] sm:$0xf] %v299_v31  ;;  %302 = vst [vmem:[#allocation5 + $0x1fc] sm:$0xff] %v301_v32   ;;  %v307_v34 = vld [vmem:[%s11077_s3 + $0x204] sm:$0xf]  ;;  %v317_v38 = vld [vmem:[%s11077_s3 + $0x21c] sm:$0xff]  }
  0x38   :  { %306 = vst [vmem:[#allocation5 + $0x204] sm:$0xf] %v305_v33  ;;  %v313_v36 = vld [vmem:[%s11077_s3 + $0x218] sm:$0xf]  ;;  %308 = vst [vmem:[#allocation5 + $0x208] sm:$0xf] %v307_v34 }
  0x39   :  { %310 = vst [vmem:[#allocation5 + $0x20c] sm:$0xff] %v309_v35   ;;  %314 = vst [vmem:[#allocation5 + $0x214] sm:$0xf] %v313_v36  ;;  %v315_v37 = vld [vmem:[%s11077_s3 + $0x214] sm:$0xf]  ;;  %v325_v41 = vld [vmem:[%s11077_s3 + $0x22c] sm:$0xff]  }
  0x3a   :  { %v321_v39 = vld [vmem:[%s11077_s3 + $0x228] sm:$0xf]  ;;  %316 = vst [vmem:[#allocation5 + $0x218] sm:$0xf] %v315_v37  ;;  %318 = vst [vmem:[#allocation5 + $0x21c] sm:$0xff] %v317_v38   ;;  %v333_v44 = vld [vmem:[%s11077_s3 + $0x23c] sm:$0xff]  }
  0x3b   :  { %322 = vst [vmem:[#allocation5 + $0x224] sm:$0xf] %v321_v39  ;;  %v323_v40 = vld [vmem:[%s11077_s3 + $0x224] sm:$0xf]  ;;  %v329_v42 = vld [vmem:[%s11077_s3 + $0x238] sm:$0xf] }
  0x3c   :  { %324 = vst [vmem:[#allocation5 + $0x228] sm:$0xf] %v323_v40  ;;  %326 = vst [vmem:[#allocation5 + $0x22c] sm:$0xff] %v325_v41   ;;  %v331_v43 = vld [vmem:[%s11077_s3 + $0x234] sm:$0xf]  ;;  %v341_v47 = vld [vmem:[%s11077_s3 + $0x24c] sm:$0xff]  }
  0x3d   :  { %330 = vst [vmem:[#allocation5 + $0x234] sm:$0xf] %v329_v42  ;;  %v337_v45 = vld [vmem:[%s11077_s3 + $0x248] sm:$0xf]  ;;  %332 = vst [vmem:[#allocation5 + $0x238] sm:$0xf] %v331_v43 }
  0x3e   :  { %334 = vst [vmem:[#allocation5 + $0x23c] sm:$0xff] %v333_v44   ;;  %338 = vst [vmem:[#allocation5 + $0x244] sm:$0xf] %v337_v45  ;;  %v339_v46 = vld [vmem:[%s11077_s3 + $0x244] sm:$0xf]  ;;  %v349_v50 = vld [vmem:[%s11077_s3 + $0x25c] sm:$0xff]  }
  0x3f   :  { %v345_v48 = vld [vmem:[%s11077_s3 + $0x258] sm:$0xf]  ;;  %340 = vst [vmem:[#allocation5 + $0x248] sm:$0xf] %v339_v46  ;;  %342 = vst [vmem:[#allocation5 + $0x24c] sm:$0xff] %v341_v47   ;;  %v357_v53 = vld [vmem:[%s11077_s3 + $0x26c] sm:$0xff]  }
  0x40   :  { %346 = vst [vmem:[#allocation5 + $0x254] sm:$0xf] %v345_v48  ;;  %v347_v49 = vld [vmem:[%s11077_s3 + $0x254] sm:$0xf]  ;;  %v353_v51 = vld [vmem:[%s11077_s3 + $0x268] sm:$0xf] }
  0x41   :  { %348 = vst [vmem:[#allocation5 + $0x258] sm:$0xf] %v347_v49  ;;  %350 = vst [vmem:[#allocation5 + $0x25c] sm:$0xff] %v349_v50   ;;  %v355_v52 = vld [vmem:[%s11077_s3 + $0x264] sm:$0xf]  ;;  %v365_v56 = vld [vmem:[%s11077_s3 + $0x27c] sm:$0xff]  }
  0x42   :  { %354 = vst [vmem:[#allocation5 + $0x264] sm:$0xf] %v353_v51  ;;  %v361_v54 = vld [vmem:[%s11077_s3 + $0x278] sm:$0xf]  ;;  %356 = vst [vmem:[#allocation5 + $0x268] sm:$0xf] %v355_v52 }
  0x43   :  { %358 = vst [vmem:[#allocation5 + $0x26c] sm:$0xff] %v357_v53   ;;  %362 = vst [vmem:[#allocation5 + $0x274] sm:$0xf] %v361_v54  ;;  %v363_v55 = vld [vmem:[%s11077_s3 + $0x274] sm:$0xf]  ;;  %v373_v59 = vld [vmem:[%s11077_s3 + $0x28c] sm:$0xff]  }
  0x44   :  { %v369_v57 = vld [vmem:[%s11077_s3 + $0x288] sm:$0xf]  ;;  %364 = vst [vmem:[#allocation5 + $0x278] sm:$0xf] %v363_v55  ;;  %366 = vst [vmem:[#allocation5 + $0x27c] sm:$0xff] %v365_v56   ;;  %v381_v62 = vld [vmem:[%s11077_s3 + $0x29c] sm:$0xff]  }
  0x45   :  { %370 = vst [vmem:[#allocation5 + $0x284] sm:$0xf] %v369_v57  ;;  %v371_v58 = vld [vmem:[%s11077_s3 + $0x284] sm:$0xf]  ;;  %v377_v60 = vld [vmem:[%s11077_s3 + $0x298] sm:$0xf] }
  0x46   :  { %372 = vst [vmem:[#allocation5 + $0x288] sm:$0xf] %v371_v58  ;;  %374 = vst [vmem:[#allocation5 + $0x28c] sm:$0xff] %v373_v59   ;;  %v379_v61 = vld [vmem:[%s11077_s3 + $0x294] sm:$0xf]  ;;  %v389_v1 = vld [vmem:[%s11077_s3 + $0x2ac] sm:$0xff]  }
  0x47   :  { %378 = vst [vmem:[#allocation5 + $0x294] sm:$0xf] %v377_v60  ;;  %v385_v63 = vld [vmem:[%s11077_s3 + $0x2a8] sm:$0xf]  ;;  %380 = vst [vmem:[#allocation5 + $0x298] sm:$0xf] %v379_v61 }
  0x48   :  { %382 = vst [vmem:[#allocation5 + $0x29c] sm:$0xff] %v381_v62   ;;  %386 = vst [vmem:[#allocation5 + $0x2a4] sm:$0xf] %v385_v63  ;;  %v387_v0 = vld [vmem:[%s11077_s3 + $0x2a4] sm:$0xf]  ;;  %v397_v4 = vld [vmem:[%s11077_s3 + $0x2bc] sm:$0xff]  }
  0x49   :  { %v393_v2 = vld [vmem:[%s11077_s3 + $0x2b8] sm:$0xf]  ;;  %388 = vst [vmem:[#allocation5 + $0x2a8] sm:$0xf] %v387_v0  ;;  %390 = vst [vmem:[#allocation5 + $0x2ac] sm:$0xff] %v389_v1   ;;  %v405_v7 = vld [vmem:[%s11077_s3 + $0x2cc] sm:$0xff]  }
  0x4a   :  { %394 = vst [vmem:[#allocation5 + $0x2b4] sm:$0xf] %v393_v2  ;;  %v395_v3 = vld [vmem:[%s11077_s3 + $0x2b4] sm:$0xf]  ;;  %v401_v5 = vld [vmem:[%s11077_s3 + $0x2c8] sm:$0xf] }
  0x4b   :  { %396 = vst [vmem:[#allocation5 + $0x2b8] sm:$0xf] %v395_v3  ;;  %398 = vst [vmem:[#allocation5 + $0x2bc] sm:$0xff] %v397_v4   ;;  %v403_v6 = vld [vmem:[%s11077_s3 + $0x2c4] sm:$0xf]  ;;  %v413_v10 = vld [vmem:[%s11077_s3 + $0x2dc] sm:$0xff]  }
  0x4c   :  { %402 = vst [vmem:[#allocation5 + $0x2c4] sm:$0xf] %v401_v5  ;;  %v409_v8 = vld [vmem:[%s11077_s3 + $0x2d8] sm:$0xf]  ;;  %404 = vst [vmem:[#allocation5 + $0x2c8] sm:$0xf] %v403_v6 }
  0x4d   :  { %406 = vst [vmem:[#allocation5 + $0x2cc] sm:$0xff] %v405_v7   ;;  %410 = vst [vmem:[#allocation5 + $0x2d4] sm:$0xf] %v409_v8  ;;  %v411_v9 = vld [vmem:[%s11077_s3 + $0x2d4] sm:$0xf]  ;;  %v421_v13 = vld [vmem:[%s11077_s3 + $0x2ec] sm:$0xff]  }
  0x4e   :  { %v417_v11 = vld [vmem:[%s11077_s3 + $0x2e8] sm:$0xf]  ;;  %412 = vst [vmem:[#allocation5 + $0x2d8] sm:$0xf] %v411_v9  ;;  %414 = vst [vmem:[#allocation5 + $0x2dc] sm:$0xff] %v413_v10   ;;  %v429_v16 = vld [vmem:[%s11077_s3 + $0x2fc] sm:$0xff]  }
  0x4f   :  { %418 = vst [vmem:[#allocation5 + $0x2e4] sm:$0xf] %v417_v11  ;;  %v419_v12 = vld [vmem:[%s11077_s3 + $0x2e4] sm:$0xf]  ;;  %v425_v14 = vld [vmem:[%s11077_s3 + $0x2f8] sm:$0xf] }
  0x50   :  { %420 = vst [vmem:[#allocation5 + $0x2e8] sm:$0xf] %v419_v12  ;;  %422 = vst [vmem:[#allocation5 + $0x2ec] sm:$0xff] %v421_v13   ;;  %v427_v15 = vld [vmem:[%s11077_s3 + $0x2f4] sm:$0xf]  ;;  %v437_v19 = vld [vmem:[%s11077_s3 + $0x30c] sm:$0xff]  }
  0x51   :  { %426 = vst [vmem:[#allocation5 + $0x2f4] sm:$0xf] %v425_v14  ;;  %v433_v17 = vld [vmem:[%s11077_s3 + $0x308] sm:$0xf]  ;;  %428 = vst [vmem:[#allocation5 + $0x2f8] sm:$0xf] %v427_v15 }
  0x52   :  { %430 = vst [vmem:[#allocation5 + $0x2fc] sm:$0xff] %v429_v16   ;;  %434 = vst [vmem:[#allocation5 + $0x304] sm:$0xf] %v433_v17  ;;  %v435_v18 = vld [vmem:[%s11077_s3 + $0x304] sm:$0xf]  ;;  %v445_v22 = vld [vmem:[%s11077_s3 + $0x31c] sm:$0xff]  }
  0x53   :  { %v441_v20 = vld [vmem:[%s11077_s3 + $0x318] sm:$0xf]  ;;  %436 = vst [vmem:[#allocation5 + $0x308] sm:$0xf] %v435_v18  ;;  %438 = vst [vmem:[#allocation5 + $0x30c] sm:$0xff] %v437_v19   ;;  %v453_v25 = vld [vmem:[%s11077_s3 + $0x32c] sm:$0xff]  }
  0x54   :  { %442 = vst [vmem:[#allocation5 + $0x314] sm:$0xf] %v441_v20  ;;  %v443_v21 = vld [vmem:[%s11077_s3 + $0x314] sm:$0xf]  ;;  %v449_v23 = vld [vmem:[%s11077_s3 + $0x328] sm:$0xf] }
  0x55   :  { %444 = vst [vmem:[#allocation5 + $0x318] sm:$0xf] %v443_v21  ;;  %446 = vst [vmem:[#allocation5 + $0x31c] sm:$0xff] %v445_v22   ;;  %v451_v24 = vld [vmem:[%s11077_s3 + $0x324] sm:$0xf]  ;;  %v461_v28 = vld [vmem:[%s11077_s3 + $0x33c] sm:$0xff]  }
  0x56   :  { %450 = vst [vmem:[#allocation5 + $0x324] sm:$0xf] %v449_v23  ;;  %v457_v26 = vld [vmem:[%s11077_s3 + $0x338] sm:$0xf]  ;;  %452 = vst [vmem:[#allocation5 + $0x328] sm:$0xf] %v451_v24 }
  0x57   :  { %454 = vst [vmem:[#allocation5 + $0x32c] sm:$0xff] %v453_v25   ;;  %458 = vst [vmem:[#allocation5 + $0x334] sm:$0xf] %v457_v26  ;;  %v459_v27 = vld [vmem:[%s11077_s3 + $0x334] sm:$0xf]  ;;  %v469_v31 = vld [vmem:[%s11077_s3 + $0x34c] sm:$0xff]  }
  0x58   :  { %v465_v29 = vld [vmem:[%s11077_s3 + $0x348] sm:$0xf]  ;;  %460 = vst [vmem:[#allocation5 + $0x338] sm:$0xf] %v459_v27  ;;  %462 = vst [vmem:[#allocation5 + $0x33c] sm:$0xff] %v461_v28   ;;  %v477_v34 = vld [vmem:[%s11077_s3 + $0x35c] sm:$0xff]  }
  0x59   :  { %466 = vst [vmem:[#allocation5 + $0x344] sm:$0xf] %v465_v29  ;;  %v467_v30 = vld [vmem:[%s11077_s3 + $0x344] sm:$0xf]  ;;  %v473_v32 = vld [vmem:[%s11077_s3 + $0x358] sm:$0xf] }
  0x5a   :  { %468 = vst [vmem:[#allocation5 + $0x348] sm:$0xf] %v467_v30  ;;  %470 = vst [vmem:[#allocation5 + $0x34c] sm:$0xff] %v469_v31   ;;  %v475_v33 = vld [vmem:[%s11077_s3 + $0x354] sm:$0xf]  ;;  %v485_v37 = vld [vmem:[%s11077_s3 + $0x36c] sm:$0xff]  }
  0x5b   :  { %474 = vst [vmem:[#allocation5 + $0x354] sm:$0xf] %v473_v32  ;;  %v481_v35 = vld [vmem:[%s11077_s3 + $0x368] sm:$0xf]  ;;  %476 = vst [vmem:[#allocation5 + $0x358] sm:$0xf] %v475_v33 }
  0x5c   :  { %478 = vst [vmem:[#allocation5 + $0x35c] sm:$0xff] %v477_v34   ;;  %482 = vst [vmem:[#allocation5 + $0x364] sm:$0xf] %v481_v35  ;;  %v483_v36 = vld [vmem:[%s11077_s3 + $0x364] sm:$0xf]  ;;  %v493_v40 = vld [vmem:[%s11077_s3 + $0x37c] sm:$0xff]  }
  0x5d   :  { %v489_v38 = vld [vmem:[%s11077_s3 + $0x378] sm:$0xf]  ;;  %484 = vst [vmem:[#allocation5 + $0x368] sm:$0xf] %v483_v36  ;;  %486 = vst [vmem:[#allocation5 + $0x36c] sm:$0xff] %v485_v37   ;;  %v501_v43 = vld [vmem:[%s11077_s3 + $0x38c] sm:$0xff]  }
  0x5e   :  { %490 = vst [vmem:[#allocation5 + $0x374] sm:$0xf] %v489_v38  ;;  %v491_v39 = vld [vmem:[%s11077_s3 + $0x374] sm:$0xf]  ;;  %v497_v41 = vld [vmem:[%s11077_s3 + $0x388] sm:$0xf] }
  0x5f   :  { %492 = vst [vmem:[#allocation5 + $0x378] sm:$0xf] %v491_v39  ;;  %494 = vst [vmem:[#allocation5 + $0x37c] sm:$0xff] %v493_v40   ;;  %v499_v42 = vld [vmem:[%s11077_s3 + $0x384] sm:$0xf]  ;;  %v509_v46 = vld [vmem:[%s11077_s3 + $0x39c] sm:$0xff]  }
  0x60   :  { %498 = vst [vmem:[#allocation5 + $0x384] sm:$0xf] %v497_v41  ;;  %v505_v44 = vld [vmem:[%s11077_s3 + $0x398] sm:$0xf]  ;;  %500 = vst [vmem:[#allocation5 + $0x388] sm:$0xf] %v499_v42 }
  0x61   :  { %502 = vst [vmem:[#allocation5 + $0x38c] sm:$0xff] %v501_v43   ;;  %506 = vst [vmem:[#allocation5 + $0x394] sm:$0xf] %v505_v44  ;;  %v507_v45 = vld [vmem:[%s11077_s3 + $0x394] sm:$0xf]  ;;  %v517_v49 = vld [vmem:[%s11077_s3 + $0x3ac] sm:$0xff]  }
  0x62   :  { %v513_v47 = vld [vmem:[%s11077_s3 + $0x3a8] sm:$0xf]  ;;  %508 = vst [vmem:[#allocation5 + $0x398] sm:$0xf] %v507_v45  ;;  %510 = vst [vmem:[#allocation5 + $0x39c] sm:$0xff] %v509_v46   ;;  %v525_v52 = vld [vmem:[%s11077_s3 + $0x3bc] sm:$0xff]  }
  0x63   :  { %514 = vst [vmem:[#allocation5 + $0x3a4] sm:$0xf] %v513_v47  ;;  %v515_v48 = vld [vmem:[%s11077_s3 + $0x3a4] sm:$0xf]  ;;  %v521_v50 = vld [vmem:[%s11077_s3 + $0x3b8] sm:$0xf] }
  0x64   :  { %516 = vst [vmem:[#allocation5 + $0x3a8] sm:$0xf] %v515_v48  ;;  %518 = vst [vmem:[#allocation5 + $0x3ac] sm:$0xff] %v517_v49   ;;  %v523_v51 = vld [vmem:[%s11077_s3 + $0x3b4] sm:$0xf]  ;;  %v533_v55 = vld [vmem:[%s11077_s3 + $0x3cc] sm:$0xff]  }
  0x65   :  { %522 = vst [vmem:[#allocation5 + $0x3b4] sm:$0xf] %v521_v50  ;;  %v529_v53 = vld [vmem:[%s11077_s3 + $0x3c8] sm:$0xf]  ;;  %524 = vst [vmem:[#allocation5 + $0x3b8] sm:$0xf] %v523_v51 }
  0x66   :  { %526 = vst [vmem:[#allocation5 + $0x3bc] sm:$0xff] %v525_v52   ;;  %530 = vst [vmem:[#allocation5 + $0x3c4] sm:$0xf] %v529_v53  ;;  %v531_v54 = vld [vmem:[%s11077_s3 + $0x3c4] sm:$0xf]  ;;  %v541_v58 = vld [vmem:[%s11077_s3 + $0x3dc] sm:$0xff]  }
  0x67   :  { %v537_v56 = vld [vmem:[%s11077_s3 + $0x3d8] sm:$0xf]  ;;  %532 = vst [vmem:[#allocation5 + $0x3c8] sm:$0xf] %v531_v54  ;;  %534 = vst [vmem:[#allocation5 + $0x3cc] sm:$0xff] %v533_v55   ;;  %v549_v61 = vld [vmem:[%s11077_s3 + $0x3ec] sm:$0xff]  }
  0x68   :  { %538 = vst [vmem:[#allocation5 + $0x3d4] sm:$0xf] %v537_v56  ;;  %v539_v57 = vld [vmem:[%s11077_s3 + $0x3d4] sm:$0xf]  ;;  %v545_v59 = vld [vmem:[%s11077_s3 + $0x3e8] sm:$0xf] }
  0x69   :  { %540 = vst [vmem:[#allocation5 + $0x3d8] sm:$0xf] %v539_v57  ;;  %542 = vst [vmem:[#allocation5 + $0x3dc] sm:$0xff] %v541_v58   ;;  %v547_v60 = vld [vmem:[%s11077_s3 + $0x3e4] sm:$0xf]  ;;  %v557_v0 = vld [vmem:[%s11077_s3 + $0x3fc] sm:$0xff]  }
  0x6a   :  { %546 = vst [vmem:[#allocation5 + $0x3e4] sm:$0xf] %v545_v59  ;;  %v553_v62 = vld [vmem:[%s11077_s3 + $0x3f8] sm:$0xf]  ;;  %548 = vst [vmem:[#allocation5 + $0x3e8] sm:$0xf] %v547_v60 }
  0x6b   :  { %550 = vst [vmem:[#allocation5 + $0x3ec] sm:$0xff] %v549_v61   ;;  %554 = vst [vmem:[#allocation5 + $0x3f4] sm:$0xf] %v553_v62  ;;  %v555_v63 = vld [vmem:[%s11077_s3 + $0x3f4] sm:$0xf]  ;;  %v565_v3 = vld [vmem:[%s11077_s3 + $0x40c] sm:$0xff]  }
  0x6c   :  { %v561_v1 = vld [vmem:[%s11077_s3 + $0x408] sm:$0xf]  ;;  %556 = vst [vmem:[#allocation5 + $0x3f8] sm:$0xf] %v555_v63  ;;  %558 = vst [vmem:[#allocation5 + $0x3fc] sm:$0xff] %v557_v0   ;;  %v573_v6 = vld [vmem:[%s11077_s3 + $0x41c] sm:$0xff]  }
  0x6d   :  { %562 = vst [vmem:[#allocation5 + $0x404] sm:$0xf] %v561_v1  ;;  %v563_v2 = vld [vmem:[%s11077_s3 + $0x404] sm:$0xf]  ;;  %v569_v4 = vld [vmem:[%s11077_s3 + $0x418] sm:$0xf] }
  0x6e   :  { %564 = vst [vmem:[#allocation5 + $0x408] sm:$0xf] %v563_v2  ;;  %566 = vst [vmem:[#allocation5 + $0x40c] sm:$0xff] %v565_v3   ;;  %v571_v5 = vld [vmem:[%s11077_s3 + $0x414] sm:$0xf]  ;;  %v581_v9 = vld [vmem:[%s11077_s3 + $0x42c] sm:$0xff]  }
  0x6f   :  { %570 = vst [vmem:[#allocation5 + $0x414] sm:$0xf] %v569_v4  ;;  %v577_v7 = vld [vmem:[%s11077_s3 + $0x428] sm:$0xf]  ;;  %572 = vst [vmem:[#allocation5 + $0x418] sm:$0xf] %v571_v5 }
  0x70   :  { %574 = vst [vmem:[#allocation5 + $0x41c] sm:$0xff] %v573_v6   ;;  %578 = vst [vmem:[#allocation5 + $0x424] sm:$0xf] %v577_v7  ;;  %v579_v8 = vld [vmem:[%s11077_s3 + $0x424] sm:$0xf]  ;;  %v589_v12 = vld [vmem:[%s11077_s3 + $0x43c] sm:$0xff]  }
  0x71   :  { %v585_v10 = vld [vmem:[%s11077_s3 + $0x438] sm:$0xf]  ;;  %580 = vst [vmem:[#allocation5 + $0x428] sm:$0xf] %v579_v8  ;;  %582 = vst [vmem:[#allocation5 + $0x42c] sm:$0xff] %v581_v9   ;;  %v597_v15 = vld [vmem:[%s11077_s3 + $0x44c] sm:$0xff]  }
  0x72   :  { %586 = vst [vmem:[#allocation5 + $0x434] sm:$0xf] %v585_v10  ;;  %v587_v11 = vld [vmem:[%s11077_s3 + $0x434] sm:$0xf]  ;;  %v593_v13 = vld [vmem:[%s11077_s3 + $0x448] sm:$0xf] }
  0x73   :  { %588 = vst [vmem:[#allocation5 + $0x438] sm:$0xf] %v587_v11  ;;  %590 = vst [vmem:[#allocation5 + $0x43c] sm:$0xff] %v589_v12   ;;  %v595_v14 = vld [vmem:[%s11077_s3 + $0x444] sm:$0xf]  ;;  %v605_v18 = vld [vmem:[%s11077_s3 + $0x45c] sm:$0xff]  }
  0x74   :  { %594 = vst [vmem:[#allocation5 + $0x444] sm:$0xf] %v593_v13  ;;  %v601_v16 = vld [vmem:[%s11077_s3 + $0x458] sm:$0xf]  ;;  %596 = vst [vmem:[#allocation5 + $0x448] sm:$0xf] %v595_v14 }
  0x75   :  { %598 = vst [vmem:[#allocation5 + $0x44c] sm:$0xff] %v597_v15   ;;  %602 = vst [vmem:[#allocation5 + $0x454] sm:$0xf] %v601_v16  ;;  %v603_v17 = vld [vmem:[%s11077_s3 + $0x454] sm:$0xf]  ;;  %v613_v21 = vld [vmem:[%s11077_s3 + $0x46c] sm:$0xff]  }
  0x76   :  { %v609_v19 = vld [vmem:[%s11077_s3 + $0x468] sm:$0xf]  ;;  %604 = vst [vmem:[#allocation5 + $0x458] sm:$0xf] %v603_v17  ;;  %606 = vst [vmem:[#allocation5 + $0x45c] sm:$0xff] %v605_v18   ;;  %v621_v24 = vld [vmem:[%s11077_s3 + $0x47c] sm:$0xff]  }
  0x77   :  { %610 = vst [vmem:[#allocation5 + $0x464] sm:$0xf] %v609_v19  ;;  %v611_v20 = vld [vmem:[%s11077_s3 + $0x464] sm:$0xf]  ;;  %v617_v22 = vld [vmem:[%s11077_s3 + $0x478] sm:$0xf] }
  0x78   :  { %612 = vst [vmem:[#allocation5 + $0x468] sm:$0xf] %v611_v20  ;;  %614 = vst [vmem:[#allocation5 + $0x46c] sm:$0xff] %v613_v21   ;;  %v619_v23 = vld [vmem:[%s11077_s3 + $0x474] sm:$0xf]  ;;  %v629_v27 = vld [vmem:[%s11077_s3 + $0x48c] sm:$0xff]  }
  0x79   :  { %618 = vst [vmem:[#allocation5 + $0x474] sm:$0xf] %v617_v22  ;;  %v625_v25 = vld [vmem:[%s11077_s3 + $0x488] sm:$0xf]  ;;  %620 = vst [vmem:[#allocation5 + $0x478] sm:$0xf] %v619_v23 }
  0x7a   :  { %622 = vst [vmem:[#allocation5 + $0x47c] sm:$0xff] %v621_v24   ;;  %626 = vst [vmem:[#allocation5 + $0x484] sm:$0xf] %v625_v25  ;;  %v627_v26 = vld [vmem:[%s11077_s3 + $0x484] sm:$0xf]  ;;  %v637_v30 = vld [vmem:[%s11077_s3 + $0x49c] sm:$0xff]  }
  0x7b   :  { %v633_v28 = vld [vmem:[%s11077_s3 + $0x498] sm:$0xf]  ;;  %628 = vst [vmem:[#allocation5 + $0x488] sm:$0xf] %v627_v26  ;;  %630 = vst [vmem:[#allocation5 + $0x48c] sm:$0xff] %v629_v27   ;;  %v645_v33 = vld [vmem:[%s11077_s3 + $0x4ac] sm:$0xff]  }
  0x7c   :  { %634 = vst [vmem:[#allocation5 + $0x494] sm:$0xf] %v633_v28  ;;  %v635_v29 = vld [vmem:[%s11077_s3 + $0x494] sm:$0xf]  ;;  %v641_v31 = vld [vmem:[%s11077_s3 + $0x4a8] sm:$0xf] }
  0x7d   :  { %636 = vst [vmem:[#allocation5 + $0x498] sm:$0xf] %v635_v29  ;;  %638 = vst [vmem:[#allocation5 + $0x49c] sm:$0xff] %v637_v30   ;;  %v643_v32 = vld [vmem:[%s11077_s3 + $0x4a4] sm:$0xf]  ;;  %v653_v36 = vld [vmem:[%s11077_s3 + $0x4bc] sm:$0xff]  }
  0x7e   :  { %642 = vst [vmem:[#allocation5 + $0x4a4] sm:$0xf] %v641_v31  ;;  %v649_v34 = vld [vmem:[%s11077_s3 + $0x4b8] sm:$0xf]  ;;  %644 = vst [vmem:[#allocation5 + $0x4a8] sm:$0xf] %v643_v32 }
  0x7f   :  { %646 = vst [vmem:[#allocation5 + $0x4ac] sm:$0xff] %v645_v33   ;;  %650 = vst [vmem:[#allocation5 + $0x4b4] sm:$0xf] %v649_v34  ;;  %v651_v35 = vld [vmem:[%s11077_s3 + $0x4b4] sm:$0xf]  ;;  %v661_v39 = vld [vmem:[%s11077_s3 + $0x4cc] sm:$0xff]  }
  0x80   :  { %v657_v37 = vld [vmem:[%s11077_s3 + $0x4c8] sm:$0xf]  ;;  %652 = vst [vmem:[#allocation5 + $0x4b8] sm:$0xf] %v651_v35  ;;  %654 = vst [vmem:[#allocation5 + $0x4bc] sm:$0xff] %v653_v36   ;;  %v669_v42 = vld [vmem:[%s11077_s3 + $0x4dc] sm:$0xff]  }
  0x81   :  { %658 = vst [vmem:[#allocation5 + $0x4c4] sm:$0xf] %v657_v37  ;;  %v659_v38 = vld [vmem:[%s11077_s3 + $0x4c4] sm:$0xf]  ;;  %v665_v40 = vld [vmem:[%s11077_s3 + $0x4d8] sm:$0xf] }
  0x82   :  { %660 = vst [vmem:[#allocation5 + $0x4c8] sm:$0xf] %v659_v38  ;;  %662 = vst [vmem:[#allocation5 + $0x4cc] sm:$0xff] %v661_v39   ;;  %v667_v41 = vld [vmem:[%s11077_s3 + $0x4d4] sm:$0xf]  ;;  %v677_v45 = vld [vmem:[%s11077_s3 + $0x4ec] sm:$0xff]  }
  0x83   :  { %666 = vst [vmem:[#allocation5 + $0x4d4] sm:$0xf] %v665_v40  ;;  %v673_v43 = vld [vmem:[%s11077_s3 + $0x4e8] sm:$0xf]  ;;  %668 = vst [vmem:[#allocation5 + $0x4d8] sm:$0xf] %v667_v41 }
  0x84   :  { %670 = vst [vmem:[#allocation5 + $0x4dc] sm:$0xff] %v669_v42   ;;  %674 = vst [vmem:[#allocation5 + $0x4e4] sm:$0xf] %v673_v43  ;;  %v675_v44 = vld [vmem:[%s11077_s3 + $0x4e4] sm:$0xf]  ;;  %v685_v48 = vld [vmem:[%s11077_s3 + $0x4fc] sm:$0xff]  }
  0x85   :  { %v681_v46 = vld [vmem:[%s11077_s3 + $0x4f8] sm:$0xf]  ;;  %676 = vst [vmem:[#allocation5 + $0x4e8] sm:$0xf] %v675_v44  ;;  %678 = vst [vmem:[#allocation5 + $0x4ec] sm:$0xff] %v677_v45   ;;  %v693_v51 = vld [vmem:[%s11077_s3 + $0x50c] sm:$0xff]  }
  0x86   :  { %682 = vst [vmem:[#allocation5 + $0x4f4] sm:$0xf] %v681_v46  ;;  %v683_v47 = vld [vmem:[%s11077_s3 + $0x4f4] sm:$0xf]  ;;  %v689_v49 = vld [vmem:[%s11077_s3 + $0x508] sm:$0xf] }
  0x87   :  { %684 = vst [vmem:[#allocation5 + $0x4f8] sm:$0xf] %v683_v47  ;;  %686 = vst [vmem:[#allocation5 + $0x4fc] sm:$0xff] %v685_v48   ;;  %v691_v50 = vld [vmem:[%s11077_s3 + $0x504] sm:$0xf]  ;;  %v701_v54 = vld [vmem:[%s11077_s3 + $0x51c] sm:$0xff]  }
  0x88   :  { %690 = vst [vmem:[#allocation5 + $0x504] sm:$0xf] %v689_v49  ;;  %v697_v52 = vld [vmem:[%s11077_s3 + $0x518] sm:$0xf]  ;;  %692 = vst [vmem:[#allocation5 + $0x508] sm:$0xf] %v691_v50 }
  0x89   :  { %694 = vst [vmem:[#allocation5 + $0x50c] sm:$0xff] %v693_v51   ;;  %698 = vst [vmem:[#allocation5 + $0x514] sm:$0xf] %v697_v52  ;;  %v699_v53 = vld [vmem:[%s11077_s3 + $0x514] sm:$0xf]  ;;  %v709_v57 = vld [vmem:[%s11077_s3 + $0x52c] sm:$0xff]  }
  0x8a   :  { %v705_v55 = vld [vmem:[%s11077_s3 + $0x528] sm:$0xf]  ;;  %700 = vst [vmem:[#allocation5 + $0x518] sm:$0xf] %v699_v53  ;;  %702 = vst [vmem:[#allocation5 + $0x51c] sm:$0xff] %v701_v54   ;;  %v717_v60 = vld [vmem:[%s11077_s3 + $0x53c] sm:$0xff]  }
  0x8b   :  { %706 = vst [vmem:[#allocation5 + $0x524] sm:$0xf] %v705_v55  ;;  %v707_v56 = vld [vmem:[%s11077_s3 + $0x524] sm:$0xf]  ;;  %v713_v58 = vld [vmem:[%s11077_s3 + $0x538] sm:$0xf] }
  0x8c   :  { %708 = vst [vmem:[#allocation5 + $0x528] sm:$0xf] %v707_v56  ;;  %710 = vst [vmem:[#allocation5 + $0x52c] sm:$0xff] %v709_v57   ;;  %v715_v59 = vld [vmem:[%s11077_s3 + $0x534] sm:$0xf]  ;;  %v725_v63 = vld [vmem:[%s11077_s3 + $0x54c] sm:$0xff]  }
  0x8d   :  { %714 = vst [vmem:[#allocation5 + $0x534] sm:$0xf] %v713_v58  ;;  %v721_v61 = vld [vmem:[%s11077_s3 + $0x548] sm:$0xf]  ;;  %716 = vst [vmem:[#allocation5 + $0x538] sm:$0xf] %v715_v59 }
  0x8e   :  { %718 = vst [vmem:[#allocation5 + $0x53c] sm:$0xff] %v717_v60   ;;  %722 = vst [vmem:[#allocation5 + $0x544] sm:$0xf] %v721_v61  ;;  %v723_v62 = vld [vmem:[%s11077_s3 + $0x544] sm:$0xf]  ;;  %v733_v2 = vld [vmem:[%s11077_s3 + $0x55c] sm:$0xff]  }
  0x8f   :  { %v729_v0 = vld [vmem:[%s11077_s3 + $0x558] sm:$0xf]  ;;  %724 = vst [vmem:[#allocation5 + $0x548] sm:$0xf] %v723_v62  ;;  %726 = vst [vmem:[#allocation5 + $0x54c] sm:$0xff] %v725_v63   ;;  %v741_v5 = vld [vmem:[%s11077_s3 + $0x56c] sm:$0xff]  }
  0x90   :  { %730 = vst [vmem:[#allocation5 + $0x554] sm:$0xf] %v729_v0  ;;  %v731_v1 = vld [vmem:[%s11077_s3 + $0x554] sm:$0xf]  ;;  %v737_v3 = vld [vmem:[%s11077_s3 + $0x568] sm:$0xf] }
  0x91   :  { %732 = vst [vmem:[#allocation5 + $0x558] sm:$0xf] %v731_v1  ;;  %734 = vst [vmem:[#allocation5 + $0x55c] sm:$0xff] %v733_v2   ;;  %v739_v4 = vld [vmem:[%s11077_s3 + $0x564] sm:$0xf]  ;;  %v749_v8 = vld [vmem:[%s11077_s3 + $0x57c] sm:$0xff]  }
  0x92   :  { %738 = vst [vmem:[#allocation5 + $0x564] sm:$0xf] %v737_v3  ;;  %v745_v6 = vld [vmem:[%s11077_s3 + $0x578] sm:$0xf]  ;;  %740 = vst [vmem:[#allocation5 + $0x568] sm:$0xf] %v739_v4 }
  0x93   :  { %742 = vst [vmem:[#allocation5 + $0x56c] sm:$0xff] %v741_v5   ;;  %746 = vst [vmem:[#allocation5 + $0x574] sm:$0xf] %v745_v6  ;;  %v747_v7 = vld [vmem:[%s11077_s3 + $0x574] sm:$0xf]  ;;  %v757_v11 = vld [vmem:[%s11077_s3 + $0x58c] sm:$0xff]  }
  0x94   :  { %v753_v9 = vld [vmem:[%s11077_s3 + $0x588] sm:$0xf]  ;;  %748 = vst [vmem:[#allocation5 + $0x578] sm:$0xf] %v747_v7  ;;  %750 = vst [vmem:[#allocation5 + $0x57c] sm:$0xff] %v749_v8  }
  0x95   :  { %754 = vst [vmem:[#allocation5 + $0x584] sm:$0xf] %v753_v9  ;;  %v755_v10 = vld [vmem:[%s11077_s3 + $0x584] sm:$0xf]  ;;  %v761_v12 = vld [vmem:[%s11077_s3 + $0x598] sm:$0xf] }
  0x96   :  { %756 = vst [vmem:[#allocation5 + $0x588] sm:$0xf] %v755_v10  ;;  %758 = vst [vmem:[#allocation5 + $0x58c] sm:$0xff] %v757_v11   ;;  %v763_v13 = vld [vmem:[%s11077_s3 + $0x594] sm:$0xf] }
  0x97   :  { %762 = vst [vmem:[#allocation5 + $0x594] sm:$0xf] %v761_v12  ;;  %v765_v14 = vld [vmem:[%s11077_s3 + $0x59c] sm:$0xf]  ;;  %764 = vst [vmem:[#allocation5 + $0x598] sm:$0xf] %v763_v13 }
  0x98   :  { %766 = vst [vmem:[#allocation5 + $0x59c] sm:$0xf] %v765_v14 }
  0x99   :  { %1517 = vsyncadd [#allocation7], 23040  ;;  %v8462_v15 = vld [vmem:[%s11079_s5] sm:$0xff]  ;;  %v8467_v16 = vld [vmem:[%s11079_s5 + $0x8] sm:$0xff] }
  0x9a   :  { %11103 = vst [vmem:[#allocation15_spill] sm:$0xff] %v8462_v15  ;;  %11104 = vst [vmem:[#allocation16_spill] sm:$0xff] %v8467_v16  ;;  %v8472_v17 = vld [vmem:[%s11079_s5 + $0x10] sm:$0xff]  ;;  %v8477_v18 = vld [vmem:[%s11079_s5 + $0x18] sm:$0xff] }
  0x9b   :  { %11105 = vst [vmem:[#allocation17_spill] sm:$0xff] %v8472_v17  ;;  %11106 = vst [vmem:[#allocation18_spill] sm:$0xff] %v8477_v18  ;;  %v8482_v19 = vld [vmem:[%s11079_s5 + $0x20] sm:$0xff]  ;;  %v8487_v20 = vld [vmem:[%s11079_s5 + $0x28] sm:$0xff] }
  0x9c   :  { %11107 = vst [vmem:[#allocation19_spill] sm:$0xff] %v8482_v19  ;;  %11108 = vst [vmem:[#allocation20_spill] sm:$0xff] %v8487_v20  ;;  %v8492_v21 = vld [vmem:[%s11079_s5 + $0x30] sm:$0xff]  ;;  %v8497_v22 = vld [vmem:[%s11079_s5 + $0x38] sm:$0xff] }
  0x9d   :  { %11109 = vst [vmem:[#allocation21_spill] sm:$0xff] %v8492_v21  ;;  %11110 = vst [vmem:[#allocation22_spill] sm:$0xff] %v8497_v22  ;;  %v8502_v23 = vld [vmem:[%s11079_s5 + $0x40] sm:$0xff]  ;;  %v8507_v24 = vld [vmem:[%s11079_s5 + $0x48] sm:$0xff] }
  0x9e   :  { %11111 = vst [vmem:[#allocation23_spill] sm:$0xff] %v8502_v23  ;;  %11112 = vst [vmem:[#allocation24_spill] sm:$0xff] %v8507_v24  ;;  %v8512_v25 = vld [vmem:[%s11079_s5 + $0x50] sm:$0xff]  ;;  %v8517_v26 = vld [vmem:[%s11079_s5 + $0x58] sm:$0xff] }
  0x9f   :  { %11113 = vst [vmem:[#allocation25_spill] sm:$0xff] %v8512_v25  ;;  %11114 = vst [vmem:[#allocation26_spill] sm:$0xff] %v8517_v26  ;;  %v8522_v27 = vld [vmem:[%s11079_s5 + $0x60] sm:$0xff]  ;;  %v8527_v28 = vld [vmem:[%s11079_s5 + $0x68] sm:$0xff] }
  0xa0   :  { %11115 = vst [vmem:[#allocation27_spill] sm:$0xff] %v8522_v27  ;;  %11116 = vst [vmem:[#allocation28_spill] sm:$0xff] %v8527_v28  ;;  %v8532_v29 = vld [vmem:[%s11079_s5 + $0x70] sm:$0xff]  ;;  %v8537_v30 = vld [vmem:[%s11079_s5 + $0x78] sm:$0xff] }
  0xa1   :  { %11117 = vst [vmem:[#allocation29_spill] sm:$0xff] %v8532_v29  ;;  %11118 = vst [vmem:[#allocation30_spill] sm:$0xff] %v8537_v30  ;;  %v8542_v31 = vld [vmem:[%s11079_s5 + $0x80] sm:$0xff]  ;;  %v8547_v32 = vld [vmem:[%s11079_s5 + $0x88] sm:$0xff] }
  0xa2   :  { %11119 = vst [vmem:[#allocation31_spill] sm:$0xff] %v8542_v31  ;;  %11120 = vst [vmem:[#allocation32_spill] sm:$0xff] %v8547_v32  ;;  %v8552_v33 = vld [vmem:[%s11079_s5 + $0x90] sm:$0xff]  ;;  %v8557_v34 = vld [vmem:[%s11079_s5 + $0x98] sm:$0xff] }
  0xa3   :  { %11121 = vst [vmem:[#allocation33_spill] sm:$0xff] %v8552_v33  ;;  %11122 = vst [vmem:[#allocation34_spill] sm:$0xff] %v8557_v34  ;;  %v8562_v35 = vld [vmem:[%s11079_s5 + $0xa0] sm:$0xff]  ;;  %v8567_v36 = vld [vmem:[%s11079_s5 + $0xa8] sm:$0xff] }
  0xa4   :  { %11123 = vst [vmem:[#allocation35_spill] sm:$0xff] %v8562_v35  ;;  %11124 = vst [vmem:[#allocation36_spill] sm:$0xff] %v8567_v36  ;;  %v8572_v37 = vld [vmem:[%s11079_s5 + $0xb0] sm:$0xff]  ;;  %v8577_v38 = vld [vmem:[%s11079_s5 + $0xb8] sm:$0xff] }
  0xa5   :  { %11125 = vst [vmem:[#allocation37_spill] sm:$0xff] %v8572_v37  ;;  %11126 = vst [vmem:[#allocation38_spill] sm:$0xff] %v8577_v38  ;;  %v8582_v39 = vld [vmem:[%s11079_s5 + $0xc0] sm:$0xff]  ;;  %v8587_v40 = vld [vmem:[%s11079_s5 + $0xc8] sm:$0xff] }
  0xa6   :  { %11127 = vst [vmem:[#allocation39_spill] sm:$0xff] %v8582_v39  ;;  %11128 = vst [vmem:[#allocation40_spill] sm:$0xff] %v8587_v40  ;;  %v8592_v41 = vld [vmem:[%s11079_s5 + $0xd0] sm:$0xff]  ;;  %v8597_v42 = vld [vmem:[%s11079_s5 + $0xd8] sm:$0xff] }
  0xa7   :  { %11129 = vst [vmem:[#allocation41_spill] sm:$0xff] %v8592_v41  ;;  %11130 = vst [vmem:[#allocation42_spill] sm:$0xff] %v8597_v42  ;;  %v8602_v43 = vld [vmem:[%s11079_s5 + $0xe0] sm:$0xff]  ;;  %v8607_v44 = vld [vmem:[%s11079_s5 + $0xe8] sm:$0xff] }
  0xa8   :  { %11131 = vst [vmem:[#allocation43_spill] sm:$0xff] %v8602_v43  ;;  %11132 = vst [vmem:[#allocation44_spill] sm:$0xff] %v8607_v44  ;;  %v8612_v45 = vld [vmem:[%s11079_s5 + $0xf0] sm:$0xff]  ;;  %v8617_v46 = vld [vmem:[%s11079_s5 + $0xf8] sm:$0xff] }
  0xa9   :  { %11133 = vst [vmem:[#allocation45_spill] sm:$0xff] %v8612_v45  ;;  %11134 = vst [vmem:[#allocation46_spill] sm:$0xff] %v8617_v46  ;;  %v8622_v47 = vld [vmem:[%s11079_s5 + $0x100] sm:$0xff]  ;;  %v8627_v48 = vld [vmem:[%s11079_s5 + $0x108] sm:$0xff] }
  0xaa   :  { %11135 = vst [vmem:[#allocation47_spill] sm:$0xff] %v8622_v47  ;;  %11136 = vst [vmem:[#allocation48_spill] sm:$0xff] %v8627_v48  ;;  %v8632_v49 = vld [vmem:[%s11079_s5 + $0x110] sm:$0xff]  ;;  %v8637_v50 = vld [vmem:[%s11079_s5 + $0x118] sm:$0xff] }
  0xab   :  { %11137 = vst [vmem:[#allocation49_spill] sm:$0xff] %v8632_v49  ;;  %11138 = vst [vmem:[#allocation50_spill] sm:$0xff] %v8637_v50  ;;  %v8642_v51 = vld [vmem:[%s11079_s5 + $0x120] sm:$0xff]  ;;  %v8647_v52 = vld [vmem:[%s11079_s5 + $0x128] sm:$0xff] }
  0xac   :  { %11139 = vst [vmem:[#allocation51_spill] sm:$0xff] %v8642_v51  ;;  %11140 = vst [vmem:[#allocation52_spill] sm:$0xff] %v8647_v52  ;;  %v8652_v53 = vld [vmem:[%s11079_s5 + $0x130] sm:$0xff]  ;;  %v8657_v54 = vld [vmem:[%s11079_s5 + $0x138] sm:$0xff] }
  0xad   :  { %11141 = vst [vmem:[#allocation53_spill] sm:$0xff] %v8652_v53  ;;  %11142 = vst [vmem:[#allocation54_spill] sm:$0xff] %v8657_v54  ;;  %v8662_v55 = vld [vmem:[%s11079_s5 + $0x140] sm:$0xff]  ;;  %v8667_v56 = vld [vmem:[%s11079_s5 + $0x148] sm:$0xff] }
  0xae   :  { %11143 = vst [vmem:[#allocation55_spill] sm:$0xff] %v8662_v55  ;;  %11144 = vst [vmem:[#allocation56_spill] sm:$0xff] %v8667_v56  ;;  %v8672_v57 = vld [vmem:[%s11079_s5 + $0x150] sm:$0xff]  ;;  %v8677_v58 = vld [vmem:[%s11079_s5 + $0x158] sm:$0xff] }
  0xaf   :  { %11145 = vst [vmem:[#allocation57_spill] sm:$0xff] %v8672_v57  ;;  %11146 = vst [vmem:[#allocation58_spill] sm:$0xff] %v8677_v58  ;;  %v8682_v59 = vld [vmem:[%s11079_s5 + $0x160] sm:$0xff]  ;;  %v8687_v60 = vld [vmem:[%s11079_s5 + $0x168] sm:$0xff] }
  0xb0   :  { %11147 = vst [vmem:[#allocation59_spill] sm:$0xff] %v8682_v59  ;;  %11148 = vst [vmem:[#allocation60_spill] sm:$0xff] %v8687_v60  ;;  %v8692_v61 = vld [vmem:[%s11079_s5 + $0x170] sm:$0xff]  ;;  %v8697_v62 = vld [vmem:[%s11079_s5 + $0x178] sm:$0xff] }
  0xb1   :  { %11149 = vst [vmem:[#allocation61_spill] sm:$0xff] %v8692_v61  ;;  %11150 = vst [vmem:[#allocation62_spill] sm:$0xff] %v8697_v62  ;;  %v8702_v63 = vld [vmem:[%s11079_s5 + $0x180] sm:$0xff]  ;;  %v8707_v0 = vld [vmem:[%s11079_s5 + $0x188] sm:$0xff] }
  0xb2   :  { %11151 = vst [vmem:[#allocation63_spill] sm:$0xff] %v8702_v63  ;;  %11152 = vst [vmem:[#allocation64_spill] sm:$0xff] %v8707_v0  ;;  %v8712_v1 = vld [vmem:[%s11079_s5 + $0x190] sm:$0xff]  ;;  %v8717_v2 = vld [vmem:[%s11079_s5 + $0x198] sm:$0xff] }
  0xb3   :  { %11153 = vst [vmem:[#allocation65_spill] sm:$0xff] %v8712_v1  ;;  %11154 = vst [vmem:[#allocation66_spill] sm:$0xff] %v8717_v2  ;;  %v8722_v3 = vld [vmem:[%s11079_s5 + $0x1a0] sm:$0xff]  ;;  %v8727_v4 = vld [vmem:[%s11079_s5 + $0x1a8] sm:$0xff] }
  0xb4   :  { %11155 = vst [vmem:[#allocation67_spill] sm:$0xff] %v8722_v3  ;;  %11156 = vst [vmem:[#allocation68_spill] sm:$0xff] %v8727_v4  ;;  %v8732_v5 = vld [vmem:[%s11079_s5 + $0x1b0] sm:$0xff]  ;;  %v8737_v6 = vld [vmem:[%s11079_s5 + $0x1b8] sm:$0xff] }
  0xb5   :  { %11157 = vst [vmem:[#allocation69_spill] sm:$0xff] %v8732_v5  ;;  %11158 = vst [vmem:[#allocation70_spill] sm:$0xff] %v8737_v6  ;;  %v8742_v7 = vld [vmem:[%s11079_s5 + $0x1c0] sm:$0xff]  ;;  %v8747_v8 = vld [vmem:[%s11079_s5 + $0x1c8] sm:$0xff] }
  0xb6   :  { %11159 = vst [vmem:[#allocation71_spill] sm:$0xff] %v8742_v7  ;;  %11160 = vst [vmem:[#allocation72_spill] sm:$0xff] %v8747_v8  ;;  %v8752_v9 = vld [vmem:[%s11079_s5 + $0x1d0] sm:$0xff]  ;;  %v8757_v10 = vld [vmem:[%s11079_s5 + $0x1d8] sm:$0xff] }
  0xb7   :  { %11161 = vst [vmem:[#allocation73_spill] sm:$0xff] %v8752_v9  ;;  %11162 = vst [vmem:[#allocation74_spill] sm:$0xff] %v8757_v10  ;;  %v8762_v11 = vld [vmem:[%s11079_s5 + $0x1e0] sm:$0xff]  ;;  %v8767_v12 = vld [vmem:[%s11079_s5 + $0x1e8] sm:$0xff] }
  0xb8   :  { %11163 = vst [vmem:[#allocation75_spill] sm:$0xff] %v8762_v11  ;;  %11164 = vst [vmem:[#allocation76_spill] sm:$0xff] %v8767_v12  ;;  %v8772_v13 = vld [vmem:[%s11079_s5 + $0x1f0] sm:$0xff]  ;;  %v8777_v14 = vld [vmem:[%s11079_s5 + $0x1f8] sm:$0xff] }
  0xb9   :  { %11165 = vst [vmem:[#allocation77_spill] sm:$0xff] %v8772_v13  ;;  %11166 = vst [vmem:[#allocation78_spill] sm:$0xff] %v8777_v14  ;;  %v8782_v10 = vld [vmem:[%s11079_s5 + $0x200] sm:$0xff]  ;;  %v8787_v11 = vld [vmem:[%s11079_s5 + $0x208] sm:$0xff] }
  0xba   :  { %11167 = vst [vmem:[#allocation79_spill] sm:$0xff] %v8782_v10  ;;  %11168 = vst [vmem:[#allocation80_spill] sm:$0xff] %v8787_v11  ;;  %v8792_v12 = vld [vmem:[%s11079_s5 + $0x210] sm:$0xff]  ;;  %v8797_v13 = vld [vmem:[%s11079_s5 + $0x218] sm:$0xff] }
  0xbb   :  { %11169 = vst [vmem:[#allocation81_spill] sm:$0xff] %v8792_v12  ;;  %11170 = vst [vmem:[#allocation82_spill] sm:$0xff] %v8797_v13  ;;  %v8802_v14 = vld [vmem:[%s11079_s5 + $0x220] sm:$0xff]  ;;  %v8807_v10 = vld [vmem:[%s11079_s5 + $0x228] sm:$0xff] }
  0xbc   :  { %11171 = vst [vmem:[#allocation83_spill] sm:$0xff] %v8802_v14  ;;  %11172 = vst [vmem:[#allocation84_spill] sm:$0xff] %v8807_v10 }
  0xbd   :  { %1698 = vsyncadd [#allocation7 + $0x1], 8960  ;;  %v11084_v11 = vmov 0.0   ;;  %v8813_v12 = vld [vmem:[%s11075_s1 + $0xb8] ss:$12 sps:$4 sm:$0xff]   ;;  %vm7593_vm0 = vmmov 0  }
  0xbe   :  { %6888 = vmatprep.subr.bf16.mxu1 %v11084_v11  ;;  %v8818_v13 = vld [vmem:[%s11075_s1 + $0xbc] ss:$12 sps:$4 sm:$0xff]   ;;  %v8823_v14 = vld [vmem:[%s11075_s1 + $0xb4] ss:$12 sps:$4 sm:$0xff]   ;;  %1911 = vmatprep.subr.bf16.mxu0 %v8813_v12  ;;  %v11173_v10 = vmov 0.0   ;;  %v11086_v6 = vmov 0  }
  0xbf   :  { %v8829_v11 = vld [vmem:[%s11075_s1 + $0xd0] ss:$12 sps:$4 sm:$0xff]   ;;  %6904 = vmatprep.mubr.msk.bf16.mxu1 %vm7593_vm0, %v11173_v10  ;;  %6889 = vmatpush3.bf16.msra.mxu1 %v8818_v13  ;;  %v8838_v9 = vld [vmem:[%s11075_s1 + $0xd4] ss:$12 sps:$4 sm:$0xff]   ;;  %v8843_v8 = vld [vmem:[%s11075_s1 + $0xcc] ss:$12 sps:$4 sm:$0xff]  }
  0xc0   :  { %1912 = vmatpush1.bf16.msra.mxu0 %v8823_v14  ;;  %6890 = vmatprep.subr.bf16.mxu1 %v11173_v10  ;;  %v8850_v7 = vld [vmem:[%s11075_s1 + $0xe8] ss:$12 sps:$4 sm:$0xff]   ;;  %v8856_v56 = vld [vmem:[%s11075_s1 + $0xec] ss:$12 sps:$4 sm:$0xff]   ;;  %v8863_v5 = vld [vmem:[%s11075_s1 + $0xe4] ss:$12 sps:$4 sm:$0xff]  }
  0xc1   :  { %1913 = vmatprep.subr.bf16.mxu0 %v8829_v11  ;;  %1943 = vmatprep.mubr.bf16.mxu0 %v11086_v6  ;;  %v8870_v6 = vld [vmem:[%s11075_s1 + $0x100] ss:$12 sps:$4 sm:$0xff]   ;;  %v8875_v55 = vld [vmem:[%s11075_s1 + $0x104] ss:$12 sps:$4 sm:$0xff]   ;;  %v8882_v4 = vld [vmem:[%s11075_s1 + $0xfc] ss:$12 sps:$4 sm:$0xff]  }
  0xc2   :  { %v8889_v54 = vld [vmem:[%s11075_s1 + $0x118] ss:$12 sps:$4 sm:$0xff]   ;;  %v8896_v3 = vld [vmem:[%s11075_s1 + $0x11c] ss:$12 sps:$4 sm:$0xff]   ;;  %v8901_v53 = vld [vmem:[%s11075_s1 + $0x114] ss:$12 sps:$4 sm:$0xff]  }
  0xc3   :  { %6891 = vmatpush3.bf16.msra.mxu1 %v8838_v9  ;;  %v8908_v2 = vld [vmem:[%s11075_s1 + $0x130] ss:$12 sps:$4 sm:$0xff]   ;;  %v8913_v52 = vld [vmem:[%s11075_s1 + $0x134] ss:$12 sps:$4 sm:$0xff]   ;;  %v8920_v1 = vld [vmem:[%s11075_s1 + $0x12c] ss:$12 sps:$4 sm:$0xff]  }
  0xc4   :  { %1914 = vmatpush1.bf16.msra.mxu0 %v8843_v8  ;;  %6892 = vmatprep.subr.bf16.mxu1 %v11173_v10  ;;  %v8927_v51 = vld [vmem:[%s11075_s1 + $0x148] ss:$12 sps:$4 sm:$0xff]   ;;  %v6296_v0 = vld [vmem:[%s11075_s1 + $0x15c] sm:$0xff]  ;;  %v8935_v50 = vld [vmem:[%s11075_s1 + $0x14c] ss:$12 sps:$4 sm:$0xff]   ;;  %vm1901_vm1 = vcmask 1043456  }
  0xc5   :  { %1915 = vmatprep.subr.bf16.mxu0 %v8850_v7  ;;  %v8940_v63 = vld [vmem:[%s11075_s1 + $0x144] ss:$12 sps:$4 sm:$0xff]   ;;  %v6322_v62 = vcombine.low %v6296_v0, %v6296_v0  ;;  %v8949_v48 = vcombine.high %v6296_v0, %v6296_v0  ;;  %v6298_v61 = vld [vmem:[%s11074_s0 + $0x8] sm:$0xf]  ;;  %v6299_v0 = vld [vmem:[%s11074_s0 + $0xc] sm:$0x1] }
  0xc6   :  { %v7377_v49 = vld [vmem:[%s11075_s1 + $0x164] ss:$0 sps:$4 sm:$0xff]   ;;  %v6300_v59 = vcombine.low %v6298_v61, %v6299_v0  ;;  %vm1897_vm2 = vcmask 982016   ;;  %v8990_v61 = vld [vmem:[%s11075_s1 + $0x1c] ss:$12 sps:$4 sm:$0xff]   ;;  %v11174_v57 = vmov 0  }
  0xc7   :  { %6893 = vmatpush3.bf16.msra.mxu1 %v8856_v56  ;;  %v8957_v47 = vsel %vm1901_vm1, %v7377_v49, 0  ;;  %v8960_v60 = vsel %vm1901_vm1, %v6322_v62, 0  ;;  %v8971_v46 = vld [vmem:[%s11075_s1 + $0x4] ss:$12 sps:$4 sm:$0xff]   ;;  %v8978_v49 = vld [vmem:[%s11075_s1 + $0x8] ss:$12 sps:$4 sm:$0xff]  }
  0xc8   :  { %1916 = vmatpush1.bf16.msra.mxu0 %v8863_v5  ;;  %6894 = vmatprep.subr.bf16.mxu1 %v11173_v10  ;;  %v8983_v62 = vld [vmem:[%s11075_s1] ss:$12 sps:$4 sm:$0xff]   ;;  %v9004_v45 = vld [vmem:[%s11075_s1 + $0x18] ss:$12 sps:$4 sm:$0xff]   ;;  %v9021_v44 = vld [vmem:[%s11075_s1 + $0x30] ss:$12 sps:$4 sm:$0xff]  }
  0xc9   :  { %1917 = vmatprep.subr.bf16.mxu0 %v8870_v6  ;;  %v8999_v0 = vld [vmem:[%s11075_s1 + $0x20] ss:$12 sps:$4 sm:$0xff]   ;;  %v9016_v58 = vld [vmem:[%s11075_s1 + $0x38] ss:$12 sps:$4 sm:$0xff]   ;;  %v9038_v28 = vld [vmem:[%s11075_s1 + $0x50] ss:$12 sps:$4 sm:$0xff]  }
  0xca   :  { %v9029_v43 = vld [vmem:[%s11075_s1 + $0x4c] ss:$12 sps:$4 sm:$0xff]   ;;  %v9043_v42 = vld [vmem:[%s11075_s1 + $0x48] ss:$12 sps:$4 sm:$0xff]   ;;  %v9048_v27 = vld [vmem:[%s11075_s1 + $0x64] ss:$12 sps:$4 sm:$0xff]  }
  0xcb   :  { %6895 = vmatpush3.bf16.msra.mxu1 %v8875_v55  ;;  %v9057_v41 = vld [vmem:[%s11075_s1 + $0x68] ss:$12 sps:$4 sm:$0xff]   ;;  %v9062_v26 = vld [vmem:[%s11075_s1 + $0x60] ss:$12 sps:$4 sm:$0xff]   ;;  %v9081_v39 = vld [vmem:[%s11075_s1 + $0x78] ss:$12 sps:$4 sm:$0xff]  }
  0xcc   :  { %1918 = vmatpush1.bf16.msra.mxu0 %v8882_v4  ;;  %6896 = vmatprep.subr.bf16.mxu1 %v11173_v10  ;;  %v9067_v40 = vld [vmem:[%s11075_s1 + $0x7c] ss:$12 sps:$4 sm:$0xff]   ;;  %v9076_v25 = vld [vmem:[%s11075_s1 + $0x80] ss:$12 sps:$4 sm:$0xff]   ;;  %v9098_v23 = vld [vmem:[%s11075_s1 + $0x98] ss:$12 sps:$4 sm:$0xff]  }
  0xcd   :  { %1919 = vmatprep.subr.bf16.mxu0 %v8889_v54  ;;  %v9086_v24 = vld [vmem:[%s11075_s1 + $0x94] ss:$12 sps:$4 sm:$0xff]   ;;  %v1727_v38 = vld [vmem:[%s11075_s1 + $0xa8] sm:$0xff]  ;;  %v9103_v37 = vld [vmem:[%s11075_s1 + $0x90] ss:$12 sps:$4 sm:$0xff]   ;;  %vm4371_vm3 = vcmask 257024  }
  0xce   :  { %v7410_v22 = vld [vmem:[%s11075_s1 + $0xb0] ss:$0 sps:$4 sm:$0xff]   ;;  %v9112_v36 = vcombine.high %v1727_v38, %v1727_v38  ;;  %v6350_v21 = vcombine.low %v1727_v38, %v1727_v38  ;;  %v1729_v35 = vld [vmem:[%s11074_s0] sm:$0xf]  ;;  %v9120_v20 = vld [vmem:[%s11074_s0 + $0x4] sm:$0x1] }
  0xcf   :  { %6897 = vmatpush3.bf16.msra.mxu1 %v8896_v3  ;;  %v9125_v34 = vsel %vm1901_vm1, %v7410_v22, 0  ;;  %v6328_v19 = vcombine.low %v1729_v35, %v9120_v20  ;;  %v6265_v22 = vld [vmem:[%s11074_s0 + $0x14] sm:$0x1]  ;;  %vm4374_vm4 = vcmask 253952  }
  0xd0   :  { %1920 = vmatpush1.bf16.msra.mxu0 %v8901_v53  ;;  %6898 = vmatprep.subr.bf16.mxu1 %v11173_v10  ;;  %v9131_v38 = vsel %vm1901_vm1, %v6350_v21, 0  ;;  %v6264_v21 = vld [vmem:[%s11074_s0 + $0x10] sm:$0xf] }
  0xd1   :  { %1921 = vmatprep.subr.bf16.mxu0 %v8908_v2  ;;  %v9223_v35 = vcombine.low %v6264_v21, %v6265_v22  ;;  %v6366_v21 = vld [vmem:[%s11074_s0 + $0x28] sm:$0xf]  ;;  %v6266_v22 = vld [vmem:[%s11074_s0 + $0x20] sm:$0xf] }
  0xd3   :  { %6899 = vmatpush3.bf16.msra.mxu1 %v8913_v52 }
  0xd4   :  { %1922 = vmatpush1.bf16.msra.mxu0 %v8920_v1  ;;  %6900 = vmatprep.subr.bf16.mxu1 %v11173_v10 }
  0xd5   :  { %1923 = vmatprep.subr.bf16.mxu0 %v8927_v51 }
  0xd7   :  { %6901 = vmatpush3.bf16.msra.mxu1 %v8935_v50 }
  0xd8   :  { %1924 = vmatpush1.bf16.msra.mxu0 %v8940_v63  ;;  %6902 = vmatprep.subr.bf16.mxu1 %v11173_v10 }
  0xd9   :  { %6325 = vmatprep.subr.msk.bf16.mxu0 %vm1901_vm1, %v8949_v48 }
  0xdb   :  { %6903 = vmatpush3.bf16.msra.mxu1 %v8957_v47 }
  0xdc   :  { %1926 = vmatpush1.bf16.msra.mxu0 %v8960_v60  ;;  %6908 = vmatprep.subr.bf16.mxu1 %v11173_v10 }
  0xdd   :  { %2132 = vmatprep.subr.bf16.mxu0 %v8971_v46 }
  0xde   :  { %6905 = vmatmul.mubr.msk.bf16.vlgmr.msra.gmra.mrb[0].mxu1 %vm1897_vm2, %v6300_v59 }
  0xdf   :  { %6326 = vmatmul.mubr.msk.bf16.vlgmr.msra.gmra.mrb[0].mxu0 %vm1897_vm2, %v6300_v59  ;;  %6909 = vmatpush3.bf16.msra.mxu1 %v8978_v49  ;;  %v9011_v59 = vld [vmem:[%s11075_s1 + $0x34] ss:$12 sps:$4 sm:$0xff]  }
  0xe0   :  { %2133 = vmatpush1.bf16.msra.mxu0 %v8983_v62  ;;  %6910 = vmatprep.subr.bf16.mxu1 %v11173_v10 }
  0xe1   :  { %2134 = vmatprep.subr.bf16.mxu0 %v8990_v61  ;;  %6924 = vmatprep.mubr.msk.bf16.mxu1 %vm7593_vm0, %v11173_v10 }
  0xe2   :  { %2164 = vmatprep.mubr.bf16.mxu0 %v11174_v57 }
  0xe3   :  { %6911 = vmatpush3.bf16.msra.mxu1 %v8999_v0 }
  0xe4   :  { %2135 = vmatpush1.bf16.msra.mxu0 %v9004_v45  ;;  %6912 = vmatprep.subr.bf16.mxu1 %v11173_v10 }
  0xe5   :  { %2136 = vmatprep.subr.bf16.mxu0 %v9011_v59 }
  0xe7   :  { %6913 = vmatpush3.bf16.msra.mxu1 %v9016_v58 }
  0xe8   :  { %2137 = vmatpush1.bf16.msra.mxu0 %v9021_v44  ;;  %6914 = vmatprep.subr.bf16.mxu1 %v11173_v10 }
  0xe9   :  { %2138 = vmatprep.subr.bf16.mxu0 %v9029_v43 }
  0xeb   :  { %6915 = vmatpush3.bf16.msra.mxu1 %v9038_v28 }
  0xec   :  { %2139 = vmatpush1.bf16.msra.mxu0 %v9043_v42  ;;  %6916 = vmatprep.subr.bf16.mxu1 %v11173_v10 }
  0xed   :  { %2140 = vmatprep.subr.bf16.mxu0 %v9048_v27 }
  0xef   :  { %6917 = vmatpush3.bf16.msra.mxu1 %v9057_v41 }
  0xf0   :  { %2141 = vmatpush1.bf16.msra.mxu0 %v9062_v26  ;;  %6918 = vmatprep.subr.bf16.mxu1 %v11173_v10 }
  0xf1   :  { %2142 = vmatprep.subr.bf16.mxu0 %v9067_v40 }
  0xf3   :  { %6919 = vmatpush3.bf16.msra.mxu1 %v9076_v25 }
  0xf4   :  { %2143 = vmatpush1.bf16.msra.mxu0 %v9081_v39  ;;  %6920 = vmatprep.subr.bf16.mxu1 %v11173_v10 }
  0xf5   :  { %2144 = vmatprep.subr.bf16.mxu0 %v9086_v24 }
  0xf7   :  { %6921 = vmatpush3.bf16.msra.mxu1 %v9098_v23 }
  0xf8   :  { %2145 = vmatpush1.bf16.msra.mxu0 %v9103_v37  ;;  %6922 = vmatprep.subr.bf16.mxu1 %v11173_v10 }
  0xf9   :  { %6353 = vmatprep.subr.msk.bf16.mxu0 %vm1901_vm1, %v9112_v36 }
  0xfb   :  { %6923 = vmatpush3.bf16.msra.mxu1 %v9125_v34 }
  0xfc   :  { %2147 = vmatpush1.bf16.msra.mxu0 %v9131_v38  ;;  %6928 = vmatprep.subr.bf16.mxu1 %v11173_v10 }
  0xfd   :  { %2227 = vmatprep.subr.bf16.mxu0 %v8813_v12 }
  0xfe   :  { %6925 = vmatmul.mubr.msk.bf16.vlgmr.msra.gmra.mrb[4].mxu1 %vm1897_vm2, %v6328_v19 }
  0xff   :  { %6354 = vmatmul.mubr.msk.bf16.vlgmr.msra.gmra.mrb[0].mxu0 %vm1897_vm2, %v6328_v19  ;;  %6929 = vmatpush3.bf16.msra.mxu1 %v8818_v13  ;;  %v9175_v19 = vld [vmem:[%s11074_s0 + $0x18] sm:$0x1f]  }
 0x100   :  { %2228 = vmatpush1.bf16.msra.mxu0 %v8823_v14  ;;  %6930 = vmatprep.subr.bf16.mxu1 %v11173_v10 }
 0x101   :  { %2229 = vmatprep.subr.bf16.mxu0 %v8829_v11  ;;  %6944 = vmatprep.mubr.msk.bf16.mxu1 %vm7593_vm0, %v11173_v10 }
 0x102   :  { %2259 = vmatprep.mubr.bf16.mxu0 %v11174_v57 }
 0x103   :  { %6931 = vmatpush3.bf16.msra.mxu1 %v8838_v9 }
 0x104   :  { %2230 = vmatpush1.bf16.msra.mxu0 %v8843_v8  ;;  %6932 = vmatprep.subr.bf16.mxu1 %v11173_v10 }
 0x105   :  { %2231 = vmatprep.subr.bf16.mxu0 %v8850_v7 }
 0x107   :  { %6933 = vmatpush3.bf16.msra.mxu1 %v8856_v56 }
 0x108   :  { %2232 = vmatpush1.bf16.msra.mxu0 %v8863_v5  ;;  %6934 = vmatprep.subr.bf16.mxu1 %v11173_v10 }
 0x109   :  { %2233 = vmatprep.subr.bf16.mxu0 %v8870_v6 }
 0x10b   :  { %6935 = vmatpush3.bf16.msra.mxu1 %v8875_v55 }
 0x10c   :  { %2234 = vmatpush1.bf16.msra.mxu0 %v8882_v4  ;;  %6936 = vmatprep.subr.bf16.mxu1 %v11173_v10 }
 0x10d   :  { %2235 = vmatprep.subr.bf16.mxu0 %v8889_v54 }
 0x10f   :  { %6937 = vmatpush3.bf16.msra.mxu1 %v8896_v3 }
 0x110   :  { %2236 = vmatpush1.bf16.msra.mxu0 %v8901_v53  ;;  %6938 = vmatprep.subr.bf16.mxu1 %v11173_v10 }
 0x111   :  { %2237 = vmatprep.subr.bf16.mxu0 %v8908_v2 }
 0x113   :  { %6939 = vmatpush3.bf16.msra.mxu1 %v8913_v52 }
 0x114   :  { %2238 = vmatpush1.bf16.msra.mxu0 %v8920_v1  ;;  %6940 = vmatprep.subr.bf16.mxu1 %v11173_v10 }
 0x115   :  { %2239 = vmatprep.subr.bf16.mxu0 %v8927_v51 }
 0x117   :  { %6941 = vmatpush3.bf16.msra.mxu1 %v8935_v50 }
 0x118   :  { %2240 = vmatpush1.bf16.msra.mxu0 %v8940_v63  ;;  %6942 = vmatprep.subr.bf16.mxu1 %v11173_v10 }
 0x119   :  { %6359 = vmatprep.subr.msk.bf16.mxu0 %vm1901_vm1, %v8949_v48 }
 0x11b   :  { %6943 = vmatpush3.bf16.msra.mxu1 %v8957_v47 }
 0x11c   :  { %2242 = vmatpush1.bf16.msra.mxu0 %v8960_v60  ;;  %6948 = vmatprep.subr.bf16.mxu1 %v11173_v10 }
 0x11d   :  { %2319 = vmatprep.subr.bf16.mxu0 %v8971_v46 }
 0x11e   :  { %6945 = vmatmul.mubr.msk.bf16.vlgmr.msra.gmra.mrb[8].mxu1 %vm1897_vm2, %v9175_v19 }
 0x11f   :  { %6360 = vmatmul.mubr.msk.bf16.vlgmr.msra.gmra.mrb[4].mxu0 %vm1897_vm2, %v9175_v19  ;;  %6949 = vmatpush3.bf16.msra.mxu1 %v8978_v49 }
 0x120   :  { %2320 = vmatpush1.bf16.msra.mxu0 %v8983_v62  ;;  %6950 = vmatprep.subr.bf16.mxu1 %v11173_v10 }
 0x121   :  { %2321 = vmatprep.subr.bf16.mxu0 %v8990_v61  ;;  %6964 = vmatprep.mubr.msk.bf16.mxu1 %vm7593_vm0, %v11173_v10 }
 0x122   :  { %2351 = vmatprep.mubr.bf16.mxu0 %v11174_v57 }
 0x123   :  { %6951 = vmatpush3.bf16.msra.mxu1 %v8999_v0 }
 0x124   :  { %2322 = vmatpush1.bf16.msra.mxu0 %v9004_v45  ;;  %6952 = vmatprep.subr.bf16.mxu1 %v11173_v10 }
 0x125   :  { %2323 = vmatprep.subr.bf16.mxu0 %v9011_v59 }
 0x127   :  { %6953 = vmatpush3.bf16.msra.mxu1 %v9016_v58 }
 0x128   :  { %2324 = vmatpush1.bf16.msra.mxu0 %v9021_v44  ;;  %6954 = vmatprep.subr.bf16.mxu1 %v11173_v10 }
 0x129   :  { %2325 = vmatprep.subr.bf16.mxu0 %v9029_v43 }
 0x12b   :  { %6955 = vmatpush3.bf16.msra.mxu1 %v9038_v28 }
 0x12c   :  { %2326 = vmatpush1.bf16.msra.mxu0 %v9043_v42  ;;  %6956 = vmatprep.subr.bf16.mxu1 %v11173_v10 }
 0x12d   :  { %2327 = vmatprep.subr.bf16.mxu0 %v9048_v27 }
 0x12f   :  { %6957 = vmatpush3.bf16.msra.mxu1 %v9057_v41 }
 0x130   :  { %2328 = vmatpush1.bf16.msra.mxu0 %v9062_v26  ;;  %6958 = vmatprep.subr.bf16.mxu1 %v11173_v10 }
 0x131   :  { %2329 = vmatprep.subr.bf16.mxu0 %v9067_v40 }
 0x133   :  { %6959 = vmatpush3.bf16.msra.mxu1 %v9076_v25 }
 0x134   :  { %2330 = vmatpush1.bf16.msra.mxu0 %v9081_v39  ;;  %6960 = vmatprep.subr.bf16.mxu1 %v11173_v10 }
 0x135   :  { %2331 = vmatprep.subr.bf16.mxu0 %v9086_v24 }
 0x137   :  { %6961 = vmatpush3.bf16.msra.mxu1 %v9098_v23 }
 0x138   :  { %2332 = vmatpush1.bf16.msra.mxu0 %v9103_v37  ;;  %6962 = vmatprep.subr.bf16.mxu1 %v11173_v10 }
 0x139   :  { %6363 = vmatprep.subr.msk.bf16.mxu0 %vm1901_vm1, %v9112_v36 }
 0x13b   :  { %6963 = vmatpush3.bf16.msra.mxu1 %v9125_v34 }
 0x13c   :  { %2334 = vmatpush1.bf16.msra.mxu0 %v9131_v38  ;;  %6968 = vmatprep.subr.bf16.mxu1 %v11173_v10 }
 0x13d   :  { %2408 = vmatprep.subr.bf16.mxu0 %v8813_v12 }
 0x13e   :  { %6965 = vmatmul.mubr.msk.bf16.vlgmr.msra.gmra.mrb[12].mxu1 %vm1897_vm2, %v9223_v35 }
 0x13f   :  { %6364 = vmatmul.mubr.msk.bf16.vlgmr.msra.gmra.mrb[4].mxu0 %vm1897_vm2, %v9223_v35  ;;  %6969 = vmatpush3.bf16.msra.mxu1 %v8818_v13 }
 0x140   :  { %2409 = vmatpush1.bf16.msra.mxu0 %v8823_v14  ;;  %6970 = vmatprep.subr.bf16.mxu1 %v11173_v10 }
 0x141   :  { %2410 = vmatprep.subr.bf16.mxu0 %v8829_v11  ;;  %6984 = vmatprep.mubr.msk.bf16.mxu1 %vm7593_vm0, %v11173_v10 }
 0x142   :  { %2440 = vmatprep.mubr.bf16.mxu0 %v11174_v57 }
 0x143   :  { %6971 = vmatpush3.bf16.msra.mxu1 %v8838_v9 }
 0x144   :  { %2411 = vmatpush1.bf16.msra.mxu0 %v8843_v8  ;;  %6972 = vmatprep.subr.bf16.mxu1 %v11173_v10 }
 0x145   :  { %2412 = vmatprep.subr.bf16.mxu0 %v8850_v7 }
 0x147   :  { %6973 = vmatpush3.bf16.msra.mxu1 %v8856_v56 }
 0x148   :  { %2413 = vmatpush1.bf16.msra.mxu0 %v8863_v5  ;;  %6974 = vmatprep.subr.bf16.mxu1 %v11173_v10 }
 0x149   :  { %2414 = vmatprep.subr.bf16.mxu0 %v8870_v6 }
 0x14b   :  { %6975 = vmatpush3.bf16.msra.mxu1 %v8875_v55 }
 0x14c   :  { %2415 = vmatpush1.bf16.msra.mxu0 %v8882_v4  ;;  %6976 = vmatprep.subr.bf16.mxu1 %v11173_v10 }
 0x14d   :  { %2416 = vmatprep.subr.bf16.mxu0 %v8889_v54 }
 0x14f   :  { %6977 = vmatpush3.bf16.msra.mxu1 %v8896_v3 }
 0x150   :  { %2417 = vmatpush1.bf16.msra.mxu0 %v8901_v53  ;;  %6978 = vmatprep.subr.bf16.mxu1 %v11173_v10 }
 0x151   :  { %2418 = vmatprep.subr.bf16.mxu0 %v8908_v2 }
 0x153   :  { %6979 = vmatpush3.bf16.msra.mxu1 %v8913_v52 }
 0x154   :  { %2419 = vmatpush1.bf16.msra.mxu0 %v8920_v1  ;;  %6980 = vmatprep.subr.bf16.mxu1 %v11173_v10 }
 0x155   :  { %2420 = vmatprep.subr.bf16.mxu0 %v8927_v51 }
 0x157   :  { %6981 = vmatpush3.bf16.msra.mxu1 %v8935_v50 }
 0x158   :  { %2421 = vmatpush1.bf16.msra.mxu0 %v8940_v63  ;;  %6982 = vmatprep.subr.bf16.mxu1 %v11173_v10 }
 0x159   :  { %6367 = vmatprep.subr.msk.bf16.mxu0 %vm1901_vm1, %v8949_v48 }
 0x15b   :  { %6983 = vmatpush3.bf16.msra.mxu1 %v8957_v47 }
 0x15c   :  { %2423 = vmatpush1.bf16.msra.mxu0 %v8960_v60  ;;  %6988 = vmatprep.subr.bf16.mxu1 %v11173_v10 }
 0x15d   :  { %2492 = vmatprep.subr.bf16.mxu0 %v8971_v46 }
 0x15e   :  { %6985 = vmatmul.mubr.msk.bf16.vlgmr.msra.gmra.mrb[16].mxu1 %vm1897_vm2, %v6366_v21 }
 0x15f   :  { %6368 = vmatmul.mubr.msk.bf16.vlgmr.msra.gmra.mrb[8].mxu0 %vm1897_vm2, %v6366_v21  ;;  %6989 = vmatpush3.bf16.msra.mxu1 %v8978_v49 }
 0x160   :  { %2493 = vmatpush1.bf16.msra.mxu0 %v8983_v62  ;;  %6990 = vmatprep.subr.bf16.mxu1 %v11173_v10 }
 0x161   :  { %2494 = vmatprep.subr.bf16.mxu0 %v8990_v61  ;;  %7004 = vmatprep.mubr.msk.bf16.mxu1 %vm7593_vm0, %v11173_v10 }
 0x162   :  { %2524 = vmatprep.mubr.bf16.mxu0 %v11174_v57 }
 0x163   :  { %6991 = vmatpush3.bf16.msra.mxu1 %v8999_v0 }
 0x164   :  { %2495 = vmatpush1.bf16.msra.mxu0 %v9004_v45  ;;  %6992 = vmatprep.subr.bf16.mxu1 %v11173_v10 }
 0x165   :  { %2496 = vmatprep.subr.bf16.mxu0 %v9011_v59 }
 0x167   :  { %6993 = vmatpush3.bf16.msra.mxu1 %v9016_v58 }
 0x168   :  { %2497 = vmatpush1.bf16.msra.mxu0 %v9021_v44  ;;  %6994 = vmatprep.subr.bf16.mxu1 %v11173_v10 }
 0x169   :  { %2498 = vmatprep.subr.bf16.mxu0 %v9029_v43 }
 0x16b   :  { %6995 = vmatpush3.bf16.msra.mxu1 %v9038_v28 }
 0x16c   :  { %2499 = vmatpush1.bf16.msra.mxu0 %v9043_v42  ;;  %6996 = vmatprep.subr.bf16.mxu1 %v11173_v10 }
 0x16d   :  { %2500 = vmatprep.subr.bf16.mxu0 %v9048_v27 }
 0x16f   :  { %6997 = vmatpush3.bf16.msra.mxu1 %v9057_v41 }
 0x170   :  { %2501 = vmatpush1.bf16.msra.mxu0 %v9062_v26  ;;  %6998 = vmatprep.subr.bf16.mxu1 %v11173_v10 }
 0x171   :  { %2502 = vmatprep.subr.bf16.mxu0 %v9067_v40 }
 0x173   :  { %6999 = vmatpush3.bf16.msra.mxu1 %v9076_v25 }
 0x174   :  { %2503 = vmatpush1.bf16.msra.mxu0 %v9081_v39  ;;  %7000 = vmatprep.subr.bf16.mxu1 %v11173_v10 }
 0x175   :  { %2504 = vmatprep.subr.bf16.mxu0 %v9086_v24 }
 0x177   :  { %7001 = vmatpush3.bf16.msra.mxu1 %v9098_v23 }
 0x178   :  { %2505 = vmatpush1.bf16.msra.mxu0 %v9103_v37  ;;  %7002 = vmatprep.subr.bf16.mxu1 %v11173_v10 }
 0x179   :  { %6370 = vmatprep.subr.msk.bf16.mxu0 %vm1901_vm1, %v9112_v36 }
 0x17b   :  { %7003 = vmatpush3.bf16.msra.mxu1 %v9125_v34 }
 0x17c   :  { %2507 = vmatpush1.bf16.msra.mxu0 %v9131_v38  ;;  %7008 = vmatprep.subr.bf16.mxu1 %v11173_v10 }
 0x17d   :  { %2578 = vmatprep.subr.bf16.mxu0 %v8813_v12 }
 0x17e   :  { %7005 = vmatmul.mubr.msk.bf16.vlgmr.msra.gmra.mrb[20].mxu1 %vm1897_vm2, %v6266_v22 }
 0x17f   :  { %6371 = vmatmul.mubr.msk.bf16.vlgmr.msra.gmra.mrb[12].mxu0 %vm1897_vm2, %v6266_v22  ;;  %7009 = vmatpush3.bf16.msra.mxu1 %v8818_v13 }
 0x180   :  { %2579 = vmatpush1.bf16.msra.mxu0 %v8823_v14  ;;  %7010 = vmatprep.subr.bf16.mxu1 %v11173_v10 }
 0x181   :  { %2580 = vmatprep.subr.bf16.mxu0 %v8829_v11  ;;  %7024 = vmatprep.mubr.msk.bf16.mxu1 %vm7593_vm0, %v11173_v10 }
 0x182   :  { %2610 = vmatprep.mubr.bf16.mxu0 %v11174_v57 }
 0x183   :  { %7011 = vmatpush3.bf16.msra.mxu1 %v8838_v9 }
 0x184   :  { %2581 = vmatpush1.bf16.msra.mxu0 %v8843_v8  ;;  %7012 = vmatprep.subr.bf16.mxu1 %v11173_v10 }
 0x185   :  { %2582 = vmatprep.subr.bf16.mxu0 %v8850_v7  ;;  %v7444_v7 = vld [vmem:[%s11075_s1 + $0x218] ss:$0 sps:$4 sm:$0xff]  }
 0x186   :  { %v9558_v9 = vsel %vm1901_vm1, %v7444_v7, 0 }
 0x187   :  { %7013 = vmatpush3.bf16.msra.mxu1 %v8856_v56 }
 0x188   :  { %2583 = vmatpush1.bf16.msra.mxu0 %v8863_v5  ;;  %7014 = vmatprep.subr.bf16.mxu1 %v11173_v10 }
 0x189   :  { %2584 = vmatprep.subr.bf16.mxu0 %v8870_v6 }
 0x18b   :  { %7015 = vmatpush3.bf16.msra.mxu1 %v8875_v55  ;;  %v9523_v55 = vld [vmem:[%s11075_s1 + $0x1fc] ss:$12 sps:$4 sm:$0xff]  }
 0x18c   :  { %2585 = vmatpush1.bf16.msra.mxu0 %v8882_v4  ;;  %7016 = vmatprep.subr.bf16.mxu1 %v11173_v10 }
 0x18d   :  { %2586 = vmatprep.subr.bf16.mxu0 %v8889_v54  ;;  %v9516_v54 = vld [vmem:[%s11075_s1 + $0x1e0] ss:$12 sps:$4 sm:$0xff]  }
 0x18f   :  { %7017 = vmatpush3.bf16.msra.mxu1 %v8896_v3  ;;  %v9540_v3 = vld [vmem:[%s11075_s1 + $0x1f8] ss:$12 sps:$4 sm:$0xff]  }
 0x190   :  { %2587 = vmatpush1.bf16.msra.mxu0 %v8901_v53  ;;  %7018 = vmatprep.subr.bf16.mxu1 %v11173_v10  ;;  %v9511_v53 = vld [vmem:[%s11075_s1 + $0x1e8] ss:$12 sps:$4 sm:$0xff]  }
 0x191   :  { %2588 = vmatprep.subr.bf16.mxu0 %v8908_v2  ;;  %v9535_v2 = vld [vmem:[%s11075_s1 + $0x200] ss:$12 sps:$4 sm:$0xff]  }
 0x193   :  { %7019 = vmatpush3.bf16.msra.mxu1 %v8913_v52  ;;  %v9352_v52 = vld [vmem:[%s11074_s0 + $0x38] sm:$0xf] }
 0x194   :  { %2589 = vmatpush1.bf16.msra.mxu0 %v8920_v1  ;;  %7020 = vmatprep.subr.bf16.mxu1 %v11173_v10 }
 0x195   :  { %2590 = vmatprep.subr.bf16.mxu0 %v8927_v51  ;;  %v9504_v51 = vld [vmem:[%s11075_s1 + $0x1e4] ss:$12 sps:$4 sm:$0xff]  }
 0x197   :  { %7021 = vmatpush3.bf16.msra.mxu1 %v8935_v50  ;;  %v9497_v50 = vld [vmem:[%s11075_s1 + $0x1c8] ss:$12 sps:$4 sm:$0xff]  }
 0x198   :  { %2591 = vmatpush1.bf16.msra.mxu0 %v8940_v63  ;;  %7022 = vmatprep.subr.bf16.mxu1 %v11173_v10 }
 0x199   :  { %6374 = vmatprep.subr.msk.bf16.mxu0 %vm1901_vm1, %v8949_v48  ;;  %v9492_v48 = vld [vmem:[%s11075_s1 + $0x1d0] ss:$12 sps:$4 sm:$0xff]  }
 0x19b   :  { %7023 = vmatpush3.bf16.msra.mxu1 %v8957_v47  ;;  %v9485_v47 = vld [vmem:[%s11075_s1 + $0x1cc] ss:$12 sps:$4 sm:$0xff]  }
 0x19c   :  { %2593 = vmatpush1.bf16.msra.mxu0 %v8960_v60  ;;  %7028 = vmatprep.subr.bf16.mxu1 %v11173_v10 }
 0x19d   :  { %2662 = vmatprep.subr.bf16.mxu0 %v8971_v46 }
 0x19e   :  { %7025 = vmatmul.mubr.msk.bf16.vlgmr.msra.gmra.mrb[24].mxu1 %vm1897_vm2, %v9352_v52 }
 0x19f   :  { %6375 = vmatmul.mubr.msk.bf16.vlgmr.msra.gmra.mrb[16].mxu0 %vm1897_vm2, %v9352_v52  ;;  %7029 = vmatpush3.bf16.msra.mxu1 %v8978_v49 }
 0x1a0   :  { %2663 = vmatpush1.bf16.msra.mxu0 %v8983_v62  ;;  %7030 = vmatprep.subr.bf16.mxu1 %v11173_v10  ;;  %v9606_v62 = vld [vmem:[%s11074_s0 + $0x20] sm:$0x1f]  }
 0x1a1   :  { %2664 = vmatprep.subr.bf16.mxu0 %v8990_v61  ;;  %7044 = vmatprep.mubr.msk.bf16.mxu1 %vm7593_vm0, %v11173_v10 }
 0x1a2   :  { %2694 = vmatprep.mubr.bf16.mxu0 %v11174_v57 }
 0x1a3   :  { %7031 = vmatpush3.bf16.msra.mxu1 %v8999_v0 }
 0x1a4   :  { %2665 = vmatpush1.bf16.msra.mxu0 %v9004_v45  ;;  %7032 = vmatprep.subr.bf16.mxu1 %v11173_v10 }
 0x1a5   :  { %2666 = vmatprep.subr.bf16.mxu0 %v9011_v59 }
 0x1a7   :  { %7033 = vmatpush3.bf16.msra.mxu1 %v9016_v58  ;;  %v6408_v58 = vld [vmem:[%s11075_s1 + $0x210] sm:$0xff] }
 0x1a8   :  { %2667 = vmatpush1.bf16.msra.mxu0 %v9021_v44  ;;  %7034 = vmatprep.subr.bf16.mxu1 %v11173_v10  ;;  %v9547_v6 = vcombine.high %v6408_v58, %v6408_v58  ;;  %v6431_v8 = vcombine.low %v6408_v58, %v6408_v58  ;;  %v9819_v58 = vld [vmem:[%s11075_s1 + $0x294] ss:$12 sps:$4 sm:$0xff]  }
 0x1a9   :  { %2668 = vmatprep.subr.bf16.mxu0 %v9029_v43  ;;  %v9478_v43 = vld [vmem:[%s11075_s1 + $0x1b0] ss:$12 sps:$4 sm:$0xff]  }
 0x1aa   :  { %v9561_v11 = vsel %vm1901_vm1, %v6431_v8, 0 }
 0x1ab   :  { %7035 = vmatpush3.bf16.msra.mxu1 %v9038_v28 }
 0x1ac   :  { %2669 = vmatpush1.bf16.msra.mxu0 %v9043_v42  ;;  %7036 = vmatprep.subr.bf16.mxu1 %v11173_v10  ;;  %v9473_v42 = vld [vmem:[%s11075_s1 + $0x1b8] ss:$12 sps:$4 sm:$0xff]  }
 0x1ad   :  { %2670 = vmatprep.subr.bf16.mxu0 %v9048_v27  ;;  %v9421_v27 = vld [vmem:[%s11075_s1 + $0x184] ss:$12 sps:$4 sm:$0xff]  }
 0x1af   :  { %7037 = vmatpush3.bf16.msra.mxu1 %v9057_v41  ;;  %v9466_v41 = vld [vmem:[%s11075_s1 + $0x1b4] ss:$12 sps:$4 sm:$0xff]  }
 0x1b0   :  { %2671 = vmatpush1.bf16.msra.mxu0 %v9062_v26  ;;  %7038 = vmatprep.subr.bf16.mxu1 %v11173_v10  ;;  %v9414_v26 = vld [vmem:[%s11075_s1 + $0x168] ss:$12 sps:$4 sm:$0xff]  }
 0x1b1   :  { %2672 = vmatprep.subr.bf16.mxu0 %v9067_v40  ;;  %v1988_v44 = vpop.f32.mrb[0].mxu1  ;;  %v9459_v40 = vld [vmem:[%s11075_s1 + $0x198] ss:$12 sps:$4 sm:$0xff]  }
 0x1b2   :  { %v6906_v45 = vpop.f32.mrb[1].mxu1 }
 0x1b3   :  { %v9383_v46 = vpop.f32.mrb[2].mxu1  ;;  %7039 = vmatpush3.bf16.msra.mxu1 %v9076_v25  ;;  %v9397_v25 = vld [vmem:[%s11075_s1 + $0x16c] ss:$12 sps:$4 sm:$0xff]  }
 0x1b4   :  { %2673 = vmatpush1.bf16.msra.mxu0 %v9081_v39  ;;  %v6907_v28 = vpop.f32.mrb[3].mxu1  ;;  %7040 = vmatprep.subr.bf16.mxu1 %v11173_v10  ;;  %v9454_v39 = vld [vmem:[%s11075_s1 + $0x1a0] ss:$12 sps:$4 sm:$0xff]  }
 0x1b5   :  { %2674 = vmatprep.subr.bf16.mxu0 %v9086_v24  ;;  %v9409_v24 = vld [vmem:[%s11075_s1 + $0x170] ss:$12 sps:$4 sm:$0xff]  }
 0x1b7   :  { %7041 = vmatpush3.bf16.msra.mxu1 %v9098_v23  ;;  %v9404_v23 = vld [vmem:[%s11074_s0 + $0x30] sm:$0xf] }
 0x1b8   :  { %2675 = vmatpush1.bf16.msra.mxu0 %v9103_v37  ;;  %7042 = vmatprep.subr.bf16.mxu1 %v11173_v10  ;;  %v9444_v37 = vld [vmem:[%s11075_s1 + $0x19c] ss:$12 sps:$4 sm:$0xff]  }
 0x1b9   :  { %6377 = vmatprep.subr.msk.bf16.mxu0 %vm1901_vm1, %v9112_v36  ;;  %v9437_v36 = vld [vmem:[%s11075_s1 + $0x180] ss:$12 sps:$4 sm:$0xff]  }
 0x1bb   :  { %7043 = vmatpush3.bf16.msra.mxu1 %v9125_v34  ;;  %v9432_v34 = vld [vmem:[%s11075_s1 + $0x188] ss:$12 sps:$4 sm:$0xff]  }
 0x1bc   :  { %2677 = vmatpush1.bf16.msra.mxu0 %v9131_v38  ;;  %7048 = vmatprep.subr.bf16.mxu1 %v11173_v10 }
 0x1bd   :  { %2903 = vmatprep.subr.bf16.mxu0 %v9397_v25 }
 0x1be   :  { %7045 = vmatmul.mubr.msk.bf16.vlgmr.msra.gmra.mrb[28].mxu1 %vm1897_vm2, %v9404_v23 }
 0x1bf   :  { %6378 = vmatmul.mubr.msk.bf16.vlgmr.msra.gmra.mrb[20].mxu0 %vm1897_vm2, %v9404_v23  ;;  %7049 = vmatpush3.bf16.msra.mxu1 %v9409_v24 }
 0x1c0   :  { %2904 = vmatpush1.bf16.msra.mxu0 %v9414_v26  ;;  %7050 = vmatprep.subr.bf16.mxu1 %v11173_v10 }
 0x1c1   :  { %2905 = vmatprep.subr.bf16.mxu0 %v9421_v27  ;;  %7064 = vmatprep.mubr.msk.bf16.mxu1 %vm7593_vm0, %v11173_v10 }
 0x1c2   :  { %2935 = vmatprep.mubr.bf16.mxu0 %v11174_v57 }
 0x1c3   :  { %7051 = vmatpush3.bf16.msra.mxu1 %v9432_v34 }
 0x1c4   :  { %2906 = vmatpush1.bf16.msra.mxu0 %v9437_v36  ;;  %7052 = vmatprep.subr.bf16.mxu1 %v11173_v10 }
 0x1c5   :  { %2907 = vmatprep.subr.bf16.mxu0 %v9444_v37 }
 0x1c7   :  { %7053 = vmatpush3.bf16.msra.mxu1 %v9454_v39 }
 0x1c8   :  { %2908 = vmatpush1.bf16.msra.mxu0 %v9459_v40  ;;  %7054 = vmatprep.subr.bf16.mxu1 %v11173_v10 }
 0x1c9   :  { %2909 = vmatprep.subr.bf16.mxu0 %v9466_v41 }
 0x1cb   :  { %7055 = vmatpush3.bf16.msra.mxu1 %v9473_v42 }
 0x1cc   :  { %2910 = vmatpush1.bf16.msra.mxu0 %v9478_v43  ;;  %7056 = vmatprep.subr.bf16.mxu1 %v11173_v10 }
 0x1cd   :  { %2911 = vmatprep.subr.bf16.mxu0 %v9485_v47 }
 0x1cf   :  { %7057 = vmatpush3.bf16.msra.mxu1 %v9492_v48 }
 0x1d0   :  { %2912 = vmatpush1.bf16.msra.mxu0 %v9497_v50  ;;  %7058 = vmatprep.subr.bf16.mxu1 %v11173_v10 }
 0x1d1   :  { %2913 = vmatprep.subr.bf16.mxu0 %v9504_v51  ;;  %v2209_v56 = vpop.f32.mrb[4].mxu1 }
 0x1d2   :  { %v9528_v60 = vadd.f32 %v2209_v56, %v1988_v44  ;;  %v6926_v63 = vpop.f32.mrb[5].mxu1  ;;  %v9814_v56 = vld [vmem:[%s11075_s1 + $0x29c] ss:$12 sps:$4 sm:$0xff]  }
 0x1d3   :  { %v2212_v1 = vpop.f32.mrb[6].mxu1  ;;  %7059 = vmatpush3.bf16.msra.mxu1 %v9511_v53  ;;  %v9826_v63 = vld [vmem:[%s11075_s1 + $0x2b0] ss:$12 sps:$4 sm:$0xff]  }
 0x1d4   :  { %2914 = vmatpush1.bf16.msra.mxu0 %v9516_v54  ;;  %v9543_v4 = vadd.f32 %v2212_v1, %v9383_v46  ;;  %v6927_v5 = vpop.f32.mrb[7].mxu1  ;;  %7060 = vmatprep.subr.bf16.mxu1 %v11173_v10 }
 0x1d5   :  { %2915 = vmatprep.subr.bf16.mxu0 %v9523_v55 }
 0x1d7   :  { %7061 = vmatpush3.bf16.msra.mxu1 %v9535_v2 }
 0x1d8   :  { %2916 = vmatpush1.bf16.msra.mxu0 %v9540_v3  ;;  %7062 = vmatprep.subr.bf16.mxu1 %v11173_v10 }
 0x1d9   :  { %6434 = vmatprep.subr.msk.bf16.mxu0 %vm1901_vm1, %v9547_v6 }
 0x1db   :  { %7063 = vmatpush3.bf16.msra.mxu1 %v9558_v9 }
 0x1dc   :  { %2918 = vmatpush1.bf16.msra.mxu0 %v9561_v11  ;;  %7068 = vmatprep.subr.bf16.mxu1 %v11173_v10 }
 0x1dd   :  { %3003 = vmatprep.subr.bf16.mxu0 %v9397_v25 }
 0x1de   :  { %7065 = vmatmul.mubr.msk.bf16.vlgmr.msra.gmra.mrb[32].mxu1 %vm1897_vm2, %v9223_v35 }
 0x1df   :  { %6435 = vmatmul.mubr.msk.bf16.vlgmr.msra.gmra.mrb[0].mxu0 %vm1897_vm2, %v9223_v35  ;;  %7069 = vmatpush3.bf16.msra.mxu1 %v9409_v24 }
 0x1e0   :  { %3004 = vmatpush1.bf16.msra.mxu0 %v9414_v26  ;;  %7070 = vmatprep.subr.bf16.mxu1 %v11173_v10 }
 0x1e1   :  { %3005 = vmatprep.subr.bf16.mxu0 %v9421_v27  ;;  %7084 = vmatprep.mubr.msk.bf16.mxu1 %vm7593_vm0, %v11173_v10 }
 0x1e2   :  { %3035 = vmatprep.mubr.bf16.mxu0 %v11174_v57 }
 0x1e3   :  { %7071 = vmatpush3.bf16.msra.mxu1 %v9432_v34 }
 0x1e4   :  { %3006 = vmatpush1.bf16.msra.mxu0 %v9437_v36  ;;  %7072 = vmatprep.subr.bf16.mxu1 %v11173_v10 }
 0x1e5   :  { %3007 = vmatprep.subr.bf16.mxu0 %v9444_v37 }
 0x1e7   :  { %7073 = vmatpush3.bf16.msra.mxu1 %v9454_v39 }
 0x1e8   :  { %3008 = vmatpush1.bf16.msra.mxu0 %v9459_v40  ;;  %7074 = vmatprep.subr.bf16.mxu1 %v11173_v10 }
 0x1e9   :  { %3009 = vmatprep.subr.bf16.mxu0 %v9466_v41 }
 0x1eb   :  { %7075 = vmatpush3.bf16.msra.mxu1 %v9473_v42 }
 0x1ec   :  { %3010 = vmatpush1.bf16.msra.mxu0 %v9478_v43  ;;  %7076 = vmatprep.subr.bf16.mxu1 %v11173_v10 }
 0x1ed   :  { %3011 = vmatprep.subr.bf16.mxu0 %v9485_v47 }
 0x1ef   :  { %7077 = vmatpush3.bf16.msra.mxu1 %v9492_v48 }
 0x1f0   :  { %3012 = vmatpush1.bf16.msra.mxu0 %v9497_v50  ;;  %7078 = vmatprep.subr.bf16.mxu1 %v11173_v10 }
 0x1f1   :  { %3013 = vmatprep.subr.bf16.mxu0 %v9504_v51  ;;  %v2304_v12 = vpop.f32.mrb[8].mxu1 }
 0x1f2   :  { %v6946_v13 = vpop.f32.mrb[9].mxu1 }
 0x1f3   :  { %v2307_v14 = vpop.f32.mrb[10].mxu1  ;;  %7079 = vmatpush3.bf16.msra.mxu1 %v9511_v53  ;;  %v9845_v13 = vld [vmem:[%s11075_s1 + $0x2b4] ss:$12 sps:$4 sm:$0xff]  }
 0x1f4   :  { %3014 = vmatpush1.bf16.msra.mxu0 %v9516_v54  ;;  %v6947_v49 = vpop.f32.mrb[11].mxu1  ;;  %7080 = vmatprep.subr.bf16.mxu1 %v11173_v10  ;;  %v9850_v14 = vld [vmem:[%s11075_s1 + $0x2ac] ss:$12 sps:$4 sm:$0xff]  }
 0x1f5   :  { %3015 = vmatprep.subr.bf16.mxu0 %v9523_v55 }
 0x1f7   :  { %7081 = vmatpush3.bf16.msra.mxu1 %v9535_v2 }
 0x1f8   :  { %3016 = vmatpush1.bf16.msra.mxu0 %v9540_v3  ;;  %7082 = vmatprep.subr.bf16.mxu1 %v11173_v10 }
 0x1f9   :  { %6440 = vmatprep.subr.msk.bf16.mxu0 %vm1901_vm1, %v9547_v6 }
 0x1fb   :  { %7083 = vmatpush3.bf16.msra.mxu1 %v9558_v9 }
 0x1fc   :  { %3018 = vmatpush1.bf16.msra.mxu0 %v9561_v11  ;;  %7088 = vmatprep.subr.bf16.mxu1 %v11173_v10 }
 0x1fd   :  { %3093 = vmatprep.subr.bf16.mxu0 %v9397_v25 }
 0x1fe   :  { %7085 = vmatmul.mubr.msk.bf16.vlgmr.msra.gmra.mrb[36].mxu1 %vm1897_vm2, %v9606_v62 }
 0x1ff   :  { %6441 = vmatmul.mubr.msk.bf16.vlgmr.msra.gmra.mrb[4].mxu0 %vm1897_vm2, %v9606_v62  ;;  %7089 = vmatpush3.bf16.msra.mxu1 %v9409_v24 }
 0x200   :  { %3094 = vmatpush1.bf16.msra.mxu0 %v9414_v26  ;;  %7090 = vmatprep.subr.bf16.mxu1 %v11173_v10 }
 0x201   :  { %3095 = vmatprep.subr.bf16.mxu0 %v9421_v27  ;;  %7104 = vmatprep.mubr.msk.bf16.mxu1 %vm7593_vm0, %v11173_v10 }
 0x202   :  { %3125 = vmatprep.mubr.bf16.mxu0 %v11174_v57 }
 0x203   :  { %7091 = vmatpush3.bf16.msra.mxu1 %v9432_v34 }
 0x204   :  { %3096 = vmatpush1.bf16.msra.mxu0 %v9437_v36  ;;  %7092 = vmatprep.subr.bf16.mxu1 %v11173_v10 }
 0x205   :  { %3097 = vmatprep.subr.bf16.mxu0 %v9444_v37 }
 0x207   :  { %7093 = vmatpush3.bf16.msra.mxu1 %v9454_v39 }
 0x208   :  { %3098 = vmatpush1.bf16.msra.mxu0 %v9459_v40  ;;  %7094 = vmatprep.subr.bf16.mxu1 %v11173_v10 }
 0x209   :  { %3099 = vmatprep.subr.bf16.mxu0 %v9466_v41 }
 0x20b   :  { %7095 = vmatpush3.bf16.msra.mxu1 %v9473_v42 }
 0x20c   :  { %3100 = vmatpush1.bf16.msra.mxu0 %v9478_v43  ;;  %7096 = vmatprep.subr.bf16.mxu1 %v11173_v10 }
 0x20d   :  { %3101 = vmatprep.subr.bf16.mxu0 %v9485_v47 }
 0x20f   :  { %7097 = vmatpush3.bf16.msra.mxu1 %v9492_v48 }
 0x210   :  { %3102 = vmatpush1.bf16.msra.mxu0 %v9497_v50  ;;  %7098 = vmatprep.subr.bf16.mxu1 %v11173_v10 }
 0x211   :  { %3103 = vmatprep.subr.bf16.mxu0 %v9504_v51  ;;  %v2396_v61 = vpop.f32.mrb[12].mxu1 }
 0x212   :  { %v9639_v0 = vadd.f32 %v2396_v61, %v2304_v12  ;;  %v6966_v59 = vpop.f32.mrb[13].mxu1 }
 0x213   :  { %v2399_v38 = vpop.f32.mrb[14].mxu1  ;;  %7099 = vmatpush3.bf16.msra.mxu1 %v9511_v53 }
 0x214   :  { %3104 = vmatpush1.bf16.msra.mxu0 %v9516_v54  ;;  %v6967_v35 = vpop.f32.mrb[15].mxu1  ;;  %7100 = vmatprep.subr.bf16.mxu1 %v11173_v10  ;;  %v7477_v38 = vld [vmem:[%s11075_s1 + $0x2cc] ss:$0 sps:$4 sm:$0xff]  }
 0x215   :  { %3105 = vmatprep.subr.bf16.mxu0 %v9523_v55 }
 0x217   :  { %7101 = vmatpush3.bf16.msra.mxu1 %v9535_v2 }
 0x218   :  { %3106 = vmatpush1.bf16.msra.mxu0 %v9540_v3  ;;  %7102 = vmatprep.subr.bf16.mxu1 %v11173_v10 }
 0x219   :  { %6443 = vmatprep.subr.msk.bf16.mxu0 %vm1901_vm1, %v9547_v6 }
 0x21b   :  { %7103 = vmatpush3.bf16.msra.mxu1 %v9558_v9 }
 0x21c   :  { %3108 = vmatpush1.bf16.msra.mxu0 %v9561_v11  ;;  %7108 = vmatprep.subr.bf16.mxu1 %v11173_v10 }
 0x21d   :  { %3185 = vmatprep.subr.bf16.mxu0 %v9397_v25  ;;  %v3177_v25 = vld [vmem:[%s11074_s0] sm:$0xe] }
 0x21e   :  { %7105 = vmatmul.mubr.msk.bf16.vlgmr.msra.gmra.mrb[40].mxu1 %vm1897_vm2, %v9404_v23 }
 0x21f   :  { %6444 = vmatmul.mubr.msk.bf16.vlgmr.msra.gmra.mrb[24].mxu0 %vm1897_vm2, %v9404_v23  ;;  %7109 = vmatpush3.bf16.msra.mxu1 %v9409_v24 }
 0x220   :  { %3186 = vmatpush1.bf16.msra.mxu0 %v9414_v26  ;;  %7110 = vmatprep.subr.bf16.mxu1 %v11173_v10  ;;  %v6446_v26 = vcombine.low %v3177_v25, %v9120_v20  ;;  %v9712_v20 = vld [vmem:[%s11075_s1 + $0x224] ss:$12 sps:$4 sm:$0xff]  }
 0x221   :  { %3187 = vmatprep.subr.bf16.mxu0 %v9421_v27  ;;  %7124 = vmatprep.mubr.msk.bf16.mxu1 %vm7593_vm0, %v11173_v10  ;;  %v9703_v27 = vld [vmem:[%s11075_s1 + $0x220] ss:$12 sps:$4 sm:$0xff]  }
 0x222   :  { %3217 = vmatprep.mubr.bf16.mxu0 %v11174_v57 }
 0x223   :  { %7111 = vmatpush3.bf16.msra.mxu1 %v9432_v34  ;;  %v9705_v34 = vrot.slane %v6446_v26, 1  ;;  %v7479_v26 = vld [vmem:[%s11074_s0 + $0x28] sm:$0x1f]  }
 0x224   :  { %3188 = vmatpush1.bf16.msra.mxu0 %v9437_v36  ;;  %7112 = vmatprep.subr.bf16.mxu1 %v11173_v10  ;;  %v9717_v36 = vld [vmem:[%s11075_s1 + $0x21c] ss:$12 sps:$4 sm:$0xff]  }
 0x225   :  { %3189 = vmatprep.subr.bf16.mxu0 %v9444_v37  ;;  %v9724_v37 = vld [vmem:[%s11075_s1 + $0x238] ss:$12 sps:$4 sm:$0xff]  }
 0x227   :  { %7113 = vmatpush3.bf16.msra.mxu1 %v9454_v39  ;;  %v9735_v39 = vld [vmem:[%s11075_s1 + $0x23c] ss:$12 sps:$4 sm:$0xff]  }
 0x228   :  { %3190 = vmatpush1.bf16.msra.mxu0 %v9459_v40  ;;  %7114 = vmatprep.subr.bf16.mxu1 %v11173_v10  ;;  %v9740_v40 = vld [vmem:[%s11075_s1 + $0x234] ss:$12 sps:$4 sm:$0xff]  }
 0x229   :  { %3191 = vmatprep.subr.bf16.mxu0 %v9466_v41  ;;  %v9747_v41 = vld [vmem:[%s11075_s1 + $0x250] ss:$12 sps:$4 sm:$0xff]  }
 0x22b   :  { %7115 = vmatpush3.bf16.msra.mxu1 %v9473_v42  ;;  %v9757_v42 = vld [vmem:[%s11075_s1 + $0x254] ss:$12 sps:$4 sm:$0xff]  }
 0x22c   :  { %3192 = vmatpush1.bf16.msra.mxu0 %v9478_v43  ;;  %7116 = vmatprep.subr.bf16.mxu1 %v11173_v10  ;;  %v9762_v43 = vld [vmem:[%s11075_s1 + $0x24c] ss:$12 sps:$4 sm:$0xff]  }
 0x22d   :  { %3193 = vmatprep.subr.bf16.mxu0 %v9485_v47  ;;  %v9769_v47 = vld [vmem:[%s11075_s1 + $0x268] ss:$12 sps:$4 sm:$0xff]  }
 0x22f   :  { %7117 = vmatpush3.bf16.msra.mxu1 %v9492_v48  ;;  %v9776_v48 = vld [vmem:[%s11075_s1 + $0x26c] ss:$12 sps:$4 sm:$0xff]  }
 0x230   :  { %3194 = vmatpush1.bf16.msra.mxu0 %v9497_v50  ;;  %7118 = vmatprep.subr.bf16.mxu1 %v11173_v10  ;;  %v9781_v50 = vld [vmem:[%s11075_s1 + $0x264] ss:$12 sps:$4 sm:$0xff]  }
 0x231   :  { %3195 = vmatprep.subr.bf16.mxu0 %v9504_v51  ;;  %v9681_v21 = vpop.f32.mrb[16].mxu1  ;;  %v9788_v51 = vld [vmem:[%s11075_s1 + $0x280] ss:$12 sps:$4 sm:$0xff]  }
 0x232   :  { %v9683_v22 = vpop.f32.mrb[8].mxu0  ;;  %v6986_v44 = vpop.f32.mrb[17].mxu1 }
 0x233   :  { %v9685_v45 = vpop.f32.mrb[9].mxu0  ;;  %v2486_v46 = vpop.f32.mrb[18].mxu1  ;;  %7119 = vmatpush3.bf16.msra.mxu1 %v9511_v53  ;;  %v9795_v53 = vld [vmem:[%s11075_s1 + $0x284] ss:$12 sps:$4 sm:$0xff]  }
 0x234   :  { %v2446_v28 = vpop.f32.mrb[10].mxu0  ;;  %3196 = vmatpush1.bf16.msra.mxu0 %v9516_v54  ;;  %v6987_v23 = vpop.f32.mrb[19].mxu1  ;;  %7120 = vmatprep.subr.bf16.mxu1 %v11173_v10  ;;  %v9800_v54 = vld [vmem:[%s11075_s1 + $0x27c] ss:$12 sps:$4 sm:$0xff]  }
 0x235   :  { %v2447_v24 = vpop.f32.mrb[11].mxu0  ;;  %3197 = vmatprep.subr.bf16.mxu0 %v9523_v55  ;;  %v9807_v55 = vld [vmem:[%s11075_s1 + $0x298] ss:$12 sps:$4 sm:$0xff]  }
 0x237   :  { %7121 = vmatpush3.bf16.msra.mxu1 %v9535_v2 }
 0x238   :  { %3198 = vmatpush1.bf16.msra.mxu0 %v9540_v3  ;;  %7122 = vmatprep.subr.bf16.mxu1 %v11173_v10  ;;  %v6478_v3 = vld [vmem:[%s11075_s1 + $0x2c4] sm:$0xff] }
 0x239   :  { %6447 = vmatprep.subr.msk.bf16.mxu0 %vm1901_vm1, %v9547_v6  ;;  %v9854_v59 = vcombine.high %v6478_v3, %v6478_v3  ;;  %v6501_v35 = vcombine.low %v6478_v3, %v6478_v3 }
 0x23b   :  { %7123 = vmatpush3.bf16.msra.mxu1 %v9558_v9 }
 0x23c   :  { %3200 = vmatpush1.bf16.msra.mxu0 %v9561_v11  ;;  %7128 = vmatprep.subr.bf16.mxu1 %v11173_v10 }
 0x23d   :  { %3429 = vmatprep.subr.bf16.mxu0 %v9703_v27 }
 0x23e   :  { %7125 = vmatmul.mubr.msk.bf16.vlgmr.msra.gmra.mrb[44].mxu1 %vm1897_vm2, %v9705_v34 }
 0x23f   :  { %6448 = vmatmul.mubr.msk.bf16.vlgmr.msra.gmra.mrb[28].mxu0 %vm1897_vm2, %v9705_v34  ;;  %7129 = vmatpush3.bf16.msra.mxu1 %v9712_v20 }
 0x240   :  { %3430 = vmatpush1.bf16.msra.mxu0 %v9717_v36  ;;  %7130 = vmatprep.subr.bf16.mxu1 %v11173_v10 }
 0x241   :  { %3431 = vmatprep.subr.bf16.mxu0 %v9724_v37  ;;  %7144 = vmatprep.mubr.msk.bf16.mxu1 %vm7593_vm0, %v11173_v10 }
 0x242   :  { %3461 = vmatprep.mubr.bf16.mxu0 %v11174_v57 }
 0x243   :  { %7131 = vmatpush3.bf16.msra.mxu1 %v9735_v39 }
 0x244   :  { %3432 = vmatpush1.bf16.msra.mxu0 %v9740_v40  ;;  %7132 = vmatprep.subr.bf16.mxu1 %v11173_v10 }
 0x245   :  { %3433 = vmatprep.subr.bf16.mxu0 %v9747_v41 }
 0x247   :  { %7133 = vmatpush3.bf16.msra.mxu1 %v9757_v42 }
 0x248   :  { %3434 = vmatpush1.bf16.msra.mxu0 %v9762_v43  ;;  %7134 = vmatprep.subr.bf16.mxu1 %v11173_v10 }
 0x249   :  { %3435 = vmatprep.subr.bf16.mxu0 %v9769_v47 }
 0x24b   :  { %7135 = vmatpush3.bf16.msra.mxu1 %v9776_v48 }
 0x24c   :  { %3436 = vmatpush1.bf16.msra.mxu0 %v9781_v50  ;;  %7136 = vmatprep.subr.bf16.mxu1 %v11173_v10 }
 0x24d   :  { %3437 = vmatprep.subr.bf16.mxu0 %v9788_v51 }
 0x24f   :  { %7137 = vmatpush3.bf16.msra.mxu1 %v9795_v53 }
 0x250   :  { %3438 = vmatpush1.bf16.msra.mxu0 %v9800_v54  ;;  %7138 = vmatprep.subr.bf16.mxu1 %v11173_v10 }
 0x251   :  { %3439 = vmatprep.subr.bf16.mxu0 %v9807_v55  ;;  %v2567_v1 = vpop.f32.mrb[20].mxu1 }
 0x252   :  { %v2526_v2 = vpop.f32.mrb[12].mxu0  ;;  %v9832_v5 = vadd.f32 %v2567_v1, %v9681_v21  ;;  %v7006_v7 = vpop.f32.mrb[21].mxu1  ;;  %v9865_v21 = vsel %vm1901_vm1, %v7477_v38, 0 }
 0x253   :  { %v9835_v6 = vadd.f32 %v2526_v2, %v9683_v22  ;;  %v2528_v8 = vpop.f32.mrb[13].mxu0  ;;  %v2570_v11 = vpop.f32.mrb[22].mxu1  ;;  %7139 = vmatpush3.bf16.msra.mxu1 %v9814_v56  ;;  %v9868_v22 = vsel %vm1901_vm1, %v6501_v35, 0 }
 0x254   :  { %v9838_v9 = vadd.f32 %v2528_v8, %v9685_v45  ;;  %v2530_v12 = vpop.f32.mrb[14].mxu0  ;;  %3440 = vmatpush1.bf16.msra.mxu0 %v9819_v58  ;;  %v7007_v49 = vpop.f32.mrb[23].mxu1  ;;  %7140 = vmatprep.subr.bf16.mxu1 %v11173_v10 }
 0x255   :  { %v2531_v61 = vpop.f32.mrb[15].mxu0  ;;  %3441 = vmatprep.subr.bf16.mxu0 %v9826_v63 }
 0x257   :  { %7141 = vmatpush3.bf16.msra.mxu1 %v9845_v13 }
 0x258   :  { %3442 = vmatpush1.bf16.msra.mxu0 %v9850_v14  ;;  %7142 = vmatprep.subr.bf16.mxu1 %v11173_v10 }
 0x259   :  { %6504 = vmatprep.subr.msk.bf16.mxu0 %vm1901_vm1, %v9854_v59 }
 0x25b   :  { %7143 = vmatpush3.bf16.msra.mxu1 %v9865_v21 }
 0x25c   :  { %3444 = vmatpush1.bf16.msra.mxu0 %v9868_v22  ;;  %7148 = vmatprep.subr.bf16.mxu1 %v11173_v10 }
 0x25d   :  { %3529 = vmatprep.subr.bf16.mxu0 %v9703_v27 }
 0x25e   :  { %7145 = vmatmul.mubr.msk.bf16.vlgmr.msra.gmra.mrb[48].mxu1 %vm1897_vm2, %v9175_v19 }
 0x25f   :  { %6505 = vmatmul.mubr.msk.bf16.vlgmr.msra.gmra.mrb[0].mxu0 %vm1897_vm2, %v9175_v19  ;;  %7149 = vmatpush3.bf16.msra.mxu1 %v9712_v20 }
 0x260   :  { %3530 = vmatpush1.bf16.msra.mxu0 %v9717_v36  ;;  %7150 = vmatprep.subr.bf16.mxu1 %v11173_v10 }
 0x261   :  { %3531 = vmatprep.subr.bf16.mxu0 %v9724_v37  ;;  %7164 = vmatprep.mubr.msk.bf16.mxu1 %vm7593_vm0, %v11173_v10 }
 0x262   :  { %3561 = vmatprep.mubr.bf16.mxu0 %v11174_v57 }
 0x263   :  { %7151 = vmatpush3.bf16.msra.mxu1 %v9735_v39 }
 0x264   :  { %3532 = vmatpush1.bf16.msra.mxu0 %v9740_v40  ;;  %7152 = vmatprep.subr.bf16.mxu1 %v11173_v10 }
 0x265   :  { %3533 = vmatprep.subr.bf16.mxu0 %v9747_v41 }
 0x267   :  { %7153 = vmatpush3.bf16.msra.mxu1 %v9757_v42 }
 0x268   :  { %3534 = vmatpush1.bf16.msra.mxu0 %v9762_v43  ;;  %7154 = vmatprep.subr.bf16.mxu1 %v11173_v10 }
 0x269   :  { %3535 = vmatprep.subr.bf16.mxu0 %v9769_v47 }
 0x26b   :  { %7155 = vmatpush3.bf16.msra.mxu1 %v9776_v48 }
 0x26c   :  { %3536 = vmatpush1.bf16.msra.mxu0 %v9781_v50  ;;  %7156 = vmatprep.subr.bf16.mxu1 %v11173_v10 }
 0x26d   :  { %3537 = vmatprep.subr.bf16.mxu0 %v9788_v51 }
 0x26f   :  { %7157 = vmatpush3.bf16.msra.mxu1 %v9795_v53 }
 0x270   :  { %3538 = vmatpush1.bf16.msra.mxu0 %v9800_v54  ;;  %7158 = vmatprep.subr.bf16.mxu1 %v11173_v10 }
 0x271   :  { %3539 = vmatprep.subr.bf16.mxu0 %v9807_v55  ;;  %v2653_v19 = vpop.f32.mrb[24].mxu1 }
 0x272   :  { %v2612_v44 = vpop.f32.mrb[16].mxu0  ;;  %v7026_v45 = vpop.f32.mrb[25].mxu1 }
 0x273   :  { %v2614_v46 = vpop.f32.mrb[17].mxu0  ;;  %v2656_v28 = vpop.f32.mrb[26].mxu1  ;;  %7159 = vmatpush3.bf16.msra.mxu1 %v9814_v56 }
 0x274   :  { %v2616_v25 = vpop.f32.mrb[18].mxu0  ;;  %3540 = vmatpush1.bf16.msra.mxu0 %v9819_v58  ;;  %v7027_v23 = vpop.f32.mrb[27].mxu1  ;;  %7160 = vmatprep.subr.bf16.mxu1 %v11173_v10 }
 0x275   :  { %v2617_v24 = vpop.f32.mrb[19].mxu0  ;;  %3541 = vmatprep.subr.bf16.mxu0 %v9826_v63 }
 0x276   :  { %v10144_v24 = vld [vmem:[%s11075_s1 + $0x368] ss:$12 sps:$4 sm:$0xff]  }
 0x277   :  { %7161 = vmatpush3.bf16.msra.mxu1 %v9845_v13 }
 0x278   :  { %3542 = vmatpush1.bf16.msra.mxu0 %v9850_v14  ;;  %7162 = vmatprep.subr.bf16.mxu1 %v11173_v10 }
 0x279   :  { %6510 = vmatprep.subr.msk.bf16.mxu0 %vm1901_vm1, %v9854_v59 }
 0x27b   :  { %7163 = vmatpush3.bf16.msra.mxu1 %v9865_v21 }
 0x27c   :  { %3544 = vmatpush1.bf16.msra.mxu0 %v9868_v22  ;;  %7168 = vmatprep.subr.bf16.mxu1 %v11173_v10 }
 0x27d   :  { %3619 = vmatprep.subr.bf16.mxu0 %v9703_v27 }
 0x27e   :  { %7165 = vmatmul.mubr.msk.bf16.vlgmr.msra.gmra.mrb[52].mxu1 %vm1897_vm2, %v7479_v26 }
 0x27f   :  { %6511 = vmatmul.mubr.msk.bf16.vlgmr.msra.gmra.mrb[4].mxu0 %vm1897_vm2, %v7479_v26  ;;  %7169 = vmatpush3.bf16.msra.mxu1 %v9712_v20  ;;  %v10149_v26 = vld [vmem:[%s11075_s1 + $0x360] ss:$12 sps:$4 sm:$0xff]  }
 0x280   :  { %3620 = vmatpush1.bf16.msra.mxu0 %v9717_v36  ;;  %7170 = vmatprep.subr.bf16.mxu1 %v11173_v10 }
 0x281   :  { %3621 = vmatprep.subr.bf16.mxu0 %v9724_v37  ;;  %7184 = vmatprep.mubr.msk.bf16.mxu1 %vm7593_vm0, %v11173_v10 }
 0x282   :  { %3651 = vmatprep.mubr.bf16.mxu0 %v11174_v57 }
 0x283   :  { %7171 = vmatpush3.bf16.msra.mxu1 %v9735_v39 }
 0x284   :  { %3622 = vmatpush1.bf16.msra.mxu0 %v9740_v40  ;;  %7172 = vmatprep.subr.bf16.mxu1 %v11173_v10 }
 0x285   :  { %3623 = vmatprep.subr.bf16.mxu0 %v9747_v41 }
 0x287   :  { %7173 = vmatpush3.bf16.msra.mxu1 %v9757_v42 }
 0x288   :  { %3624 = vmatpush1.bf16.msra.mxu0 %v9762_v43  ;;  %7174 = vmatprep.subr.bf16.mxu1 %v11173_v10 }
 0x289   :  { %3625 = vmatprep.subr.bf16.mxu0 %v9769_v47 }
 0x28b   :  { %7175 = vmatpush3.bf16.msra.mxu1 %v9776_v48 }
 0x28c   :  { %3626 = vmatpush1.bf16.msra.mxu0 %v9781_v50  ;;  %7176 = vmatprep.subr.bf16.mxu1 %v11173_v10 }
 0x28d   :  { %3627 = vmatprep.subr.bf16.mxu0 %v9788_v51 }
 0x28f   :  { %7177 = vmatpush3.bf16.msra.mxu1 %v9795_v53 }
 0x290   :  { %3628 = vmatpush1.bf16.msra.mxu0 %v9800_v54  ;;  %7178 = vmatprep.subr.bf16.mxu1 %v11173_v10 }
 0x291   :  { %3629 = vmatprep.subr.bf16.mxu0 %v9807_v55  ;;  %v2737_v1 = vpop.f32.mrb[28].mxu1 }
 0x292   :  { %v2696_v2 = vpop.f32.mrb[20].mxu0  ;;  %v9942_v3 = vadd.f32 %v2737_v1, %v2653_v19  ;;  %v7046_v8 = vpop.f32.mrb[29].mxu1  ;;  %v10124_v19 = vld [vmem:[%s11075_s1 + $0x348] ss:$12 sps:$4 sm:$0xff]  }
 0x293   :  { %v9944_v7 = vadd.f32 %v2696_v2, %v2612_v44  ;;  %v2698_v11 = vpop.f32.mrb[21].mxu0  ;;  %v2740_v49 = vpop.f32.mrb[30].mxu1  ;;  %7179 = vmatpush3.bf16.msra.mxu1 %v9814_v56  ;;  %v10131_v44 = vld [vmem:[%s11075_s1 + $0x364] ss:$12 sps:$4 sm:$0xff]   ;;  %v7509_v2 = vld [vmem:[%s11075_s1 + $0x380] ss:$0 sps:$4 sm:$0xff]  }
 0x294   :  { %v9946_v12 = vadd.f32 %v2698_v11, %v2614_v46  ;;  %v2700_v61 = vpop.f32.mrb[22].mxu0  ;;  %3630 = vmatpush1.bf16.msra.mxu0 %v9819_v58  ;;  %v7047_v38 = vpop.f32.mrb[31].mxu1  ;;  %7180 = vmatprep.subr.bf16.mxu1 %v11173_v10  ;;  %v6549_v46 = vld [vmem:[%s11075_s1 + $0x378] sm:$0xff]  ;;  %v10164_v11 = vsel %vm1901_vm1, %v7509_v2, 0 }
 0x295   :  { %v2701_v35 = vpop.f32.mrb[23].mxu0  ;;  %3631 = vmatprep.subr.bf16.mxu0 %v9826_v63  ;;  %v6572_v8 = vcombine.low %v6549_v46, %v6549_v46 }
 0x297   :  { %7181 = vmatpush3.bf16.msra.mxu1 %v9845_v13  ;;  %v10167_v49 = vsel %vm1901_vm1, %v6572_v8, 0 }
 0x298   :  { %3632 = vmatpush1.bf16.msra.mxu0 %v9850_v14  ;;  %7182 = vmatprep.subr.bf16.mxu1 %v11173_v10 }
 0x299   :  { %6513 = vmatprep.subr.msk.bf16.mxu0 %vm1901_vm1, %v9854_v59 }
 0x29b   :  { %7183 = vmatpush3.bf16.msra.mxu1 %v9865_v21 }
 0x29c   :  { %3634 = vmatpush1.bf16.msra.mxu0 %v9868_v22  ;;  %7188 = vmatprep.subr.bf16.mxu1 %v11173_v10 }
 0x29d   :  { %3711 = vmatprep.subr.bf16.mxu0 %v9703_v27 }
 0x29e   :  { %7185 = vmatmul.mubr.msk.bf16.vlgmr.msra.gmra.mrb[56].mxu1 %vm1897_vm2, %v9352_v52 }
 0x29f   :  { %6514 = vmatmul.mubr.msk.bf16.vlgmr.msra.gmra.mrb[32].mxu0 %vm1897_vm2, %v9352_v52  ;;  %7189 = vmatpush3.bf16.msra.mxu1 %v9712_v20 }
 0x2a0   :  { %3712 = vmatpush1.bf16.msra.mxu0 %v9717_v36  ;;  %7190 = vmatprep.subr.bf16.mxu1 %v11173_v10  ;;  %v6516_v36 = vld [vmem:[%s11074_s0 + $0x8] sm:$0xe] }
 0x2a1   :  { %3713 = vmatprep.subr.bf16.mxu0 %v9724_v37  ;;  %7204 = vmatprep.mubr.msk.bf16.mxu1 %vm7593_vm0, %v11173_v10 }
 0x2a2   :  { %3743 = vmatprep.mubr.bf16.mxu0 %v11174_v57 }
 0x2a3   :  { %7191 = vmatpush3.bf16.msra.mxu1 %v9735_v39 }
 0x2a4   :  { %3714 = vmatpush1.bf16.msra.mxu0 %v9740_v40  ;;  %7192 = vmatprep.subr.bf16.mxu1 %v11173_v10 }
 0x2a5   :  { %3715 = vmatprep.subr.bf16.mxu0 %v9747_v41 }
 0x2a7   :  { %7193 = vmatpush3.bf16.msra.mxu1 %v9757_v42 }
 0x2a8   :  { %3716 = vmatpush1.bf16.msra.mxu0 %v9762_v43  ;;  %7194 = vmatprep.subr.bf16.mxu1 %v11173_v10  ;;  %v10019_v43 = vld [vmem:[%s11075_s1 + $0x2d8] ss:$12 sps:$4 sm:$0xff]  }
 0x2a9   :  { %3717 = vmatprep.subr.bf16.mxu0 %v9769_v47  ;;  %v10024_v47 = vld [vmem:[%s11075_s1 + $0x2d0] ss:$12 sps:$4 sm:$0xff]  }
 0x2ab   :  { %7195 = vmatpush3.bf16.msra.mxu1 %v9776_v48  ;;  %v10031_v48 = vld [vmem:[%s11075_s1 + $0x2ec] ss:$12 sps:$4 sm:$0xff]  }
 0x2ac   :  { %3718 = vmatpush1.bf16.msra.mxu0 %v9781_v50  ;;  %7196 = vmatprep.subr.bf16.mxu1 %v11173_v10  ;;  %v10040_v50 = vld [vmem:[%s11075_s1 + $0x2f0] ss:$12 sps:$4 sm:$0xff]  }
 0x2ad   :  { %3719 = vmatprep.subr.bf16.mxu0 %v9788_v51  ;;  %v10045_v51 = vld [vmem:[%s11075_s1 + $0x2e8] ss:$12 sps:$4 sm:$0xff]  }
 0x2af   :  { %7197 = vmatpush3.bf16.msra.mxu1 %v9795_v53  ;;  %v10052_v53 = vld [vmem:[%s11075_s1 + $0x304] ss:$12 sps:$4 sm:$0xff]  }
 0x2b0   :  { %3720 = vmatpush1.bf16.msra.mxu0 %v9800_v54  ;;  %7198 = vmatprep.subr.bf16.mxu1 %v11173_v10  ;;  %v10062_v54 = vld [vmem:[%s11075_s1 + $0x308] ss:$12 sps:$4 sm:$0xff]  }
 0x2b1   :  { %3721 = vmatprep.subr.bf16.mxu0 %v9807_v55  ;;  %v2980_v52 = vpop.f32.mrb[32].mxu1  ;;  %v10067_v55 = vld [vmem:[%s11075_s1 + $0x300] ss:$12 sps:$4 sm:$0xff]  }
 0x2b2   :  { %v9989_v27 = vadd.f32 %v2980_v52, %v9528_v60  ;;  %v7066_v20 = vpop.f32.mrb[33].mxu1  ;;  %v7513_v60 = vld [vmem:[%s11074_s0 + $0xc] sm:$0x1] }
 0x2b3   :  { %v2983_v37 = vpop.f32.mrb[34].mxu1  ;;  %7199 = vmatpush3.bf16.msra.mxu1 %v9814_v56  ;;  %v6517_v41 = vcombine.low %v6516_v36, %v7513_v60  ;;  %v10074_v56 = vld [vmem:[%s11075_s1 + $0x31c] ss:$12 sps:$4 sm:$0xff]  }
 0x2b4   :  { %3722 = vmatpush1.bf16.msra.mxu0 %v9819_v58  ;;  %v9997_v39 = vadd.f32 %v2983_v37, %v9543_v4  ;;  %v7067_v40 = vpop.f32.mrb[35].mxu1  ;;  %7200 = vmatprep.subr.bf16.mxu1 %v11173_v10  ;;  %v10012_v4 = vld [vmem:[%s11075_s1 + $0x2d4] ss:$12 sps:$4 sm:$0xff]  }
 0x2b5   :  { %3723 = vmatprep.subr.bf16.mxu0 %v9826_v63  ;;  %v3707_v42 = vrot.slane %v6517_v41, 1  ;;  %v10081_v58 = vld [vmem:[%s11075_s1 + $0x320] ss:$12 sps:$4 sm:$0xff]   ;;  %v10086_v63 = vld [vmem:[%s11075_s1 + $0x318] ss:$12 sps:$4 sm:$0xff]  }
 0x2b7   :  { %7201 = vmatpush3.bf16.msra.mxu1 %v9845_v13  ;;  %v10093_v13 = vld [vmem:[%s11075_s1 + $0x334] ss:$12 sps:$4 sm:$0xff]  }
 0x2b8   :  { %3724 = vmatpush1.bf16.msra.mxu0 %v9850_v14  ;;  %7202 = vmatprep.subr.bf16.mxu1 %v11173_v10  ;;  %v10100_v14 = vld [vmem:[%s11075_s1 + $0x338] ss:$12 sps:$4 sm:$0xff]  }
 0x2b9   :  { %6518 = vmatprep.subr.msk.bf16.mxu0 %vm1901_vm1, %v9854_v59  ;;  %v10105_v59 = vld [vmem:[%s11075_s1 + $0x330] ss:$12 sps:$4 sm:$0xff]  }
 0x2bb   :  { %7203 = vmatpush3.bf16.msra.mxu1 %v9865_v21  ;;  %v10112_v21 = vld [vmem:[%s11075_s1 + $0x34c] ss:$12 sps:$4 sm:$0xff]  }
 0x2bc   :  { %3726 = vmatpush1.bf16.msra.mxu0 %v9868_v22  ;;  %7208 = vmatprep.subr.bf16.mxu1 %v11173_v10  ;;  %v10119_v22 = vld [vmem:[%s11075_s1 + $0x350] ss:$12 sps:$4 sm:$0xff]  }
 0x2bd   :  { %3955 = vmatprep.subr.bf16.mxu0 %v10012_v4 }
 0x2be   :  { %7205 = vmatmul.mubr.msk.bf16.vlgmr.msra.gmra.mrb[60].mxu1 %vm1897_vm2, %v3707_v42 }
 0x2bf   :  { %6519 = vmatmul.mubr.msk.bf16.vlgmr.msra.gmra.mrb[36].mxu0 %vm1897_vm2, %v3707_v42  ;;  %7209 = vmatpush3.bf16.msra.mxu1 %v10019_v43 }
 0x2c0   :  { %3956 = vmatpush1.bf16.msra.mxu0 %v10024_v47  ;;  %7210 = vmatprep.subr.bf16.mxu1 %v11173_v10 }
 0x2c1   :  { %3957 = vmatprep.subr.bf16.mxu0 %v10031_v48  ;;  %7224 = vmatprep.mubr.msk.bf16.mxu1 %vm7593_vm0, %v11173_v10 }
 0x2c2   :  { %3987 = vmatprep.mubr.bf16.mxu0 %v11174_v57 }
 0x2c3   :  { %7211 = vmatpush3.bf16.msra.mxu1 %v10040_v50 }
 0x2c4   :  { %3958 = vmatpush1.bf16.msra.mxu0 %v10045_v51  ;;  %7212 = vmatprep.subr.bf16.mxu1 %v11173_v10 }
 0x2c5   :  { %3959 = vmatprep.subr.bf16.mxu0 %v10052_v53 }
 0x2c7   :  { %7213 = vmatpush3.bf16.msra.mxu1 %v10062_v54 }
 0x2c8   :  { %3960 = vmatpush1.bf16.msra.mxu0 %v10067_v55  ;;  %7214 = vmatprep.subr.bf16.mxu1 %v11173_v10 }
 0x2c9   :  { %3961 = vmatprep.subr.bf16.mxu0 %v10074_v56 }
 0x2cb   :  { %7215 = vmatpush3.bf16.msra.mxu1 %v10081_v58 }
 0x2cc   :  { %3962 = vmatpush1.bf16.msra.mxu0 %v10086_v63  ;;  %7216 = vmatprep.subr.bf16.mxu1 %v11173_v10 }
 0x2cd   :  { %3963 = vmatprep.subr.bf16.mxu0 %v10093_v13 }
 0x2cf   :  { %7217 = vmatpush3.bf16.msra.mxu1 %v10100_v14 }
 0x2d0   :  { %3964 = vmatpush1.bf16.msra.mxu0 %v10105_v59  ;;  %7218 = vmatprep.subr.bf16.mxu1 %v11173_v10 }
 0x2d1   :  { %3965 = vmatprep.subr.bf16.mxu0 %v10112_v21  ;;  %v3080_v45 = vpop.f32.mrb[36].mxu1 }
 0x2d2   :  { %v10137_v28 = vadd.f32 %v3080_v45, %v9639_v0  ;;  %v7086_v25 = vpop.f32.mrb[37].mxu1  ;;  %v10153_v0 = vcombine.high %v6549_v46, %v6549_v46 }
 0x2d3   :  { %v3083_v23 = vpop.f32.mrb[38].mxu1  ;;  %7219 = vmatpush3.bf16.msra.mxu1 %v10119_v22 }
 0x2d4   :  { %3966 = vmatpush1.bf16.msra.mxu0 %v10124_v19  ;;  %v7087_v1 = vpop.f32.mrb[39].mxu1  ;;  %7220 = vmatprep.subr.bf16.mxu1 %v11173_v10 }
 0x2d5   :  { %3967 = vmatprep.subr.bf16.mxu0 %v10131_v44 }
 0x2d7   :  { %7221 = vmatpush3.bf16.msra.mxu1 %v10144_v24 }
 0x2d8   :  { %3968 = vmatpush1.bf16.msra.mxu0 %v10149_v26  ;;  %7222 = vmatprep.subr.bf16.mxu1 %v11173_v10 }
 0x2d9   :  { %6575 = vmatprep.subr.msk.bf16.mxu0 %vm1901_vm1, %v10153_v0 }
 0x2db   :  { %7223 = vmatpush3.bf16.msra.mxu1 %v10164_v11 }
 0x2dc   :  { %3970 = vmatpush1.bf16.msra.mxu0 %v10167_v49  ;;  %7228 = vmatprep.subr.bf16.mxu1 %v11173_v10 }
 0x2dd   :  { %4055 = vmatprep.subr.bf16.mxu0 %v10012_v4 }
 0x2de   :  { %7225 = vmatmul.mubr.msk.bf16.vlgmr.msra.gmra.mrb[64].mxu1 %vm1897_vm2, %v9606_v62 }
 0x2df   :  { %6576 = vmatmul.mubr.msk.bf16.vlgmr.msra.gmra.mrb[0].mxu0 %vm1897_vm2, %v9606_v62  ;;  %7229 = vmatpush3.bf16.msra.mxu1 %v10019_v43 }
 0x2e0   :  { %4056 = vmatpush1.bf16.msra.mxu0 %v10024_v47  ;;  %7230 = vmatprep.subr.bf16.mxu1 %v11173_v10 }
 0x2e1   :  { %4057 = vmatprep.subr.bf16.mxu0 %v10031_v48  ;;  %7244 = vmatprep.mubr.msk.bf16.mxu1 %vm7593_vm0, %v11173_v10 }
 0x2e2   :  { %4087 = vmatprep.mubr.bf16.mxu0 %v11174_v57 }
 0x2e3   :  { %7231 = vmatpush3.bf16.msra.mxu1 %v10040_v50 }
 0x2e4   :  { %4058 = vmatpush1.bf16.msra.mxu0 %v10045_v51  ;;  %7232 = vmatprep.subr.bf16.mxu1 %v11173_v10 }
 0x2e5   :  { %4059 = vmatprep.subr.bf16.mxu0 %v10052_v53 }
 0x2e7   :  { %7233 = vmatpush3.bf16.msra.mxu1 %v10062_v54 }
 0x2e8   :  { %4060 = vmatpush1.bf16.msra.mxu0 %v10067_v55  ;;  %7234 = vmatprep.subr.bf16.mxu1 %v11173_v10 }
 0x2e9   :  { %4061 = vmatprep.subr.bf16.mxu0 %v10074_v56 }
 0x2eb   :  { %7235 = vmatpush3.bf16.msra.mxu1 %v10081_v58 }
 0x2ec   :  { %4062 = vmatpush1.bf16.msra.mxu0 %v10086_v63  ;;  %7236 = vmatprep.subr.bf16.mxu1 %v11173_v10 }
 0x2ed   :  { %4063 = vmatprep.subr.bf16.mxu0 %v10093_v13 }
 0x2ef   :  { %7237 = vmatpush3.bf16.msra.mxu1 %v10100_v14 }
 0x2f0   :  { %4064 = vmatpush1.bf16.msra.mxu0 %v10105_v59  ;;  %7238 = vmatprep.subr.bf16.mxu1 %v11173_v10 }
 0x2f1   :  { %4065 = vmatprep.subr.bf16.mxu0 %v10112_v21  ;;  %v3168_v62 = vpop.f32.mrb[40].mxu1 }
 0x2f2   :  { %v3127_v61 = vpop.f32.mrb[24].mxu0  ;;  %v10201_v38 = vadd.f32 %v3168_v62, %v9832_v5  ;;  %v7106_v52 = vpop.f32.mrb[41].mxu1  ;;  %v7511_v5 = vld [vmem:[%s11074_s0 + $0x30] sm:$0x1f]  }
 0x2f3   :  { %v10204_v35 = vadd.f32 %v3127_v61, %v9835_v6  ;;  %v3129_v20 = vpop.f32.mrb[25].mxu0  ;;  %v3171_v37 = vpop.f32.mrb[42].mxu1  ;;  %7239 = vmatpush3.bf16.msra.mxu1 %v10119_v22 }
 0x2f4   :  { %v10207_v36 = vadd.f32 %v3129_v20, %v9838_v9  ;;  %v3131_v40 = vpop.f32.mrb[26].mxu0  ;;  %4066 = vmatpush1.bf16.msra.mxu0 %v10124_v19  ;;  %v7107_v60 = vpop.f32.mrb[43].mxu1  ;;  %7240 = vmatprep.subr.bf16.mxu1 %v11173_v10  ;;  %v4323_v37 = vlaneseq }
 0x2f5   :  { %v3132_v41 = vpop.f32.mrb[27].mxu0  ;;  %4067 = vmatprep.subr.bf16.mxu0 %v10131_v44 }
 0x2f6   :  { %v10341_v40 = vshrl.u32 %v4323_v37, 7  ;;  %v4321_v41 = vld [vmem:[%s11076_s2] sm:$0x7] }
 0x2f7   :  { %7241 = vmatpush3.bf16.msra.mxu1 %v10144_v24 }
 0x2f8   :  { %4068 = vmatpush1.bf16.msra.mxu0 %v10149_v26  ;;  %7242 = vmatprep.subr.bf16.mxu1 %v11173_v10  ;;  %11175 = vst [vmem:[#allocation85_spill] sm:$0xff] %v10341_v40  ;;  %v11089_v60 = vsub.s32 0, %v10341_v40 }
 0x2f9   :  { %6581 = vmatprep.subr.msk.bf16.mxu0 %vm1901_vm1, %v10153_v0 }
 0x2fb   :  { %7243 = vmatpush3.bf16.msra.mxu1 %v10164_v11 }
 0x2fc   :  { %4070 = vmatpush1.bf16.msra.mxu0 %v10167_v49  ;;  %7248 = vmatprep.subr.bf16.mxu1 %v11173_v10 }
 0x2fd   :  { %4145 = vmatprep.subr.bf16.mxu0 %v10012_v4 }
 0x2fe   :  { %7245 = vmatmul.mubr.msk.bf16.vlgmr.msra.gmra.mrb[68].mxu1 %vm1897_vm2, %v7511_v5 }
 0x2ff   :  { %6582 = vmatmul.mubr.msk.bf16.vlgmr.msra.gmra.mrb[4].mxu0 %vm1897_vm2, %v7511_v5  ;;  %7249 = vmatpush3.bf16.msra.mxu1 %v10019_v43  ;;  %v11088_v5 = vsub.s32 1, %v10341_v40 }
 0x300   :  { %4146 = vmatpush1.bf16.msra.mxu0 %v10024_v47  ;;  %7250 = vmatprep.subr.bf16.mxu1 %v11173_v10 }
 0x301   :  { %4147 = vmatprep.subr.bf16.mxu0 %v10031_v48  ;;  %7264 = vmatprep.mubr.msk.bf16.mxu1 %vm7593_vm0, %v11173_v10 }
 0x302   :  { %4177 = vmatprep.mubr.bf16.mxu0 %v11174_v57 }
 0x303   :  { %7251 = vmatpush3.bf16.msra.mxu1 %v10040_v50 }
 0x304   :  { %4148 = vmatpush1.bf16.msra.mxu0 %v10045_v51  ;;  %7252 = vmatprep.subr.bf16.mxu1 %v11173_v10 }
 0x305   :  { %4149 = vmatprep.subr.bf16.mxu0 %v10052_v53 }
 0x307   :  { %7253 = vmatpush3.bf16.msra.mxu1 %v10062_v54 }
 0x308   :  { %4150 = vmatpush1.bf16.msra.mxu0 %v10067_v55  ;;  %7254 = vmatprep.subr.bf16.mxu1 %v11173_v10 }
 0x309   :  { %4151 = vmatprep.subr.bf16.mxu0 %v10074_v56 }
 0x30b   :  { %7255 = vmatpush3.bf16.msra.mxu1 %v10081_v58 }
 0x30c   :  { %4152 = vmatpush1.bf16.msra.mxu0 %v10086_v63  ;;  %7256 = vmatprep.subr.bf16.mxu1 %v11173_v10 }
 0x30d   :  { %4153 = vmatprep.subr.bf16.mxu0 %v10093_v13 }
 0x30f   :  { %7257 = vmatpush3.bf16.msra.mxu1 %v10100_v14 }
 0x310   :  { %4154 = vmatpush1.bf16.msra.mxu0 %v10105_v59  ;;  %7258 = vmatprep.subr.bf16.mxu1 %v11173_v10 }
 0x311   :  { %4155 = vmatprep.subr.bf16.mxu0 %v10112_v21  ;;  %v3260_v6 = vpop.f32.mrb[44].mxu1 }
 0x312   :  { %v3219_v9 = vpop.f32.mrb[28].mxu0  ;;  %v10251_v42 = vadd.f32 %v3260_v6, %v9942_v3  ;;  %v7126_v46 = vpop.f32.mrb[45].mxu1  ;;  %v4333_v6 = vsub.s32 2, %v10341_v40 }
 0x313   :  { %v10254_v45 = vadd.f32 %v3219_v9, %v9944_v7  ;;  %v3221_v25 = vpop.f32.mrb[29].mxu0  ;;  %v3263_v1 = vpop.f32.mrb[46].mxu1  ;;  %7259 = vmatpush3.bf16.msra.mxu1 %v10119_v22  ;;  %v10351_v9 = vrot.slane %v4321_v41, %v11089_v60 }
 0x314   :  { %v10257_v23 = vadd.f32 %v3221_v25, %v9946_v12  ;;  %v3223_v2 = vpop.f32.mrb[30].mxu0  ;;  %4156 = vmatpush1.bf16.msra.mxu0 %v10124_v19  ;;  %v7127_v8 = vpop.f32.mrb[47].mxu1  ;;  %7260 = vmatprep.subr.bf16.mxu1 %v11173_v10 }
 0x315   :  { %v3224_v62 = vpop.f32.mrb[31].mxu0  ;;  %4157 = vmatprep.subr.bf16.mxu0 %v10131_v44 }
 0x317   :  { %7261 = vmatpush3.bf16.msra.mxu1 %v10144_v24 }
 0x318   :  { %4158 = vmatpush1.bf16.msra.mxu0 %v10149_v26  ;;  %7262 = vmatprep.subr.bf16.mxu1 %v11173_v10 }
 0x319   :  { %6584 = vmatprep.subr.msk.bf16.mxu0 %vm1901_vm1, %v10153_v0 }
 0x31b   :  { %7263 = vmatpush3.bf16.msra.mxu1 %v10164_v11 }
 0x31c   :  { %4160 = vmatpush1.bf16.msra.mxu0 %v10167_v49  ;;  %7268 = vmatprep.subr.bf16.mxu1 %v11173_v10 }
 0x31d   :  { %4237 = vmatprep.subr.bf16.mxu0 %v10012_v4  ;;  %v6587_v4 = vld [vmem:[%s11074_s0 + $0x10] sm:$0xe] }
 0x31e   :  { %7265 = vmatmul.mubr.msk.bf16.vlgmr.msra.gmra.mrb[72].mxu1 %vm1897_vm2, %v9705_v34 }
 0x31f   :  { %6585 = vmatmul.mubr.msk.bf16.vlgmr.msra.gmra.mrb[40].mxu0 %vm1897_vm2, %v9705_v34  ;;  %7269 = vmatpush3.bf16.msra.mxu1 %v10019_v43 }
 0x320   :  { %4238 = vmatpush1.bf16.msra.mxu0 %v10024_v47  ;;  %7270 = vmatprep.subr.bf16.mxu1 %v11173_v10 }
 0x321   :  { %4239 = vmatprep.subr.bf16.mxu0 %v10031_v48  ;;  %7284 = vmatprep.mubr.msk.bf16.mxu1 %vm7593_vm0, %v11173_v10 }
 0x322   :  { %4269 = vmatprep.mubr.bf16.mxu0 %v11174_v57 }
 0x323   :  { %7271 = vmatpush3.bf16.msra.mxu1 %v10040_v50 }
 0x324   :  { %4240 = vmatpush1.bf16.msra.mxu0 %v10045_v51  ;;  %7272 = vmatprep.subr.bf16.mxu1 %v11173_v10 }
 0x325   :  { %4241 = vmatprep.subr.bf16.mxu0 %v10052_v53 }
 0x327   :  { %7273 = vmatpush3.bf16.msra.mxu1 %v10062_v54 }
 0x328   :  { %4242 = vmatpush1.bf16.msra.mxu0 %v10067_v55  ;;  %7274 = vmatprep.subr.bf16.mxu1 %v11173_v10 }
 0x329   :  { %4243 = vmatprep.subr.bf16.mxu0 %v10074_v56 }
 0x32b   :  { %7275 = vmatpush3.bf16.msra.mxu1 %v10081_v58 }
 0x32c   :  { %4244 = vmatpush1.bf16.msra.mxu0 %v10086_v63  ;;  %7276 = vmatprep.subr.bf16.mxu1 %v11173_v10 }
 0x32d   :  { %4245 = vmatprep.subr.bf16.mxu0 %v10093_v13 }
 0x32f   :  { %7277 = vmatpush3.bf16.msra.mxu1 %v10100_v14 }
 0x330   :  { %4246 = vmatpush1.bf16.msra.mxu0 %v10105_v59  ;;  %7278 = vmatprep.subr.bf16.mxu1 %v11173_v10 }
 0x331   :  { %4247 = vmatprep.subr.bf16.mxu0 %v10112_v21  ;;  %v3506_v34 = vpop.f32.mrb[48].mxu1 }
 0x332   :  { %v3515_v3 = vadd.f32 %v3506_v34, %v9989_v27  ;;  %v7146_v7 = vpop.f32.mrb[49].mxu1  ;;  %v7514_v27 = vld [vmem:[%s11074_s0 + $0x14] sm:$0x1] }
 0x333   :  { %v3509_v12 = vpop.f32.mrb[50].mxu1  ;;  %7279 = vmatpush3.bf16.msra.mxu1 %v10119_v22  ;;  %v6588_v48 = vcombine.low %v6587_v4, %v7514_v27 }
 0x334   :  { %4248 = vmatpush1.bf16.msra.mxu0 %v10124_v19  ;;  %v3518_v43 = vadd.f32 %v3509_v12, %v9997_v39  ;;  %v7147_v47 = vpop.f32.mrb[51].mxu1  ;;  %7280 = vmatprep.subr.bf16.mxu1 %v11173_v10 }
 0x335   :  { %4249 = vmatprep.subr.bf16.mxu0 %v10131_v44  ;;  %v4233_v39 = vrot.slane %v6588_v48, 1 }
 0x337   :  { %7281 = vmatpush3.bf16.msra.mxu1 %v10144_v24 }
 0x338   :  { %4250 = vmatpush1.bf16.msra.mxu0 %v10149_v26  ;;  %7282 = vmatprep.subr.bf16.mxu1 %v11173_v10 }
 0x339   :  { %6589 = vmatprep.subr.msk.bf16.mxu0 %vm1901_vm1, %v10153_v0 }
 0x33b   :  { %7283 = vmatpush3.bf16.msra.mxu1 %v10164_v11 }
 0x33c   :  { %4252 = vmatpush1.bf16.msra.mxu0 %v10167_v49 }
 0x33e   :  { %7285 = vmatmul.mubr.msk.bf16.vlgmr.msra.gmra.mrb[76].mxu1 %vm1897_vm2, %v4233_v39 }
 0x33f   :  { %6590 = vmatmul.mubr.msk.bf16.vlgmr.msra.gmra.mrb[44].mxu0 %vm1897_vm2, %v4233_v39 }
 0x351   :  { %v3606_v50 = vpop.f32.mrb[52].mxu1 }
 0x352   :  { %v10321_v51 = vadd.f32 %v3606_v50, %v10137_v28  ;;  %v7166_v53 = vpop.f32.mrb[53].mxu1 }
 0x353   :  { %v3609_v54 = vpop.f32.mrb[54].mxu1 }
 0x354   :  { %v7167_v55 = vpop.f32.mrb[55].mxu1 }
 0x371   :  { %v3694_v56 = vpop.f32.mrb[56].mxu1 }
 0x372   :  { %v3653_v58 = vpop.f32.mrb[32].mxu0  ;;  %v10324_v63 = vadd.f32 %v3694_v56, %v10201_v38  ;;  %v7186_v14 = vpop.f32.mrb[57].mxu1 }
 0x373   :  { %v10327_v13 = vadd.f32 %v3653_v58, %v10204_v35  ;;  %v3655_v59 = vpop.f32.mrb[33].mxu0  ;;  %v3697_v22 = vpop.f32.mrb[58].mxu1 }
 0x374   :  { %v10330_v21 = vadd.f32 %v3655_v59, %v10207_v36  ;;  %v3657_v19 = vpop.f32.mrb[34].mxu0  ;;  %v7187_v44 = vpop.f32.mrb[59].mxu1 }
 0x375   :  { %v3658_v28 = vpop.f32.mrb[35].mxu0 }
 0x391   :  { %v3786_v24 = vpop.f32.mrb[60].mxu1 }
 0x392   :  { %v3745_v26 = vpop.f32.mrb[36].mxu0  ;;  %v10333_v0 = vadd.f32 %v3786_v24, %v10251_v42  ;;  %v7206_v49 = vpop.f32.mrb[61].mxu1  ;;  %v10355_v42 = vrot.slane %v4321_v41, %v11088_v5 }
 0x393   :  { %v10336_v11 = vadd.f32 %v3745_v26, %v10254_v45  ;;  %v3747_v61 = vpop.f32.mrb[37].mxu0  ;;  %v3789_v35 = vpop.f32.mrb[62].mxu1  ;;  %v10357_v45 = vrot.slane %v4321_v41, %v4333_v6 }
 0x394   :  { %v10339_v38 = vadd.f32 %v3747_v61, %v10257_v23  ;;  %v3749_v52 = vpop.f32.mrb[38].mxu0  ;;  %v7207_v20 = vpop.f32.mrb[63].mxu1 }
 0x395   :  { %v3750_v36 = vpop.f32.mrb[39].mxu0 }
 0x3b1   :  { %v4032_v46 = vpop.f32.mrb[64].mxu1 }
 0x3b2   :  { %v3989_v25 = vpop.f32.mrb[0].mxu0  ;;  %v4041_v23 = vadd.f32 %v4032_v46, %v3515_v3  ;;  %v7226_v2 = vpop.f32.mrb[65].mxu1 }
 0x3b3   :  { %v4338_v1 = vadd.f32 %v10351_v9, %v3989_v25  ;;  %v3991_v8 = vpop.f32.mrb[1].mxu0  ;;  %v4035_v34 = vpop.f32.mrb[66].mxu1 }
 0x3b4   :  { %v4339_v62 = vadd.f32 %v10355_v42, %v3991_v8  ;;  %v3993_v7 = vpop.f32.mrb[2].mxu0  ;;  %v4340_v12 = vadd.f32 %v10357_v45, %v4041_v23  ;;  %v4044_v47 = vadd.f32 %v4035_v34, %v3518_v43  ;;  %v7227_v48 = vpop.f32.mrb[67].mxu1 }
 0x3b5   :  { %v4344_v4 = vmax.f32 %v4338_v1, 0.0  ;;  %v4341_v27 = vadd.f32 %v10351_v9, %v3993_v7  ;;  %v3995_v39 = vpop.f32.mrb[3].mxu0 }
 0x3b6   :  { %v4345_v50 = vmax.f32 %v4339_v62, 0.0  ;;  %v4342_v53 = vadd.f32 %v10355_v42, %v3995_v39  ;;  %v4346_v3 = vmax.f32 %v4340_v12, 0.0  ;;  %v4343_v54 = vadd.f32 %v10357_v45, %v4044_v47 }
 0x3b7   :  { %v4347_v55 = vmax.f32 %v4341_v27, 0.0 }
 0x3b8   :  { %v6684_v56 = vpack.c.bf16 %v4345_v50, %v4344_v4  ;;  %v4348_v58 = vmax.f32 %v4342_v53, 0.0  ;;  %v6685_v14 = vpack.c.bf16 %v4346_v3, %v4346_v3  ;;  %v4349_v59 = vmax.f32 %v4343_v54, 0.0 }
 0x3ba   :  { %4370 = vst [vmem:[#allocation2] sm:$0xff] %v6684_v56  ;;  %v6686_v22 = vpack.c.bf16 %v4348_v58, %v4347_v55  ;;  %4372 = vst.msk [vmem:[#allocation2 + $0x8] sm:$0xf] %vm4371_vm3, %v6685_v14  ;;  %v6687_v43 = vpack.c.bf16 %v4349_v59, %v4349_v59 }
 0x3bc   :  { %4373 = vst [vmem:[#allocation2 + $0xc] sm:$0x11] %v6686_v22  ;;  %4375 = vst.msk [vmem:[#allocation2 + $0x14] sm:$0x1] %vm4374_vm4, %v6687_v43 }
 0x3d1   :  { %v4132_v19 = vpop.f32.mrb[68].mxu1 }
 0x3d2   :  { %v4089_v44 = vpop.f32.mrb[4].mxu0  ;;  %v4141_v28 = vadd.f32 %v4132_v19, %v10321_v51  ;;  %v7246_v26 = vpop.f32.mrb[69].mxu1 }
 0x3d3   :  { %v4376_v24 = vadd.f32 %v10351_v9, %v4089_v44  ;;  %v4091_v49 = vpop.f32.mrb[5].mxu0  ;;  %v4135_v35 = vpop.f32.mrb[70].mxu1 }
 0x3d4   :  { %v4377_v61 = vadd.f32 %v10355_v42, %v4091_v49  ;;  %v4093_v52 = vpop.f32.mrb[6].mxu0  ;;  %v4378_v20 = vadd.f32 %v10357_v45, %v4141_v28  ;;  %v7247_v37 = vpop.f32.mrb[71].mxu1 }
 0x3d5   :  { %v4382_v36 = vmax.f32 %v4376_v24, 0.0  ;;  %v4095_v41 = vpop.f32.mrb[7].mxu0 }
 0x3d6   :  { %v4383_v6 = vmax.f32 %v4377_v61, 0.0  ;;  %v4384_v46 = vmax.f32 %v4378_v20, 0.0 }
 0x3d8   :  { %v6688_v25 = vpack.c.bf16 %v4383_v6, %v4382_v36  ;;  %v6689_v23 = vpack.c.bf16 %v4384_v46, %v4384_v46 }
 0x3da   :  { %4409 = vst [vmem:[#allocation2 + $0x18] sm:$0xff] %v6688_v25  ;;  %4410 = vst.msk [vmem:[#allocation2 + $0x20] sm:$0xf] %vm4371_vm3, %v6689_v23 }
 0x3f1   :  { %v4220_v51 = vpop.f32.mrb[72].mxu1 }
 0x3f2   :  { %v4179_v1 = vpop.f32.mrb[40].mxu0  ;;  %v4228_v2 = vadd.f32 %v4220_v51, %v10324_v63  ;;  %v7266_v62 = vpop.f32.mrb[73].mxu1 }
 0x3f3   :  { %v4226_v8 = vadd.f32 %v4179_v1, %v10327_v13  ;;  %v4181_v34 = vpop.f32.mrb[41].mxu0  ;;  %v4223_v12 = vpop.f32.mrb[74].mxu1 }
 0x3f4   :  { %v4227_v7 = vadd.f32 %v4181_v34, %v10330_v21  ;;  %v4183_v4 = vpop.f32.mrb[42].mxu0  ;;  %v4415_v47 = vadd.f32 %v10357_v45, %v4228_v2  ;;  %v7267_v48 = vpop.f32.mrb[75].mxu1 }
 0x3f5   :  { %v4413_v27 = vadd.f32 %v10351_v9, %v4226_v8  ;;  %v4184_v39 = vpop.f32.mrb[43].mxu0 }
 0x3f6   :  { %v4414_v50 = vadd.f32 %v10355_v42, %v4227_v7  ;;  %v4418_v53 = vmax.f32 %v4415_v47, 0.0 }
 0x3f7   :  { %v4416_v3 = vmax.f32 %v4413_v27, 0.0 }
 0x3f8   :  { %v4417_v54 = vmax.f32 %v4414_v50, 0.0  ;;  %v6693_v63 = vpack.c.bf16 %v4418_v53, %v4418_v53 }
 0x3fa   :  { %v6692_v55 = vpack.c.bf16 %v4417_v54, %v4416_v3  ;;  %4434 = vst.msk [vmem:[#allocation2 + $0x38] sm:$0xf] %vm4371_vm3, %v6693_v63 }
 0x3fc   :  { %4433 = vst [vmem:[#allocation2 + $0x30] sm:$0xff] %v6692_v55 }
 0x411   :  { %v4312_v13 = vpop.f32.mrb[76].mxu1 }
 0x412   :  { %v4271_v21 = vpop.f32.mrb[44].mxu0  ;;  %v4320_v56 = vadd.f32 %v4312_v13, %v10333_v0  ;;  %v7286_v14 = vpop.f32.mrb[77].mxu1 }
 0x413   :  { %v4318_v58 = vadd.f32 %v4271_v21, %v10336_v11  ;;  %v4273_v59 = vpop.f32.mrb[45].mxu0  ;;  %v4315_v43 = vpop.f32.mrb[78].mxu1 }
 0x414   :  { %v4319_v22 = vadd.f32 %v4273_v59, %v10339_v38  ;;  %v4275_v19 = vpop.f32.mrb[46].mxu0  ;;  %v4437_v44 = vadd.f32 %v10357_v45, %v4320_v56  ;;  %v7287_v24 = vpop.f32.mrb[79].mxu1 }
 0x415   :  { %v4435_v28 = vadd.f32 %v10351_v9, %v4318_v58  ;;  %v4276_v26 = vpop.f32.mrb[47].mxu0 }
 0x416   :  { %v4436_v49 = vadd.f32 %v10355_v42, %v4319_v22  ;;  %v4440_v61 = vmax.f32 %v4437_v44, 0.0 }
 0x417   :  { %v4438_v35 = vmax.f32 %v4435_v28, 0.0 }
 0x418   :  { %v4439_v52 = vmax.f32 %v4436_v49, 0.0  ;;  %v6695_v0 = vpack.c.bf16 %v4440_v61, %v4440_v61 }
 0x41a   :  { %v6694_v20 = vpack.c.bf16 %v4439_v52, %v4438_v35  ;;  %4456 = vst.msk [vmem:[#allocation2 + $0x50] sm:$0xf] %vm4371_vm3, %v6695_v0 }
 0x41c   :  { %4455 = vst [vmem:[#allocation2 + $0x48] sm:$0xff] %v6694_v20 }
 0x41d   :  { %7586 = dma.done.wait [#allocation7], 23040 }
 0x41e   :  { %7587 = vsyncadd [#allocation7], 4294944256  ;;  %4628 = vmatprep.mubr.bf16.mxu1 %v11174_v57  ;;  %v10386_v11 = vld [vmem:[#allocation5 + $0x128] sm:$0xff]  ;;  %v10390_v9 = vld [vmem:[#allocation5 + $0x120] sm:$0xff]  ;;  %vm4551_vm5 = vcmask 261120   ;;  %vm5672_vm6 = vcmask 785412  }
 0x41f   :  { %v10388_v38 = vld [vmem:[#allocation5 + $0x228] sm:$0xff]  ;;  %4555 = vmatprep.subr.bf16.mxu0 %v10386_v11  ;;  %v10394_v42 = vld [vmem:[#allocation5 + $0x220] sm:$0xff]  ;;  %v10396_v45 = vld [vmem:[#allocation5 + $0x138] sm:$0xff]  ;;  %vm5688_vm8 = vcmask 1042432   ;;  %vm5689_vm9 = vcmask 784388  }
 0x420   :  { %4596 = vmatprep.subr.bf16.mxu1 %v10388_v38  ;;  %v10398_v36 = vld [vmem:[#allocation5 + $0x238] sm:$0xff]  ;;  %4556 = vmatpush1.bf16.msra.mxu0 %v10390_v9  ;;  %v10404_v37 = vld [vmem:[#allocation5 + $0x130] sm:$0xff]  ;;  %v10408_v6 = vld [vmem:[#allocation5 + $0x148] sm:$0xff] }
 0x421   :  { %4597 = vmatpush1.bf16.msra.mxu1 %v10394_v42  ;;  %4557 = vmatprep.subr.bf16.mxu0 %v10396_v45  ;;  %v10406_v41 = vld [vmem:[#allocation5 + $0x230] sm:$0xff]  ;;  %v10410_v46 = vld [vmem:[#allocation5 + $0x8] sm:$0xff]  ;;  %v10416_v23 = vld [vmem:[#allocation5 + $0x140] sm:$0xff] }
 0x422   :  { %4598 = vmatprep.subr.bf16.mxu1 %v10398_v36  ;;  %v7515_v25 = vld [vmem:[#allocation2 + $0x20] ss:$0 sps:$4 sm:$0xff]   ;;  %v10418_v51 = vld [vmem:[#allocation5] sm:$0xff]  ;;  %v10420_v1 = vld [vmem:[#allocation5 + $0x158] sm:$0xff] }
 0x423   :  { %v10422_v2 = vld [vmem:[#allocation5 + $0x18] sm:$0xff]  ;;  %v10429_v8 = vld [vmem:[#allocation5 + $0x150] sm:$0xff]  ;;  %v10433_v34 = vld [vmem:[#allocation5 + $0x168] sm:$0xff] }
 0x424   :  { %4558 = vmatpush1.bf16.msra.mxu0 %v10404_v37  ;;  %v10431_v62 = vld [vmem:[#allocation5 + $0x10] sm:$0xff]  ;;  %v10435_v7 = vld [vmem:[#allocation5 + $0x28] sm:$0xff]  ;;  %v10441_v12 = vld [vmem:[#allocation5 + $0x160] sm:$0xff] }
 0x425   :  { %4599 = vmatpush1.bf16.msra.mxu1 %v10406_v41  ;;  %4559 = vmatprep.subr.bf16.mxu0 %v10408_v6  ;;  %v10443_v4 = vld [vmem:[#allocation5 + $0x20] sm:$0xff]  ;;  %v10445_v47 = vld [vmem:[#allocation5 + $0x178] sm:$0xff]  ;;  %v10453_v48 = vld [vmem:[#allocation5 + $0x170] sm:$0xff] }
 0x426   :  { %4650 = vmatprep.subr.bf16.mxu1 %v10410_v46  ;;  %v10447_v27 = vld [vmem:[#allocation5 + $0x38] sm:$0xff]  ;;  %v10455_v39 = vld [vmem:[#allocation5 + $0x30] sm:$0xff]  ;;  %v10457_v50 = vld [vmem:[#allocation5 + $0x188] sm:$0xff] }
 0x427   :  { %v10459_v53 = vld [vmem:[#allocation5 + $0x48] sm:$0xff]  ;;  %v10467_v54 = vld [vmem:[#allocation5 + $0x180] sm:$0xff]  ;;  %v10475_v21 = vld [vmem:[#allocation5 + $0x198] sm:$0xff] }
 0x428   :  { %6607 = vmatmul.mubr.msk.bf16.vlgmr.msra.gmra.mrb[80].mxu1 %vm4551_vm5, %v7515_v25  ;;  %4560 = vmatpush1.bf16.msra.mxu0 %v10416_v23  ;;  %v10463_v3 = vld [vmem:[#allocation2 + $0x18] sm:$0xff]  ;;  %v10473_v13 = vld [vmem:[#allocation2] sm:$0xff]  ;;  %v10477_v56 = vld [vmem:[#allocation5 + $0x58] sm:$0xff] }
 0x429   :  { %4651 = vmatpush1.bf16.msra.mxu1 %v10418_v51  ;;  %4561 = vmatprep.subr.bf16.mxu0 %v10420_v1  ;;  %v10469_v63 = vld [vmem:[#allocation5 + $0x40] sm:$0xff]  ;;  %v6605_v55 = vcombine.high %v10463_v3, %v10463_v3  ;;  %v6609_v58 = vcombine.high %v10473_v13, %v10473_v13  ;;  %v10485_v14 = vld [vmem:[#allocation5 + $0x190] sm:$0xff]  ;;  %v10489_v22 = vld [vmem:[#allocation5 + $0x1a8] sm:$0xff] }
 0x42a   :  { %4652 = vmatprep.subr.bf16.mxu1 %v10422_v2  ;;  %v10487_v59 = vld [vmem:[#allocation5 + $0x50] sm:$0xff]  ;;  %v10491_v43 = vld [vmem:[#allocation5 + $0x68] sm:$0xff]  ;;  %v10497_v19 = vld [vmem:[#allocation5 + $0x1a0] sm:$0xff] }
 0x42b   :  { %4587 = vmatprep.mubr.bf16.mxu0 %v6605_v55  ;;  %4682 = vmatprep.mubr.bf16.mxu1 %v6609_v58  ;;  %v10499_v44 = vld [vmem:[#allocation5 + $0x60] sm:$0xff]  ;;  %v10501_v28 = vld [vmem:[#allocation5 + $0x1b8] sm:$0xff]  ;;  %v10507_v26 = vld [vmem:[#allocation5 + $0x1b0] sm:$0xff] }
 0x42c   :  { %4562 = vmatpush1.bf16.msra.mxu0 %v10429_v8  ;;  %v10503_v24 = vld [vmem:[#allocation5 + $0x78] sm:$0xff]  ;;  %v10509_v49 = vld [vmem:[#allocation5 + $0x70] sm:$0xff]  ;;  %v10511_v61 = vld [vmem:[#allocation5 + $0x1c8] sm:$0xff] }
 0x42d   :  { %4653 = vmatpush1.bf16.msra.mxu1 %v10431_v62  ;;  %4563 = vmatprep.subr.bf16.mxu0 %v10433_v34  ;;  %v10515_v35 = vld [vmem:[#allocation5 + $0x88] sm:$0xff]  ;;  %v10521_v52 = vld [vmem:[#allocation5 + $0x1c0] sm:$0xff]  ;;  %v10525_v20 = vld [vmem:[#allocation5 + $0x1d8] sm:$0xff] }
 0x42e   :  { %4654 = vmatprep.subr.bf16.mxu1 %v10435_v7  ;;  %v10523_v0 = vld [vmem:[#allocation5 + $0x80] sm:$0xff]  ;;  %v10527_v25 = vld [vmem:[#allocation5 + $0x98] sm:$0xff]  ;;  %v10533_v55 = vld [vmem:[#allocation5 + $0x1d0] sm:$0xff] }
 0x42f   :  { %11176 = vst [vmem:[#allocation86_spill] sm:$0xff] %v10527_v25  ;;  %v10535_v58 = vld [vmem:[#allocation5 + $0x90] sm:$0xff]  ;;  %v10537_v5 = vld [vmem:[#allocation5 + $0x1e8] sm:$0xff]  ;;  %v10545_v10 = vld [vmem:[#allocation5 + $0x1e0] sm:$0xff] }
 0x430   :  { %4564 = vmatpush1.bf16.msra.mxu0 %v10441_v12  ;;  %11177 = vst [vmem:[#allocation87_spill] sm:$0xff] %v10535_v58  ;;  %v10539_v60 = vld [vmem:[#allocation5 + $0xa8] sm:$0xff]  ;;  %v10547_v33 = vld [vmem:[#allocation5 + $0xa0] sm:$0xff]  ;;  %v10549_v18 = vld [vmem:[#allocation5 + $0x1f8] sm:$0xff] }
 0x431   :  { %4655 = vmatpush1.bf16.msra.mxu1 %v10443_v4  ;;  %4565 = vmatprep.subr.bf16.mxu0 %v10445_v47  ;;  %11178 = vst [vmem:[#allocation88_spill] sm:$0xff] %v10539_v60  ;;  %11179 = vst [vmem:[#allocation89_spill] sm:$0xff] %v10547_v33  ;;  %v10551_v32 = vld [vmem:[#allocation5 + $0xb8] sm:$0xff]  ;;  %v10557_v17 = vld [vmem:[#allocation5 + $0x1f0] sm:$0xff] }
 0x432   :  { %4656 = vmatprep.subr.bf16.mxu1 %v10447_v27  ;;  %11180 = vst [vmem:[#allocation90_spill] sm:$0xff] %v10551_v32  ;;  %v10559_v31 = vld [vmem:[#allocation5 + $0xb0] sm:$0xff]  ;;  %v10561_v16 = vld [vmem:[#allocation5 + $0x208] sm:$0xff]  ;;  %v10569_v15 = vld [vmem:[#allocation5 + $0x200] sm:$0xff] }
 0x433   :  { %11181 = vst [vmem:[#allocation91_spill] sm:$0xff] %v10559_v31  ;;  %v10563_v30 = vld [vmem:[#allocation5 + $0xc8] sm:$0xff]  ;;  %v10571_v29 = vld [vmem:[#allocation5 + $0xc0] sm:$0xff]  ;;  %v10573_v40 = vld [vmem:[#allocation5 + $0x218] sm:$0xff] }
 0x434   :  { %4566 = vmatpush1.bf16.msra.mxu0 %v10453_v48  ;;  %11182 = vst [vmem:[#allocation92_spill] sm:$0xff] %v10563_v30  ;;  %11183 = vst [vmem:[#allocation93_spill] sm:$0xff] %v10571_v29 }
 0x435   :  { %4657 = vmatpush1.bf16.msra.mxu1 %v10455_v39  ;;  %4567 = vmatprep.subr.bf16.mxu0 %v10457_v50  ;;  %vm5673_vm7 = vmor %vm5672_vm6, %vm1901_vm1 }
 0x436   :  { %4658 = vmatprep.subr.bf16.mxu1 %v10459_v53  ;;  %vm5690_vm10 = vmor %vm5689_vm9, %vm5688_vm8 }
 0x438   :  { %4568 = vmatpush1.bf16.msra.mxu0 %v10467_v54 }
 0x439   :  { %4659 = vmatpush1.bf16.msra.mxu1 %v10469_v63  ;;  %4569 = vmatprep.subr.bf16.mxu0 %v10475_v21 }
 0x43a   :  { %4660 = vmatprep.subr.bf16.mxu1 %v10477_v56 }
 0x43c   :  { %4570 = vmatpush1.bf16.msra.mxu0 %v10485_v14 }
 0x43d   :  { %4661 = vmatpush1.bf16.msra.mxu1 %v10487_v59  ;;  %4571 = vmatprep.subr.bf16.mxu0 %v10489_v22 }
 0x43e   :  { %4662 = vmatprep.subr.bf16.mxu1 %v10491_v43 }
 0x440   :  { %4572 = vmatpush1.bf16.msra.mxu0 %v10497_v19 }
 0x441   :  { %4663 = vmatpush1.bf16.msra.mxu1 %v10499_v44  ;;  %4573 = vmatprep.subr.bf16.mxu0 %v10501_v28 }
 0x442   :  { %4664 = vmatprep.subr.bf16.mxu1 %v10503_v24 }
 0x444   :  { %4574 = vmatpush1.bf16.msra.mxu0 %v10507_v26 }
 0x445   :  { %4665 = vmatpush1.bf16.msra.mxu1 %v10509_v49  ;;  %4575 = vmatprep.subr.bf16.mxu0 %v10511_v61 }
 0x446   :  { %4666 = vmatprep.subr.bf16.mxu1 %v10515_v35 }
 0x448   :  { %4576 = vmatpush1.bf16.msra.mxu0 %v10521_v52 }
 0x449   :  { %4667 = vmatpush1.bf16.msra.mxu1 %v10523_v0  ;;  %4577 = vmatprep.subr.bf16.mxu0 %v10525_v20 }
 0x44a   :  { %4668 = vmatprep.subr.bf16.mxu1 %v10527_v25 }
 0x44c   :  { %4578 = vmatpush1.bf16.msra.mxu0 %v10533_v55 }
 0x44d   :  { %4669 = vmatpush1.bf16.msra.mxu1 %v10535_v58  ;;  %4579 = vmatprep.subr.bf16.mxu0 %v10537_v5  ;;  %v10589_v58 = vld [vmem:[#allocation2 + $0x48] sm:$0x77] }
 0x44e   :  { %4670 = vmatprep.subr.bf16.mxu1 %v10539_v60  ;;  %v6604_v60 = vcombine.low %v10463_v3, %v10463_v3  ;;  %v6613_v25 = vcombine.high %v10589_v58, %v10589_v58  ;;  %v10605_v3 = vld [vmem:[#allocation5 + $0xf0] sm:$0xff] }
 0x450   :  { %4580 = vmatpush1.bf16.msra.mxu0 %v10545_v10 }
 0x451   :  { %4671 = vmatpush1.bf16.msra.mxu1 %v10547_v33  ;;  %4581 = vmatprep.subr.bf16.mxu0 %v10549_v18  ;;  %v10583_v33 = vld [vmem:[#allocation5 + $0xd0] sm:$0xff] }
 0x452   :  { %4672 = vmatprep.subr.bf16.mxu1 %v10551_v32  ;;  %v10575_v32 = vld [vmem:[#allocation5 + $0xd8] sm:$0xff] }
 0x453   :  { %11184 = vst [vmem:[#allocation94_spill] sm:$0xff] %v10575_v32 }
 0x454   :  { %4582 = vmatpush1.bf16.msra.mxu0 %v10557_v17 }
 0x455   :  { %4673 = vmatpush1.bf16.msra.mxu1 %v10559_v31  ;;  %4583 = vmatprep.subr.bf16.mxu0 %v10561_v16  ;;  %v10581_v31 = vld [vmem:[#allocation5 + $0x210] sm:$0xff] }
 0x456   :  { %4674 = vmatprep.subr.bf16.mxu1 %v10563_v30  ;;  %v10585_v30 = vld [vmem:[#allocation5 + $0xe8] sm:$0xff] }
 0x457   :  { %11185 = vst [vmem:[#allocation95_spill] sm:$0xff] %v10585_v30 }
 0x458   :  { %4584 = vmatpush1.bf16.msra.mxu0 %v10569_v15 }
 0x459   :  { %4675 = vmatpush1.bf16.msra.mxu1 %v10571_v29  ;;  %4585 = vmatprep.subr.bf16.mxu0 %v10573_v40  ;;  %v10597_v29 = vld [vmem:[#allocation5 + $0xf8] sm:$0xff] }
 0x45a   :  { %4676 = vmatprep.subr.bf16.mxu1 %v10575_v32  ;;  %v10595_v32 = vld [vmem:[#allocation5 + $0xe0] sm:$0xff] }
 0x45c   :  { %4586 = vmatpush1.bf16.msra.mxu0 %v10581_v31 }
 0x45d   :  { %4677 = vmatpush1.bf16.msra.mxu1 %v10583_v33  ;;  %4747 = vmatprep.subr.bf16.mxu0 %v10386_v11  ;;  %v6608_v11 = vcombine.low %v10473_v13, %v10473_v13 }
 0x45e   :  { %4678 = vmatprep.subr.bf16.mxu1 %v10585_v30  ;;  %v10607_v30 = vld [vmem:[#allocation5 + $0x108] sm:$0xff] }
 0x45f   :  { %4588 = vmatmul.mubr.bf16.vlgmr.msra.gmra.mrb[48].mxu0 %v6604_v60  ;;  %v10615_v60 = vld [vmem:[#allocation5 + $0x100] sm:$0xff] }
 0x460   :  { %4748 = vmatpush1.bf16.msra.mxu0 %v10390_v9  ;;  %4779 = vmatprep.mubr.bf16.mxu0 %v6613_v25  ;;  %v10617_v9 = vld [vmem:[#allocation5 + $0x118] sm:$0xff]  ;;  %v4954_v25 = vld [vmem:[#allocation5 + $0x328] sm:$0xff] }
 0x461   :  { %4679 = vmatpush1.bf16.msra.mxu1 %v10595_v32  ;;  %4749 = vmatprep.subr.bf16.mxu0 %v10396_v45  ;;  %v10623_v45 = vld [vmem:[#allocation5 + $0x110] sm:$0xff] }
 0x462   :  { %4680 = vmatprep.subr.bf16.mxu1 %v10597_v29 }
 0x464   :  { %4750 = vmatpush1.bf16.msra.mxu0 %v10404_v37  ;;  %v7520_v37 = vld [vmem:[#allocation2 + $0x8] ss:$0 sps:$4 sm:$0xff]  }
 0x465   :  { %4681 = vmatpush1.bf16.msra.mxu1 %v10605_v3  ;;  %4751 = vmatprep.subr.bf16.mxu0 %v10408_v6  ;;  %v7521_v6 = vld [vmem:[#allocation2 + $0x50] ss:$0 sps:$4 sm:$0x77]  }
 0x466   :  { %4691 = vmatprep.subr.bf16.mxu1 %v10607_v30 }
 0x468   :  { %4683 = vmatmul.mubr.bf16.vlgmr.msra.gmra.mrb[84].mxu1 %v6608_v11  ;;  %4752 = vmatpush1.bf16.msra.mxu0 %v10416_v23  ;;  %v10636_v23 = vld [vmem:[#allocation2 + $0x30] sm:$0x77] }
 0x469   :  { %4692 = vmatpush1.bf16.msra.mxu1 %v10615_v60  ;;  %4753 = vmatprep.subr.bf16.mxu0 %v10420_v1  ;;  %v11193_v1 = vld [vmem:[#allocation93_spill] sm:$0xff] }
 0x46a   :  { %4693 = vmatprep.subr.bf16.mxu1 %v10617_v9  ;;  %4723 = vmatprep.mubr.bf16.mxu1 %v11174_v57 }
 0x46c   :  { %4754 = vmatpush1.bf16.msra.mxu0 %v10429_v8  ;;  %v4927_v8 = vld [vmem:[#allocation5 + $0x250] sm:$0xff] }
 0x46d   :  { %4694 = vmatpush1.bf16.msra.mxu1 %v10623_v45  ;;  %4755 = vmatprep.subr.bf16.mxu0 %v10433_v34  ;;  %v11195_v34 = vld [vmem:[#allocation95_spill] sm:$0xff] }
 0x46e   :  { %4788 = vmatprep.subr.bf16.mxu1 %v10388_v38  ;;  %v6617_v38 = vcombine.high %v10636_v23, %v10636_v23 }
 0x470   :  { %6611 = vmatmul.mubr.msk.bf16.vlgmr.msra.gmra.mrb[88].mxu1 %vm4551_vm5, %v7520_v37  ;;  %4756 = vmatpush1.bf16.msra.mxu0 %v10441_v12  ;;  %v4932_v12 = vld [vmem:[#allocation5 + $0x278] sm:$0xff] }
 0x471   :  { %4789 = vmatpush1.bf16.msra.mxu1 %v10394_v42  ;;  %4757 = vmatprep.subr.bf16.mxu0 %v10445_v47  ;;  %v7524_v42 = vld [vmem:[#allocation2 + $0x38] ss:$0 sps:$4 sm:$0x77]   ;;  %v4934_v47 = vld [vmem:[#allocation5 + $0x288] sm:$0xff]  ;;  %v10733_v37 = vld [vmem:[#allocation2 + $0x48] sm:$0xff] }
 0x472   :  { %4790 = vmatprep.subr.bf16.mxu1 %v10398_v36  ;;  %4820 = vmatprep.mubr.bf16.mxu1 %v11174_v57  ;;  %v11191_v36 = vld [vmem:[#allocation91_spill] sm:$0xff] }
 0x474   :  { %4758 = vmatpush1.bf16.msra.mxu0 %v10453_v48  ;;  %v6616_v48 = vcombine.low %v10636_v23, %v10636_v23  ;;  %v5166_v23 = vld [vmem:[#allocation5 + $0x378] sm:$0xff] }
 0x475   :  { %4791 = vmatpush1.bf16.msra.mxu1 %v10406_v41  ;;  %4759 = vmatprep.subr.bf16.mxu0 %v10457_v50  ;;  %v4925_v41 = vld [vmem:[#allocation5 + $0x240] sm:$0xff]  ;;  %v10714_v50 = vld [vmem:[#allocation5 + $0x358] sm:$0xff] }
 0x476   :  { %4842 = vmatprep.subr.bf16.mxu1 %v10410_v46  ;;  %v4928_v46 = vld [vmem:[#allocation5 + $0x258] sm:$0xff] }
 0x478   :  { %6615 = vmatmul.mubr.msk.bf16.vlgmr.msra.gmra.mrb[92].mxu1 %vm4551_vm5, %v7521_v6  ;;  %4760 = vmatpush1.bf16.msra.mxu0 %v10467_v54  ;;  %v10720_v54 = vld [vmem:[#allocation5 + $0x350] sm:$0xff]  ;;  %v5163_v6 = vld [vmem:[#allocation5 + $0x360] sm:$0xff] }
 0x479   :  { %4843 = vmatpush1.bf16.msra.mxu1 %v10418_v51  ;;  %4761 = vmatprep.subr.bf16.mxu0 %v10475_v21  ;;  %v7527_v21 = vld [vmem:[#allocation2 + $0x38] ss:$0 sps:$4 sm:$0xff]  }
 0x47a   :  { %4844 = vmatprep.subr.bf16.mxu1 %v10422_v2  ;;  %4874 = vmatprep.mubr.bf16.mxu1 %v6617_v38  ;;  %v11194_v2 = vld [vmem:[#allocation94_spill] sm:$0xff]  ;;  %v6629_v38 = vcombine.high %v10733_v37, %v10733_v37 }
 0x47c   :  { %4762 = vmatpush1.bf16.msra.mxu0 %v10485_v14  ;;  %v4940_v14 = vld [vmem:[#allocation5 + $0x2b8] sm:$0xff] }
 0x47d   :  { %4845 = vmatpush1.bf16.msra.mxu1 %v10431_v62  ;;  %4763 = vmatprep.subr.bf16.mxu0 %v10489_v22  ;;  %v4930_v62 = vld [vmem:[#allocation5 + $0x268] sm:$0xff]  ;;  %v4939_v22 = vld [vmem:[#allocation5 + $0x2b0] sm:$0xff] }
 0x47e   :  { %4846 = vmatprep.subr.bf16.mxu1 %v10435_v7  ;;  %v4929_v7 = vld [vmem:[#allocation5 + $0x260] sm:$0xff] }
 0x480   :  { %4764 = vmatpush1.bf16.msra.mxu0 %v10497_v19  ;;  %v4941_v19 = vld [vmem:[#allocation5 + $0x2c0] sm:$0xff] }
 0x481   :  { %4847 = vmatpush1.bf16.msra.mxu1 %v10443_v4  ;;  %4765 = vmatprep.subr.bf16.mxu0 %v10501_v28  ;;  %v4931_v4 = vld [vmem:[#allocation5 + $0x270] sm:$0xff] }
 0x482   :  { %4848 = vmatprep.subr.bf16.mxu1 %v10447_v27  ;;  %v10706_v27 = vld [vmem:[#allocation5 + $0x348] sm:$0xff]  ;;  %v4943_v28 = vld [vmem:[#allocation5 + $0x2d0] sm:$0xff] }
 0x484   :  { %4766 = vmatpush1.bf16.msra.mxu0 %v10507_v26  ;;  %v4945_v26 = vld [vmem:[#allocation5 + $0x2e0] sm:$0xff] }
 0x485   :  { %4849 = vmatpush1.bf16.msra.mxu1 %v10455_v39  ;;  %4767 = vmatprep.subr.bf16.mxu0 %v10511_v61  ;;  %v10712_v39 = vld [vmem:[#allocation5 + $0x340] sm:$0xff]  ;;  %v4947_v61 = vld [vmem:[#allocation5 + $0x2f0] sm:$0xff] }
 0x486   :  { %4850 = vmatprep.subr.bf16.mxu1 %v10459_v53  ;;  %v4935_v53 = vld [vmem:[#allocation5 + $0x290] sm:$0xff] }
 0x488   :  { %4768 = vmatpush1.bf16.msra.mxu0 %v10521_v52  ;;  %v4949_v52 = vld [vmem:[#allocation5 + $0x300] sm:$0xff] }
 0x489   :  { %4851 = vmatpush1.bf16.msra.mxu1 %v10469_v63  ;;  %4769 = vmatprep.subr.bf16.mxu0 %v10525_v20  ;;  %v4938_v63 = vld [vmem:[#allocation5 + $0x2a8] sm:$0xff]  ;;  %v4951_v20 = vld [vmem:[#allocation5 + $0x310] sm:$0xff] }
 0x48a   :  { %4852 = vmatprep.subr.bf16.mxu1 %v10477_v56  ;;  %v4937_v56 = vld [vmem:[#allocation5 + $0x2a0] sm:$0xff] }
 0x48c   :  { %4770 = vmatpush1.bf16.msra.mxu0 %v10533_v55  ;;  %v4953_v55 = vld [vmem:[#allocation5 + $0x320] sm:$0xff] }
 0x48d   :  { %4853 = vmatpush1.bf16.msra.mxu1 %v10487_v59  ;;  %4771 = vmatprep.subr.bf16.mxu0 %v10537_v5  ;;  %v11188_v5 = vld [vmem:[#allocation88_spill] sm:$0xff] }
 0x48e   :  { %4854 = vmatprep.subr.bf16.mxu1 %v10491_v43  ;;  %v4942_v43 = vld [vmem:[#allocation5 + $0x2c8] sm:$0xff] }
 0x490   :  { %4772 = vmatpush1.bf16.msra.mxu0 %v10545_v10  ;;  %v11186_v10 = vld [vmem:[#allocation86_spill] sm:$0xff] }
 0x491   :  { %4855 = vmatpush1.bf16.msra.mxu1 %v10499_v44  ;;  %4773 = vmatprep.subr.bf16.mxu0 %v10549_v18  ;;  %v6612_v18 = vcombine.low %v10589_v58, %v10589_v58  ;;  %v4944_v44 = vld [vmem:[#allocation5 + $0x2d8] sm:$0xff] }
 0x492   :  { %4856 = vmatprep.subr.bf16.mxu1 %v10503_v24  ;;  %v4946_v24 = vld [vmem:[#allocation5 + $0x2e8] sm:$0xff]  ;;  %v4956_v58 = vld [vmem:[#allocation5 + $0x338] sm:$0xff] }
 0x494   :  { %4774 = vmatpush1.bf16.msra.mxu0 %v10557_v17  ;;  %v11187_v17 = vld [vmem:[#allocation87_spill] sm:$0xff] }
 0x495   :  { %4857 = vmatpush1.bf16.msra.mxu1 %v10509_v49  ;;  %4775 = vmatprep.subr.bf16.mxu0 %v10561_v16  ;;  %v11189_v16 = vld [vmem:[#allocation89_spill] sm:$0xff] }
 0x496   :  { %4858 = vmatprep.subr.bf16.mxu1 %v10515_v35  ;;  %v4948_v49 = vld [vmem:[#allocation5 + $0x2f8] sm:$0xff]  ;;  %v4950_v35 = vld [vmem:[#allocation5 + $0x308] sm:$0xff] }
 0x498   :  { %4776 = vmatpush1.bf16.msra.mxu0 %v10569_v15  ;;  %v11190_v15 = vld [vmem:[#allocation90_spill] sm:$0xff] }
 0x499   :  { %4859 = vmatpush1.bf16.msra.mxu1 %v10523_v0  ;;  %4777 = vmatprep.subr.bf16.mxu0 %v10573_v40  ;;  %v4926_v40 = vld [vmem:[#allocation5 + $0x248] sm:$0xff]  ;;  %v4952_v0 = vld [vmem:[#allocation5 + $0x318] sm:$0xff] }
 0x49a   :  { %4860 = vmatprep.subr.bf16.mxu1 %v11186_v10  ;;  %v5165_v10 = vld [vmem:[#allocation5 + $0x370] sm:$0xff] }
 0x49c   :  { %4778 = vmatpush1.bf16.msra.mxu0 %v10581_v31  ;;  %v10692_v31 = vld [vmem:[#allocation2 + $0x30] sm:$0xff] }
 0x49d   :  { %4861 = vmatpush1.bf16.msra.mxu1 %v11187_v17  ;;  %4883 = vmatprep.subr.bf16.mxu0 %v10607_v30  ;;  %v11192_v30 = vld [vmem:[#allocation92_spill] sm:$0xff]  ;;  %v6621_v51 = vcombine.high %v10692_v31, %v10692_v31  ;;  %v6620_v11 = vcombine.low %v10692_v31, %v10692_v31  ;;  %v5167_v17 = vld [vmem:[#allocation5 + $0x380] sm:$0xff] }
 0x49e   :  { %4862 = vmatprep.subr.bf16.mxu1 %v11188_v5  ;;  %v5170_v5 = vld [vmem:[#allocation5 + $0x398] sm:$0xff]  ;;  %v10743_v31 = vld [vmem:[#allocation5 + $0x468] sm:$0xff] }
 0x49f   :  { %4780 = vmatmul.mubr.bf16.vlgmr.msra.gmra.mrb[52].mxu0 %v6612_v18  ;;  %v5168_v18 = vld [vmem:[#allocation5 + $0x388] sm:$0xff] }
 0x4a0   :  { %4884 = vmatpush1.bf16.msra.mxu0 %v10615_v60  ;;  %4915 = vmatprep.mubr.bf16.mxu0 %v11174_v57  ;;  %v7530_v60 = vld [vmem:[#allocation2 + $0x8] ss:$0 sps:$4 sm:$0xee]  }
 0x4a1   :  { %4863 = vmatpush1.bf16.msra.mxu1 %v11189_v16  ;;  %4885 = vmatprep.subr.bf16.mxu0 %v10617_v9  ;;  %v5164_v9 = vld [vmem:[#allocation5 + $0x368] sm:$0xff] }
 0x4a2   :  { %4864 = vmatprep.subr.bf16.mxu1 %v11190_v15  ;;  %v5169_v15 = vld [vmem:[#allocation5 + $0x390] sm:$0xff] }
 0x4a4   :  { %4886 = vmatpush1.bf16.msra.mxu0 %v10623_v45  ;;  %v5072_v45 = vrot.slane %v7530_v60, 1 }
 0x4a5   :  { %4865 = vmatpush1.bf16.msra.mxu1 %v11191_v36  ;;  %4976 = vmatprep.subr.bf16.mxu0 %v4926_v40 }
 0x4a6   :  { %4866 = vmatprep.subr.bf16.mxu1 %v11192_v30 }
 0x4a7   :  { %6619 = vmatmul.mubr.msk.bf16.vlgmr.msra.gmra.mrb[56].mxu0 %vm4551_vm5, %v7524_v42  ;;  %v5172_v42 = vld [vmem:[#allocation5 + $0x3a8] sm:$0xff] }
 0x4a8   :  { %4977 = vmatpush1.bf16.msra.mxu0 %v4925_v41  ;;  %5008 = vmatprep.mubr.bf16.mxu0 %v6621_v51  ;;  %v5171_v51 = vld [vmem:[#allocation5 + $0x3a0] sm:$0xff] }
 0x4a9   :  { %4867 = vmatpush1.bf16.msra.mxu1 %v11193_v1  ;;  %4978 = vmatprep.subr.bf16.mxu0 %v4928_v46  ;;  %v10748_v1 = vld [vmem:[#allocation5 + $0x460] sm:$0xff] }
 0x4aa   :  { %4868 = vmatprep.subr.bf16.mxu1 %v11194_v2  ;;  %v5174_v2 = vld [vmem:[#allocation5 + $0x3b8] sm:$0xff] }
 0x4ac   :  { %4979 = vmatpush1.bf16.msra.mxu0 %v4927_v8 }
 0x4ad   :  { %4869 = vmatpush1.bf16.msra.mxu1 %v10583_v33  ;;  %4980 = vmatprep.subr.bf16.mxu0 %v4930_v62  ;;  %v4933_v33 = vld [vmem:[#allocation5 + $0x280] sm:$0xff] }
 0x4ae   :  { %4870 = vmatprep.subr.bf16.mxu1 %v11195_v34  ;;  %v5173_v34 = vld [vmem:[#allocation5 + $0x3b0] sm:$0xff] }
 0x4b0   :  { %4981 = vmatpush1.bf16.msra.mxu0 %v4929_v7 }
 0x4b1   :  { %4871 = vmatpush1.bf16.msra.mxu1 %v10595_v32  ;;  %4982 = vmatprep.subr.bf16.mxu0 %v4932_v12  ;;  %v4936_v32 = vld [vmem:[#allocation5 + $0x298] sm:$0xff] }
 0x4b2   :  { %4872 = vmatprep.subr.bf16.mxu1 %v10597_v29  ;;  %v10716_v29 = vld [vmem:[#allocation2] sm:$0xee] }
 0x4b3   :  { %v6625_v13 = vcombine.high %v10716_v29, %v10716_v29  ;;  %v6624_v16 = vcombine.low %v10716_v29, %v10716_v29  ;;  %v5182_v29 = vld [vmem:[#allocation5 + $0x3f8] sm:$0xff] }
 0x4b4   :  { %4983 = vmatpush1.bf16.msra.mxu0 %v4931_v4 }
 0x4b5   :  { %4873 = vmatpush1.bf16.msra.mxu1 %v10605_v3  ;;  %4984 = vmatprep.subr.bf16.mxu0 %v4934_v47  ;;  %v5071_v59 = vrot.slane %v6625_v13, 1  ;;  %v4955_v3 = vld [vmem:[#allocation5 + $0x330] sm:$0xff]  ;;  %v5070_v30 = vrot.slane %v6624_v16, 1  ;;  %v5186_v13 = vld [vmem:[#allocation5 + $0x418] sm:$0xff] }
 0x4b6   :  { %5017 = vmatprep.subr.bf16.mxu1 %v10706_v27 }
 0x4b8   :  { %4875 = vmatmul.mubr.bf16.vlgmr.msra.gmra.mrb[96].mxu1 %v6616_v48  ;;  %4985 = vmatpush1.bf16.msra.mxu0 %v4933_v33  ;;  %v5178_v48 = vld [vmem:[#allocation5 + $0x3d8] sm:$0xff] }
 0x4b9   :  { %5018 = vmatpush1.bf16.msra.mxu1 %v10712_v39  ;;  %4986 = vmatprep.subr.bf16.mxu0 %v4936_v32 }
 0x4ba   :  { %5019 = vmatprep.subr.bf16.mxu1 %v10714_v50  ;;  %5049 = vmatprep.mubr.bf16.mxu1 %v11174_v57 }
 0x4bc   :  { %4987 = vmatpush1.bf16.msra.mxu0 %v4935_v53 }
 0x4bd   :  { %5020 = vmatpush1.bf16.msra.mxu1 %v10720_v54  ;;  %4988 = vmatprep.subr.bf16.mxu0 %v4938_v63 }
 0x4be   :  { %5078 = vmatprep.subr.bf16.mxu1 %v4926_v40 }
 0x4c0   :  { %6623 = vmatmul.mubr.msk.bf16.vlgmr.msra.gmra.mrb[100].mxu1 %vm4551_vm5, %v7527_v21  ;;  %4989 = vmatpush1.bf16.msra.mxu0 %v4937_v56  ;;  %v5185_v21 = vld [vmem:[#allocation5 + $0x410] sm:$0xff] }
 0x4c1   :  { %5079 = vmatpush1.bf16.msra.mxu1 %v4925_v41  ;;  %4990 = vmatprep.subr.bf16.mxu0 %v4940_v14 }
 0x4c2   :  { %5080 = vmatprep.subr.bf16.mxu1 %v4928_v46  ;;  %5110 = vmatprep.mubr.bf16.mxu1 %v5071_v59  ;;  %v5190_v59 = vld [vmem:[#allocation5 + $0x438] sm:$0xff] }
 0x4c4   :  { %4991 = vmatpush1.bf16.msra.mxu0 %v4939_v22 }
 0x4c5   :  { %5081 = vmatpush1.bf16.msra.mxu1 %v4927_v8  ;;  %4992 = vmatprep.subr.bf16.mxu0 %v4942_v43  ;;  %v10750_v8 = vld [vmem:[#allocation5 + $0x478] sm:$0xff] }
 0x4c6   :  { %5082 = vmatprep.subr.bf16.mxu1 %v4930_v62  ;;  %v10752_v62 = vld [vmem:[#allocation2 + $0x18] sm:$0xee] }
 0x4c7   :  { %v6632_v16 = vcombine.low %v10752_v62, %v10752_v62 }
 0x4c8   :  { %4993 = vmatpush1.bf16.msra.mxu0 %v4941_v19 }
 0x4c9   :  { %5083 = vmatpush1.bf16.msra.mxu1 %v4929_v7  ;;  %4994 = vmatprep.subr.bf16.mxu0 %v4944_v44  ;;  %v10756_v7 = vld [vmem:[#allocation5 + $0x470] sm:$0xff] }
 0x4ca   :  { %5084 = vmatprep.subr.bf16.mxu1 %v4932_v12  ;;  %v5176_v12 = vld [vmem:[#allocation5 + $0x3c8] sm:$0xff] }
 0x4cc   :  { %4995 = vmatpush1.bf16.msra.mxu0 %v4943_v28 }
 0x4cd   :  { %5085 = vmatpush1.bf16.msra.mxu1 %v4931_v4  ;;  %4996 = vmatprep.subr.bf16.mxu0 %v4946_v24  ;;  %v6633_v4 = vcombine.high %v10752_v62, %v10752_v62  ;;  %v5412_v62 = vld [vmem:[#allocation5 + $0x4d8] sm:$0xff] }
 0x4ce   :  { %5086 = vmatprep.subr.bf16.mxu1 %v4934_v47  ;;  %v7533_v47 = vld [vmem:[#allocation2 + $0x50] ss:$0 sps:$4 sm:$0xff]  }
 0x4d0   :  { %4997 = vmatpush1.bf16.msra.mxu0 %v4945_v26 }
 0x4d1   :  { %5087 = vmatpush1.bf16.msra.mxu1 %v4933_v33  ;;  %4998 = vmatprep.subr.bf16.mxu0 %v4948_v49  ;;  %v5309_v33 = vrot.slane %v6633_v4, 1  ;;  %v5411_v4 = vld [vmem:[#allocation5 + $0x4d0] sm:$0xff] }
 0x4d2   :  { %5088 = vmatprep.subr.bf16.mxu1 %v4936_v32  ;;  %v5180_v32 = vld [vmem:[#allocation5 + $0x3e8] sm:$0xff] }
 0x4d4   :  { %4999 = vmatpush1.bf16.msra.mxu0 %v4947_v61 }
 0x4d5   :  { %5089 = vmatpush1.bf16.msra.mxu1 %v4935_v53  ;;  %5000 = vmatprep.subr.bf16.mxu0 %v4950_v35  ;;  %v5181_v53 = vld [vmem:[#allocation5 + $0x3f0] sm:$0xff] }
 0x4d6   :  { %5090 = vmatprep.subr.bf16.mxu1 %v4938_v63  ;;  %v5183_v63 = vld [vmem:[#allocation5 + $0x400] sm:$0xff] }
 0x4d8   :  { %5001 = vmatpush1.bf16.msra.mxu0 %v4949_v52 }
 0x4d9   :  { %5091 = vmatpush1.bf16.msra.mxu1 %v4937_v56  ;;  %5002 = vmatprep.subr.bf16.mxu0 %v4952_v0  ;;  %v5188_v56 = vld [vmem:[#allocation5 + $0x428] sm:$0xff] }
 0x4da   :  { %5092 = vmatprep.subr.bf16.mxu1 %v4940_v14  ;;  %v5187_v14 = vld [vmem:[#allocation5 + $0x420] sm:$0xff] }
 0x4dc   :  { %5003 = vmatpush1.bf16.msra.mxu0 %v4951_v20 }
 0x4dd   :  { %5093 = vmatpush1.bf16.msra.mxu1 %v4939_v22  ;;  %5004 = vmatprep.subr.bf16.mxu0 %v4954_v25  ;;  %v5189_v22 = vld [vmem:[#allocation5 + $0x430] sm:$0xff] }
 0x4de   :  { %5094 = vmatprep.subr.bf16.mxu1 %v4942_v43  ;;  %v5192_v43 = vld [vmem:[#allocation5 + $0x448] sm:$0xff] }
 0x4e0   :  { %5005 = vmatpush1.bf16.msra.mxu0 %v4953_v55 }
 0x4e1   :  { %5095 = vmatpush1.bf16.msra.mxu1 %v4941_v19  ;;  %5006 = vmatprep.subr.bf16.mxu0 %v4956_v58  ;;  %v5191_v19 = vld [vmem:[#allocation5 + $0x440] sm:$0xff] }
 0x4e2   :  { %5096 = vmatprep.subr.bf16.mxu1 %v4944_v44  ;;  %v5194_v44 = vld [vmem:[#allocation5 + $0x458] sm:$0xff] }
 0x4e4   :  { %5007 = vmatpush1.bf16.msra.mxu0 %v4955_v3 }
 0x4e5   :  { %5097 = vmatpush1.bf16.msra.mxu1 %v4943_v28  ;;  %5119 = vmatprep.subr.bf16.mxu0 %v10706_v27  ;;  %v5175_v27 = vld [vmem:[#allocation5 + $0x3c0] sm:$0xff]  ;;  %v5193_v28 = vld [vmem:[#allocation5 + $0x450] sm:$0xff] }
 0x4e6   :  { %5098 = vmatprep.subr.bf16.mxu1 %v4946_v24  ;;  %v6628_v24 = vcombine.low %v10733_v37, %v10733_v37  ;;  %v10784_v37 = vld [vmem:[#allocation5 + $0x4a8] sm:$0xff] }
 0x4e7   :  { %5009 = vmatmul.mubr.bf16.vlgmr.msra.gmra.mrb[60].mxu0 %v6620_v11  ;;  %v10777_v11 = vld [vmem:[#allocation5 + $0x498] sm:$0xff] }
 0x4e8   :  { %5120 = vmatpush1.bf16.msra.mxu0 %v10712_v39  ;;  %5151 = vmatprep.mubr.bf16.mxu0 %v11174_v57  ;;  %v5177_v39 = vld [vmem:[#allocation5 + $0x3d0] sm:$0xff] }
 0x4e9   :  { %5099 = vmatpush1.bf16.msra.mxu1 %v4945_v26  ;;  %5121 = vmatprep.subr.bf16.mxu0 %v10714_v50  ;;  %v5179_v50 = vld [vmem:[#allocation5 + $0x3e0] sm:$0xff]  ;;  %v7536_v26 = vld [vmem:[#allocation2 + $0x20] ss:$0 sps:$4 sm:$0xee]  }
 0x4ea   :  { %5100 = vmatprep.subr.bf16.mxu1 %v4948_v49 }
 0x4ec   :  { %5122 = vmatpush1.bf16.msra.mxu0 %v10720_v54  ;;  %v5184_v54 = vld [vmem:[#allocation5 + $0x408] sm:$0xff] }
 0x4ed   :  { %5101 = vmatpush1.bf16.msra.mxu1 %v4947_v61  ;;  %5214 = vmatprep.subr.bf16.mxu0 %v5164_v9  ;;  %v10769_v61 = vld [vmem:[#allocation5 + $0x488] sm:$0xff] }
 0x4ee   :  { %5102 = vmatprep.subr.bf16.mxu1 %v4950_v35  ;;  %v7542_v35 = vld [vmem:[#allocation2 + $0x4] ss:$12 sps:$4 sm:$0x1e]  }
 0x4ef   :  { %6627 = vmatmul.mubr.msk.bf16.vlgmr.msra.gmra.mrb[64].mxu0 %vm4551_vm5, %v5072_v45  ;;  %v5455_v60 = vrot.slane %v7542_v35, 1  ;;  %v5429_v35 = vld [vmem:[#allocation5 + $0x560] sm:$0xff] }
 0x4f0   :  { %5215 = vmatpush1.bf16.msra.mxu0 %v5163_v6  ;;  %5246 = vmatprep.mubr.bf16.mxu0 %v6629_v38 }
 0x4f1   :  { %5103 = vmatpush1.bf16.msra.mxu1 %v4949_v52  ;;  %5216 = vmatprep.subr.bf16.mxu0 %v5166_v23 }
 0x4f2   :  { %5104 = vmatprep.subr.bf16.mxu1 %v4952_v0 }
 0x4f4   :  { %5217 = vmatpush1.bf16.msra.mxu0 %v5165_v10 }
 0x4f5   :  { %5105 = vmatpush1.bf16.msra.mxu1 %v4951_v20  ;;  %5218 = vmatprep.subr.bf16.mxu0 %v5168_v18  ;;  %v5310_v20 = vrot.slane %v7536_v26, 1  ;;  %v5428_v26 = vld [vmem:[#allocation5 + $0x558] sm:$0xff] }
 0x4f6   :  { %5106 = vmatprep.subr.bf16.mxu1 %v4954_v25 }
 0x4f8   :  { %5219 = vmatpush1.bf16.msra.mxu0 %v5167_v17 }
 0x4f9   :  { %5107 = vmatpush1.bf16.msra.mxu1 %v4953_v55  ;;  %5220 = vmatprep.subr.bf16.mxu0 %v5170_v5 }
 0x4fa   :  { %5108 = vmatprep.subr.bf16.mxu1 %v4956_v58  ;;  %v10775_v58 = vld [vmem:[#allocation5 + $0x480] sm:$0xff] }
 0x4fb   :  { %v10741_v40 = vpop.f32.mrb[80].mxu1 }
 0x4fc   :  { %v10745_v36 = vpop.f32.mrb[81].mxu1  ;;  %5221 = vmatpush1.bf16.msra.mxu0 %v5169_v15 }
 0x4fd   :  { %v4634_v41 = vpop.f32.mrb[82].mxu1  ;;  %5109 = vmatpush1.bf16.msra.mxu1 %v4955_v3  ;;  %5222 = vmatprep.subr.bf16.mxu0 %v5172_v42 }
 0x4fe   :  { %v4635_v46 = vpop.f32.mrb[83].mxu1  ;;  %5255 = vmatprep.subr.bf16.mxu1 %v10743_v31  ;;  %v5308_v41 = vrot.slane %v6632_v16, 1 }
 0x500   :  { %5111 = vmatmul.mubr.bf16.vlgmr.msra.gmra.mrb[104].mxu1 %v5070_v30  ;;  %5223 = vmatpush1.bf16.msra.mxu0 %v5171_v51 }
 0x501   :  { %5256 = vmatpush1.bf16.msra.mxu1 %v10748_v1  ;;  %5224 = vmatprep.subr.bf16.mxu0 %v5174_v2 }
 0x502   :  { %5257 = vmatprep.subr.bf16.mxu1 %v10750_v8  ;;  %5287 = vmatprep.mubr.bf16.mxu1 %v11174_v57 }
 0x504   :  { %5225 = vmatpush1.bf16.msra.mxu0 %v5173_v34 }
 0x505   :  { %5258 = vmatpush1.bf16.msra.mxu1 %v10756_v7  ;;  %5226 = vmatprep.subr.bf16.mxu0 %v5176_v12 }
 0x506   :  { %5316 = vmatprep.subr.bf16.mxu1 %v5164_v9  ;;  %v10782_v9 = vld [vmem:[#allocation5 + $0x490] sm:$0xff] }
 0x508   :  { %6631 = vmatmul.mubr.msk.bf16.vlgmr.msra.gmra.mrb[108].mxu1 %vm4551_vm5, %v7533_v47  ;;  %5227 = vmatpush1.bf16.msra.mxu0 %v5175_v27  ;;  %v10811_v47 = vld [vmem:[#allocation5 + $0x590] sm:$0xff] }
 0x509   :  { %5317 = vmatpush1.bf16.msra.mxu1 %v5163_v6  ;;  %5228 = vmatprep.subr.bf16.mxu0 %v5178_v48 }
 0x50a   :  { %5318 = vmatprep.subr.bf16.mxu1 %v5166_v23  ;;  %5348 = vmatprep.mubr.bf16.mxu1 %v5309_v33 }
 0x50c   :  { %5229 = vmatpush1.bf16.msra.mxu0 %v5177_v39 }
 0x50d   :  { %5319 = vmatpush1.bf16.msra.mxu1 %v5165_v10  ;;  %5230 = vmatprep.subr.bf16.mxu0 %v5180_v32 }
 0x50e   :  { %5320 = vmatprep.subr.bf16.mxu1 %v5168_v18 }
 0x510   :  { %5231 = vmatpush1.bf16.msra.mxu0 %v5179_v50 }
 0x511   :  { %5321 = vmatpush1.bf16.msra.mxu1 %v5167_v17  ;;  %5232 = vmatprep.subr.bf16.mxu0 %v5182_v29  ;;  %v10788_v17 = vld [vmem:[#allocation5 + $0x4a0] sm:$0xff] }
 0x512   :  { %5322 = vmatprep.subr.bf16.mxu1 %v5170_v5  ;;  %v10790_v5 = vld [vmem:[#allocation5 + $0x4b8] sm:$0xff] }
 0x514   :  { %5233 = vmatpush1.bf16.msra.mxu0 %v5181_v53 }
 0x515   :  { %5323 = vmatpush1.bf16.msra.mxu1 %v5169_v15  ;;  %5234 = vmatprep.subr.bf16.mxu0 %v5184_v54  ;;  %v5407_v15 = vld [vmem:[#allocation5 + $0x4b0] sm:$0xff] }
 0x516   :  { %5324 = vmatprep.subr.bf16.mxu1 %v5172_v42  ;;  %v5410_v42 = vld [vmem:[#allocation5 + $0x4c8] sm:$0xff] }
 0x518   :  { %5235 = vmatpush1.bf16.msra.mxu0 %v5183_v63 }
 0x519   :  { %5325 = vmatpush1.bf16.msra.mxu1 %v5171_v51  ;;  %5236 = vmatprep.subr.bf16.mxu0 %v5186_v13 }
 0x51a   :  { %5326 = vmatprep.subr.bf16.mxu1 %v5174_v2  ;;  %v5409_v2 = vld [vmem:[#allocation5 + $0x4c0] sm:$0xff] }
 0x51c   :  { %5237 = vmatpush1.bf16.msra.mxu0 %v5185_v21 }
 0x51d   :  { %5327 = vmatpush1.bf16.msra.mxu1 %v5173_v34  ;;  %5238 = vmatprep.subr.bf16.mxu0 %v5188_v56  ;;  %v10805_v34 = vld [vmem:[#allocation5 + $0x598] sm:$0xff] }
 0x51e   :  { %5328 = vmatprep.subr.bf16.mxu1 %v5176_v12  ;;  %v10807_v12 = vld [vmem:[#allocation2 + $0x30] sm:$0xee] }
 0x51f   :  { %v6641_v33 = vcombine.high %v10807_v12, %v10807_v12 }
 0x520   :  { %5239 = vmatpush1.bf16.msra.mxu0 %v5187_v14 }
 0x521   :  { %5329 = vmatpush1.bf16.msra.mxu1 %v5175_v27  ;;  %5240 = vmatprep.subr.bf16.mxu0 %v5190_v59 }
 0x522   :  { %5330 = vmatprep.subr.bf16.mxu1 %v5178_v48  ;;  %v5414_v48 = vld [vmem:[#allocation5 + $0x4e8] sm:$0xff] }
 0x524   :  { %5241 = vmatpush1.bf16.msra.mxu0 %v5189_v22 }
 0x525   :  { %5331 = vmatpush1.bf16.msra.mxu1 %v5177_v39  ;;  %5242 = vmatprep.subr.bf16.mxu0 %v5192_v43 }
 0x526   :  { %5332 = vmatprep.subr.bf16.mxu1 %v5180_v32 }
 0x528   :  { %5243 = vmatpush1.bf16.msra.mxu0 %v5191_v19 }
 0x529   :  { %5333 = vmatpush1.bf16.msra.mxu1 %v5179_v50  ;;  %5244 = vmatprep.subr.bf16.mxu0 %v5194_v44 }
 0x52a   :  { %5334 = vmatprep.subr.bf16.mxu1 %v5182_v29 }
 0x52c   :  { %5245 = vmatpush1.bf16.msra.mxu0 %v5193_v28 }
 0x52d   :  { %5335 = vmatpush1.bf16.msra.mxu1 %v5181_v53  ;;  %5357 = vmatprep.subr.bf16.mxu0 %v10743_v31  ;;  %v10796_v31 = vld [vmem:[#allocation5 + $0x588] sm:$0xff]  ;;  %v5413_v53 = vld [vmem:[#allocation5 + $0x4e0] sm:$0xff] }
 0x52e   :  { %5336 = vmatprep.subr.bf16.mxu1 %v5184_v54  ;;  %v5416_v54 = vld [vmem:[#allocation5 + $0x4f8] sm:$0xff] }
 0x52f   :  { %5247 = vmatmul.mubr.bf16.vlgmr.msra.gmra.mrb[68].mxu0 %v6628_v24  ;;  %v5425_v24 = vld [vmem:[#allocation5 + $0x540] sm:$0xff] }
 0x530   :  { %5358 = vmatpush1.bf16.msra.mxu0 %v10748_v1  ;;  %5389 = vmatprep.mubr.bf16.mxu0 %v11174_v57 }
 0x531   :  { %5337 = vmatpush1.bf16.msra.mxu1 %v5183_v63  ;;  %5359 = vmatprep.subr.bf16.mxu0 %v10750_v8  ;;  %v10803_v8 = vld [vmem:[#allocation5 + $0x580] sm:$0xff]  ;;  %v5557_v63 = vrot.slane %v6641_v33, 1 }
 0x532   :  { %5338 = vmatprep.subr.bf16.mxu1 %v5186_v13  ;;  %v4589_v49 = vpop.f32.mrb[48].mxu0  ;;  %v5415_v13 = vld [vmem:[#allocation5 + $0x4f0] sm:$0xff] }
 0x533   :  { %v4631_v52 = vadd.f32 %v10741_v40, %v4589_v49  ;;  %v4591_v0 = vpop.f32.mrb[49].mxu0  ;;  %v5427_v49 = vld [vmem:[#allocation5 + $0x550] sm:$0xff] }
 0x534   :  { %v4633_v25 = vadd.f32 %v10745_v36, %v4591_v0  ;;  %5360 = vmatpush1.bf16.msra.mxu0 %v10756_v7  ;;  %v4593_v55 = vpop.f32.mrb[50].mxu0  ;;  %v7539_v7 = vld [vmem:[#allocation2 + $0x8] ss:$12 sps:$4 sm:$0x1e]  }
 0x535   :  { %5339 = vmatpush1.bf16.msra.mxu1 %v5185_v21  ;;  %5462 = vmatprep.subr.bf16.mxu0 %v10769_v61  ;;  %v4594_v3 = vpop.f32.mrb[51].mxu0  ;;  %v5456_v32 = vrot.slane %v7539_v7, 1  ;;  %v5418_v21 = vld [vmem:[#allocation5 + $0x508] sm:$0xff] }
 0x536   :  { %5340 = vmatprep.subr.bf16.mxu1 %v5188_v56  ;;  %v5417_v56 = vld [vmem:[#allocation5 + $0x500] sm:$0xff]  ;;  %v7540_v0 = vld [vmem:[#allocation2] ss:$12 sps:$4 sm:$0x1e]  }
 0x537   :  { %6635 = vmatmul.mubr.msk.bf16.vlgmr.msra.gmra.mrb[72].mxu0 %vm4551_vm5, %v5310_v20  ;;  %v5431_v20 = vld [vmem:[#allocation5 + $0x570] sm:$0xff]  ;;  %v5454_v3 = vrot.slane %v7540_v0, 1 }
 0x538   :  { %5463 = vmatpush1.bf16.msra.mxu0 %v10775_v58  ;;  %5494 = vmatprep.mubr.bf16.mxu0 %v5455_v60 }
 0x539   :  { %5341 = vmatpush1.bf16.msra.mxu1 %v5187_v14  ;;  %5464 = vmatprep.subr.bf16.mxu0 %v10777_v11  ;;  %v5420_v14 = vld [vmem:[#allocation5 + $0x518] sm:$0xff] }
 0x53a   :  { %5342 = vmatprep.subr.bf16.mxu1 %v5190_v59  ;;  %v5419_v59 = vld [vmem:[#allocation5 + $0x510] sm:$0xff] }
 0x53b   :  { %v4684_v45 = vpop.f32.mrb[84].mxu1 }
 0x53c   :  { %v4685_v6 = vadd.f32 %v4684_v45, %v4631_v52  ;;  %v4686_v23 = vpop.f32.mrb[85].mxu1  ;;  %5465 = vmatpush1.bf16.msra.mxu0 %v10782_v9  ;;  %v5432_v52 = vld [vmem:[#allocation5 + $0x578] sm:$0xff]  ;;  %v7543_v45 = vld [vmem:[#allocation2 + $0x38] ss:$0 sps:$4 sm:$0xee]  }
 0x53d   :  { %v4687_v38 = vadd.f32 %v4686_v23, %v4633_v25  ;;  %v4688_v10 = vpop.f32.mrb[86].mxu1  ;;  %5343 = vmatpush1.bf16.msra.mxu1 %v5189_v22  ;;  %5466 = vmatprep.subr.bf16.mxu0 %v10784_v37  ;;  %v5422_v22 = vld [vmem:[#allocation5 + $0x528] sm:$0xff]  ;;  %v5558_v23 = vrot.slane %v7543_v45, 1 }
 0x53e   :  { %v4689_v18 = vpop.f32.mrb[87].mxu1  ;;  %5344 = vmatprep.subr.bf16.mxu1 %v5192_v43  ;;  %v5421_v43 = vld [vmem:[#allocation5 + $0x520] sm:$0xff] }
 0x53f   :  { %v6640_v18 = vcombine.low %v10807_v12, %v10807_v12 }
 0x540   :  { %5467 = vmatpush1.bf16.msra.mxu0 %v10788_v17 }
 0x541   :  { %5345 = vmatpush1.bf16.msra.mxu1 %v5191_v19  ;;  %5468 = vmatprep.subr.bf16.mxu0 %v10790_v5  ;;  %v5424_v19 = vld [vmem:[#allocation5 + $0x538] sm:$0xff] }
 0x542   :  { %5346 = vmatprep.subr.bf16.mxu1 %v5194_v44  ;;  %v5423_v44 = vld [vmem:[#allocation5 + $0x530] sm:$0xff] }
 0x543   :  { %v4725_v40 = vpop.f32.mrb[88].mxu1 }
 0x544   :  { %v10798_v36 = vadd.f32 %v4725_v40, %v4685_v6  ;;  %v4727_v30 = vpop.f32.mrb[89].mxu1  ;;  %5469 = vmatpush1.bf16.msra.mxu0 %v5407_v15 }
 0x545   :  { %v10800_v46 = vadd.f32 %v4727_v30, %v4687_v38  ;;  %v4729_v51 = vpop.f32.mrb[90].mxu1  ;;  %5347 = vmatpush1.bf16.msra.mxu1 %v5193_v28  ;;  %5470 = vmatprep.subr.bf16.mxu0 %v5410_v42  ;;  %v5426_v28 = vld [vmem:[#allocation5 + $0x548] sm:$0xff] }
 0x546   :  { %v4730_v1 = vpop.f32.mrb[91].mxu1  ;;  %5503 = vmatprep.subr.bf16.mxu1 %v10796_v31 }
 0x548   :  { %5349 = vmatmul.mubr.bf16.vlgmr.msra.gmra.mrb[112].mxu1 %v5308_v41  ;;  %5471 = vmatpush1.bf16.msra.mxu0 %v5409_v2 }
 0x549   :  { %5504 = vmatpush1.bf16.msra.mxu1 %v10803_v8  ;;  %5472 = vmatprep.subr.bf16.mxu0 %v5412_v62 }
 0x54a   :  { %5505 = vmatprep.subr.bf16.mxu1 %v10805_v34  ;;  %5535 = vmatprep.mubr.bf16.mxu1 %v11174_v57 }
 0x54b   :  { %v10813_v27 = vpop.f32.mrb[92].mxu1 }
 0x54c   :  { %v10818_v39 = vpop.f32.mrb[93].mxu1  ;;  %5473 = vmatpush1.bf16.msra.mxu0 %v5411_v4 }
 0x54d   :  { %v4826_v50 = vpop.f32.mrb[94].mxu1  ;;  %5506 = vmatpush1.bf16.msra.mxu1 %v10811_v47  ;;  %5474 = vmatprep.subr.bf16.mxu0 %v5414_v48 }
 0x54e   :  { %v4827_v29 = vpop.f32.mrb[95].mxu1  ;;  %5564 = vmatprep.subr.bf16.mxu1 %v10769_v61  ;;  %v5430_v61 = vld [vmem:[#allocation5 + $0x568] sm:$0xff] }
 0x550   :  { %6639 = vmatmul.mubr.msk.bf16.vlgmr.msra.gmra.mrb[116].mxu1 %vm4551_vm5, %v5456_v32  ;;  %5475 = vmatpush1.bf16.msra.mxu0 %v5413_v53 }
 0x551   :  { %5565 = vmatpush1.bf16.msra.mxu1 %v10775_v58  ;;  %5476 = vmatprep.subr.bf16.mxu0 %v5416_v54 }
 0x552   :  { %5566 = vmatprep.subr.bf16.mxu1 %v10777_v11  ;;  %5596 = vmatprep.mubr.bf16.mxu1 %v5557_v63 }
 0x554   :  { %5477 = vmatpush1.bf16.msra.mxu0 %v5415_v13 }
 0x555   :  { %5567 = vmatpush1.bf16.msra.mxu1 %v10782_v9  ;;  %5478 = vmatprep.subr.bf16.mxu0 %v5418_v21 }
 0x556   :  { %5568 = vmatprep.subr.bf16.mxu1 %v10784_v37 }
 0x558   :  { %5479 = vmatpush1.bf16.msra.mxu0 %v5417_v56 }
 0x559   :  { %5569 = vmatpush1.bf16.msra.mxu1 %v10788_v17  ;;  %5480 = vmatprep.subr.bf16.mxu0 %v5420_v14 }
 0x55a   :  { %5570 = vmatprep.subr.bf16.mxu1 %v10790_v5 }
 0x55c   :  { %5481 = vmatpush1.bf16.msra.mxu0 %v5419_v59 }
 0x55d   :  { %5571 = vmatpush1.bf16.msra.mxu1 %v5407_v15  ;;  %5482 = vmatprep.subr.bf16.mxu0 %v5422_v22  ;;  %v5556_v15 = vrot.slane %v6640_v18, 1 }
 0x55e   :  { %5572 = vmatprep.subr.bf16.mxu1 %v5410_v42 }
 0x560   :  { %5483 = vmatpush1.bf16.msra.mxu0 %v5421_v43 }
 0x561   :  { %5573 = vmatpush1.bf16.msra.mxu1 %v5409_v2  ;;  %5484 = vmatprep.subr.bf16.mxu0 %v5424_v19 }
 0x562   :  { %5574 = vmatprep.subr.bf16.mxu1 %v5412_v62 }
 0x564   :  { %5485 = vmatpush1.bf16.msra.mxu0 %v5423_v44 }
 0x565   :  { %5575 = vmatpush1.bf16.msra.mxu1 %v5411_v4  ;;  %5486 = vmatprep.subr.bf16.mxu0 %v5426_v28 }
 0x566   :  { %5576 = vmatprep.subr.bf16.mxu1 %v5414_v48 }
 0x568   :  { %5487 = vmatpush1.bf16.msra.mxu0 %v5425_v24 }
 0x569   :  { %5577 = vmatpush1.bf16.msra.mxu1 %v5413_v53  ;;  %5488 = vmatprep.subr.bf16.mxu0 %v5428_v26 }
 0x56a   :  { %5578 = vmatprep.subr.bf16.mxu1 %v5416_v54 }
 0x56c   :  { %5489 = vmatpush1.bf16.msra.mxu0 %v5427_v49 }
 0x56d   :  { %5579 = vmatpush1.bf16.msra.mxu1 %v5415_v13  ;;  %5490 = vmatprep.subr.bf16.mxu0 %v5430_v61 }
 0x56e   :  { %5580 = vmatprep.subr.bf16.mxu1 %v5418_v21 }
 0x570   :  { %5491 = vmatpush1.bf16.msra.mxu0 %v5429_v35 }
 0x571   :  { %5581 = vmatpush1.bf16.msra.mxu1 %v5417_v56  ;;  %5492 = vmatprep.subr.bf16.mxu0 %v5432_v52 }
 0x572   :  { %5582 = vmatprep.subr.bf16.mxu1 %v5420_v14  ;;  %v4781_v25 = vpop.f32.mrb[52].mxu0 }
 0x573   :  { %v4823_v55 = vadd.f32 %v10813_v27, %v4781_v25  ;;  %v4783_v58 = vpop.f32.mrb[53].mxu0 }
 0x574   :  { %v4825_v11 = vadd.f32 %v10818_v39, %v4783_v58  ;;  %5493 = vmatpush1.bf16.msra.mxu0 %v5431_v20  ;;  %v4785_v60 = vpop.f32.mrb[54].mxu0 }
 0x575   :  { %5583 = vmatpush1.bf16.msra.mxu1 %v5419_v59  ;;  %v4786_v9 = vpop.f32.mrb[55].mxu0  ;;  %5605 = vmatprep.subr.bf16.mxu0 %v10796_v31 }
 0x576   :  { %5584 = vmatprep.subr.bf16.mxu1 %v5422_v22 }
 0x577   :  { %5495 = vmatmul.mubr.bf16.vlgmr.msra.gmra.mrb[76].mxu0 %v5454_v3 }
 0x578   :  { %5606 = vmatpush1.bf16.msra.mxu0 %v10803_v8  ;;  %5637 = vmatprep.mubr.bf16.mxu0 %v11174_v57 }
 0x579   :  { %5585 = vmatpush1.bf16.msra.mxu1 %v5421_v43  ;;  %5607 = vmatprep.subr.bf16.mxu0 %v10805_v34 }
 0x57a   :  { %5586 = vmatprep.subr.bf16.mxu1 %v5424_v19  ;;  %v4917_v37 = vpop.f32.mrb[56].mxu0 }
 0x57b   :  { %v4919_v6 = vpop.f32.mrb[57].mxu0 }
 0x57c   :  { %v4921_v38 = vpop.f32.mrb[58].mxu0  ;;  %5608 = vmatpush1.bf16.msra.mxu0 %v10811_v47 }
 0x57d   :  { %5587 = vmatpush1.bf16.msra.mxu1 %v5423_v44  ;;  %v4922_v10 = vpop.f32.mrb[59].mxu0  ;;  %5737 = vmatprep.subr.bf16.mxu0 %v11174_v57 }
 0x57e   :  { %5588 = vmatprep.subr.bf16.mxu1 %v5426_v28  ;;  %v5648_v10 = vld [vmem:[%s11078_s4] sm:$0x3] }
 0x57f   :  { %6643 = vmatmul.mubr.msk.bf16.vlgmr.msra.gmra.mrb[80].mxu0 %vm4551_vm5, %v5558_v23 }
 0x581   :  { %5589 = vmatpush1.bf16.msra.mxu1 %v5425_v24 }
 0x582   :  { %5590 = vmatprep.subr.bf16.mxu1 %v5428_v26 }
 0x585   :  { %5591 = vmatpush1.bf16.msra.mxu1 %v5427_v49 }
 0x586   :  { %5592 = vmatprep.subr.bf16.mxu1 %v5430_v61 }
 0x589   :  { %5593 = vmatpush1.bf16.msra.mxu1 %v5429_v35 }
 0x58a   :  { %5594 = vmatprep.subr.bf16.mxu1 %v5432_v52 }
 0x58b   :  { %v4876_v17 = vpop.f32.mrb[96].mxu1 }
 0x58c   :  { %v4877_v5 = vadd.f32 %v4876_v17, %v4823_v55  ;;  %v4878_v16 = vpop.f32.mrb[97].mxu1 }
 0x58d   :  { %v4879_v40 = vadd.f32 %v4878_v16, %v4825_v11  ;;  %v4880_v42 = vpop.f32.mrb[98].mxu1  ;;  %5595 = vmatpush1.bf16.msra.mxu1 %v5431_v20 }
 0x58e   :  { %v4918_v31 = vadd.f32 %v4917_v37, %v4877_v5  ;;  %v4881_v30 = vpop.f32.mrb[99].mxu1  ;;  %v11196_v5 = vld [vmem:[#allocation85_spill] sm:$0xff]  ;;  %5786 = vmatprep.subr.bf16.mxu1 %v11174_v57 }
 0x58f   :  { %v4920_v41 = vadd.f32 %v4919_v6, %v4879_v40  ;;  %v11197_v16 = vsub.s32 0, %v11196_v5 }
 0x590   :  { %5597 = vmatmul.mubr.bf16.vlgmr.msra.gmra.mrb[120].mxu1 %v5556_v15 }
 0x591   :  { %v5653_v15 = vrot.slane %v5648_v10, %v11197_v16 }
 0x593   :  { %v5051_v51 = vpop.f32.mrb[100].mxu1 }
 0x594   :  { %v5053_v1 = vpop.f32.mrb[101].mxu1 }
 0x595   :  { %v5055_v2 = vpop.f32.mrb[102].mxu1 }
 0x596   :  { %v5056_v8 = vpop.f32.mrb[103].mxu1 }
 0x5ba   :  { %v5010_v62 = vpop.f32.mrb[60].mxu0 }
 0x5bb   :  { %v5052_v34 = vadd.f32 %v5051_v51, %v5010_v62  ;;  %v5012_v7 = vpop.f32.mrb[61].mxu0 }
 0x5bc   :  { %v5054_v12 = vadd.f32 %v5053_v1, %v5012_v7  ;;  %v5014_v4 = vpop.f32.mrb[62].mxu0 }
 0x5bd   :  { %v5058_v47 = vadd.f32 %v5052_v34, %v10798_v36  ;;  %v5015_v27 = vpop.f32.mrb[63].mxu0 }
 0x5be   :  { %v5059_v48 = vadd.f32 %v5054_v12, %v10800_v46 }
 0x5c2   :  { %v5153_v33 = vpop.f32.mrb[64].mxu0 }
 0x5c3   :  { %v5155_v39 = vpop.f32.mrb[65].mxu0 }
 0x5c4   :  { %v5157_v32 = vpop.f32.mrb[66].mxu0 }
 0x5c5   :  { %v5158_v50 = vpop.f32.mrb[67].mxu0 }
 0x5d3   :  { %v5112_v29 = vpop.f32.mrb[104].mxu1 }
 0x5d4   :  { %v5154_v53 = vadd.f32 %v5153_v33, %v5112_v29  ;;  %v5114_v54 = vpop.f32.mrb[105].mxu1 }
 0x5d5   :  { %v5156_v63 = vadd.f32 %v5155_v39, %v5114_v54  ;;  %v5116_v13 = vpop.f32.mrb[106].mxu1 }
 0x5d6   :  { %v5160_v21 = vadd.f32 %v5154_v53, %v4918_v31  ;;  %v5117_v56 = vpop.f32.mrb[107].mxu1  ;;  %v11198_v31 = vsub.s32 1, %v11196_v5 }
 0x5d7   :  { %v5161_v14 = vadd.f32 %v5156_v63, %v4920_v41 }
 0x5d8   :  { %v5657_v30 = vrot.slane %v5648_v10, %v11198_v31 }
 0x5db   :  { %v5289_v59 = vpop.f32.mrb[108].mxu1 }
 0x5dc   :  { %v5291_v22 = vpop.f32.mrb[109].mxu1 }
 0x5dd   :  { %v5293_v43 = vpop.f32.mrb[110].mxu1 }
 0x5de   :  { %v5294_v19 = vpop.f32.mrb[111].mxu1 }
 0x602   :  { %v5248_v36 = vpop.f32.mrb[68].mxu0 }
 0x603   :  { %v5290_v44 = vadd.f32 %v5289_v59, %v5248_v36  ;;  %v5250_v28 = vpop.f32.mrb[69].mxu0 }
 0x604   :  { %v5292_v46 = vadd.f32 %v5291_v22, %v5250_v28  ;;  %v5252_v24 = vpop.f32.mrb[70].mxu0 }
 0x605   :  { %v5296_v26 = vadd.f32 %v5290_v44, %v5058_v47  ;;  %v5253_v49 = vpop.f32.mrb[71].mxu0 }
 0x606   :  { %v5297_v61 = vadd.f32 %v5292_v46, %v5059_v48 }
 0x60a   :  { %v5391_v35 = vpop.f32.mrb[72].mxu0 }
 0x60b   :  { %v5393_v52 = vpop.f32.mrb[73].mxu0 }
 0x60c   :  { %v5395_v0 = vpop.f32.mrb[74].mxu0 }
 0x60d   :  { %v5396_v20 = vpop.f32.mrb[75].mxu0 }
 0x61b   :  { %v5350_v25 = vpop.f32.mrb[112].mxu1 }
 0x61c   :  { %v5392_v55 = vadd.f32 %v5391_v35, %v5350_v25  ;;  %v5352_v58 = vpop.f32.mrb[113].mxu1 }
 0x61d   :  { %v5394_v3 = vadd.f32 %v5393_v52, %v5352_v58  ;;  %v5354_v11 = vpop.f32.mrb[114].mxu1 }
 0x61e   :  { %v5398_v60 = vadd.f32 %v5392_v55, %v5160_v21  ;;  %v5355_v9 = vpop.f32.mrb[115].mxu1 }
 0x61f   :  { %v5399_v45 = vadd.f32 %v5394_v3, %v5161_v14 }
 0x623   :  { %v5537_v37 = vpop.f32.mrb[116].mxu1 }
 0x624   :  { %v5539_v6 = vpop.f32.mrb[117].mxu1 }
 0x625   :  { %v5541_v23 = vpop.f32.mrb[118].mxu1 }
 0x626   :  { %v5542_v38 = vpop.f32.mrb[119].mxu1 }
 0x64a   :  { %v5496_v18 = vpop.f32.mrb[76].mxu0 }
 0x64b   :  { %v5538_v17 = vadd.f32 %v5537_v37, %v5496_v18  ;;  %v5498_v40 = vpop.f32.mrb[77].mxu0 }
 0x64c   :  { %v5540_v42 = vadd.f32 %v5539_v6, %v5498_v40  ;;  %v5500_v41 = vpop.f32.mrb[78].mxu0 }
 0x64d   :  { %v5544_v51 = vadd.f32 %v5538_v17, %v5296_v26  ;;  %v5501_v1 = vpop.f32.mrb[79].mxu0 }
 0x64e   :  { %v5545_v2 = vadd.f32 %v5540_v42, %v5297_v61 }
 0x64f   :  { %v5660_v8 = vadd.f32 %v5653_v15, %v5544_v51 }
 0x650   :  { %v5661_v62 = vadd.f32 %v5657_v30, %v5545_v2 }
 0x651   :  { %v5662_v34 = vmax.f32 %v5660_v8, 0.0 }
 0x652   :  { %v5663_v7 = vmax.f32 %v5661_v62, 0.0  ;;  %v5639_v12 = vpop.f32.mrb[80].mxu0 }
 0x653   :  { %v5641_v4 = vpop.f32.mrb[81].mxu0 }
 0x654   :  { %v6696_v47 = vpack.c.bf16 %v5663_v7, %v5662_v34  ;;  %v5643_v27 = vpop.f32.mrb[82].mxu0 }
 0x655   :  { %v5644_v48 = vpop.f32.mrb[83].mxu0 }
 0x656   :  { %5674 = vst.msk [vmem:[#allocation3] sm:$0xff] %vm5673_vm7, %v6696_v47 }
 0x663   :  { %v5598_v33 = vpop.f32.mrb[120].mxu1 }
 0x664   :  { %v5640_v39 = vadd.f32 %v5639_v12, %v5598_v33  ;;  %v5600_v32 = vpop.f32.mrb[121].mxu1 }
 0x665   :  { %v5642_v50 = vadd.f32 %v5641_v4, %v5600_v32  ;;  %v5602_v29 = vpop.f32.mrb[122].mxu1 }
 0x666   :  { %v5646_v53 = vadd.f32 %v5640_v39, %v5398_v60  ;;  %v5603_v54 = vpop.f32.mrb[123].mxu1 }
 0x667   :  { %v5647_v63 = vadd.f32 %v5642_v50, %v5399_v45 }
 0x668   :  { %v5675_v13 = vadd.f32 %v5653_v15, %v5646_v53 }
 0x669   :  { %v5676_v21 = vadd.f32 %v5657_v30, %v5647_v63 }
 0x66a   :  { %v5677_v56 = vmax.f32 %v5675_v13, 0.0 }
 0x66b   :  { %v5678_v14 = vmax.f32 %v5676_v21, 0.0 }
 0x66d   :  { %v6697_v59 = vpack.c.bf16 %v5678_v14, %v5677_v56 }
 0x66f   :  { %5691 = vst.msk [vmem:[#allocation3 + $0x8] sm:$0x77] %vm5690_vm10, %v6697_v59 }
 0x670   :  { %7588 = dma.done.wait [#allocation7 + $0x1], 8960 }
 0x671   :  { %7589 = vsyncadd [#allocation7 + $0x1], 4294958336  ;;  %v11199_v22 = vld [vmem:[#allocation29_spill] sm:$0xff]  ;;  %v11200_v43 = vld [vmem:[#allocation15_spill] sm:$0xff]  ;;  %vm5733_vm11 = vcmask 785408   ;;  %vm6040_vm12 = vcmask 517120  }
 0x672   :  { %5738 = vmatpush1.bf16.msra.mxu0 %v11199_v22  ;;  %5787 = vmatpush1.bf16.msra.mxu1 %v11200_v43  ;;  %v11201_v19 = vld [vmem:[#allocation30_spill] sm:$0xff]  ;;  %v11202_v36 = vld [vmem:[#allocation16_spill] sm:$0xff]  ;;  %v11203_v26 = vld [vmem:[#allocation31_spill] sm:$0xff]  ;;  %vm6094_vm13 = vcmask 523264   ;;  %s7595_s21 = smov [#allocation8]   ;;  %vm6213_vm14 = vcmask 9216  }
 0x673   :  { %5739 = vmatprep.subr.bf16.mxu0 %v11174_v57  ;;  %5788 = vmatprep.subr.bf16.mxu1 %v11174_v57  ;;  %v10861_v28 = vld [vmem:[#allocation3] sm:$0x33]  ;;  %v11206_v35 = vld [vmem:[#allocation18_spill] sm:$0xff]  ;;  %v11208_v0 = vld [vmem:[#allocation19_spill] sm:$0xff]  ;;  %s6221_s22 = sshll.u32 %s7595_s21, 4  ;;  %s6222_s22 = int_to_ptr.vmem [resolvable:$true] %s6221_s22 }
 0x674   :  { %v6650_v24 = vcombine.high %v10861_v28, %v10861_v28  ;;  %v11204_v49 = vld [vmem:[#allocation17_spill] sm:$0xff]  ;;  %v11205_v61 = vld [vmem:[#allocation32_spill] sm:$0xff]  ;;  %v11209_v20 = vld [vmem:[#allocation34_spill] sm:$0xff]  ;;  %v6649_v31 = vcombine.low %v10861_v28, %v10861_v28  ;;  %p7569_p1 = scmp.lt.s32.totalorder %s6222_s22, %s6222_s22 }
 0x675   :  { %v11207_v52 = vld [vmem:[#allocation33_spill] sm:$0xff]  ;;  %v11210_v25 = vld [vmem:[#allocation20_spill] sm:$0xff]  ;;  %v11211_v55 = vld [vmem:[#allocation35_spill] sm:$0xff] }
 0x676   :  { %5740 = vmatpush1.bf16.msra.mxu0 %v11201_v19  ;;  %5789 = vmatpush1.bf16.msra.mxu1 %v11202_v36  ;;  %v10859_v44 = vld [vmem:[#allocation3 + $0x8] sm:$0x33]  ;;  %v11213_v3 = vld [vmem:[#allocation36_spill] sm:$0xff]  ;;  %v11216_v9 = vld [vmem:[#allocation23_spill] sm:$0xff] }
 0x677   :  { %5741 = vmatprep.subr.bf16.mxu0 %v11174_v57  ;;  %5790 = vmatprep.subr.bf16.mxu1 %v11174_v57  ;;  %v6647_v46 = vcombine.high %v10859_v44, %v10859_v44  ;;  %v11212_v58 = vld [vmem:[#allocation21_spill] sm:$0xff]  ;;  %v11214_v11 = vld [vmem:[#allocation22_spill] sm:$0xff]  ;;  %v11218_v37 = vld [vmem:[#allocation24_spill] sm:$0xff]  ;;  %v6646_v42 = vcombine.low %v10859_v44, %v10859_v44 }
 0x678   :  { %6651 = vmatprep.mubr.msk.bf16.mxu1 %vm5733_vm11, %v6650_v24  ;;  %v11215_v60 = vld [vmem:[#allocation37_spill] sm:$0xff]  ;;  %v11217_v45 = vld [vmem:[#allocation38_spill] sm:$0xff]  ;;  %v11219_v6 = vld [vmem:[#allocation39_spill] sm:$0xff] }
 0x679   :  { %6648 = vmatprep.mubr.msk.bf16.mxu0 %vm5733_vm11, %v6647_v46  ;;  %v11220_v23 = vld [vmem:[#allocation25_spill] sm:$0xff]  ;;  %v11221_v38 = vld [vmem:[#allocation40_spill] sm:$0xff]  ;;  %v11222_v10 = vld [vmem:[#allocation26_spill] sm:$0xff] }
 0x67a   :  { %5742 = vmatpush1.bf16.msra.mxu0 %v11203_v26  ;;  %5791 = vmatpush1.bf16.msra.mxu1 %v11204_v49  ;;  %v10909_v18 = vld [vmem:[#allocation3] sm:$0x66]  ;;  %v10911_v17 = vld [vmem:[#allocation3 + $0x8] sm:$0x66]  ;;  %v11224_v16 = vld [vmem:[#allocation27_spill] sm:$0xff] }
 0x67b   :  { %5743 = vmatprep.subr.bf16.mxu0 %v11174_v57  ;;  %5792 = vmatprep.subr.bf16.mxu1 %v11174_v57  ;;  %v11223_v5 = vld [vmem:[#allocation41_spill] sm:$0xff]  ;;  %v6653_v15 = vcombine.high %v10909_v18, %v10909_v18  ;;  %v6656_v40 = vcombine.high %v10911_v17, %v10911_v17  ;;  %v11225_v30 = vld [vmem:[#allocation42_spill] sm:$0xff]  ;;  %v11226_v41 = vld [vmem:[#allocation28_spill] sm:$0xff]  ;;  %v6652_v19 = vcombine.low %v10909_v18, %v10909_v18 }
 0x67c   :  { %v11227_v2 = vld [vmem:[#allocation43_spill] sm:$0xff]  ;;  %v11228_v8 = vld [vmem:[#allocation57_spill] sm:$0xff]  ;;  %v11229_v62 = vld [vmem:[#allocation44_spill] sm:$0xff]  ;;  %v6655_v36 = vcombine.low %v10911_v17, %v10911_v17 }
 0x67d   :  { %v5848_v51 = vrot.slane %v6653_v15, 1  ;;  %v5916_v1 = vrot.slane %v6656_v40, 1  ;;  %v11230_v34 = vld [vmem:[#allocation58_spill] sm:$0xff]  ;;  %v11231_v7 = vld [vmem:[#allocation45_spill] sm:$0xff]  ;;  %v11232_v12 = vld [vmem:[#allocation59_spill] sm:$0xff]  ;;  %v5847_v24 = vrot.slane %v6652_v19, 1 }
 0x67e   :  { %5744 = vmatpush1.bf16.msra.mxu0 %v11205_v61  ;;  %5793 = vmatpush1.bf16.msra.mxu1 %v11206_v35  ;;  %v11233_v4 = vld [vmem:[#allocation46_spill] sm:$0xff]  ;;  %v11234_v47 = vld [vmem:[#allocation60_spill] sm:$0xff]  ;;  %v11235_v27 = vld [vmem:[#allocation47_spill] sm:$0xff]  ;;  %v5915_v26 = vrot.slane %v6655_v36, 1 }
 0x67f   :  { %5745 = vmatprep.subr.bf16.mxu0 %v11174_v57  ;;  %5794 = vmatprep.subr.bf16.mxu1 %v11174_v57  ;;  %v11236_v48 = vld [vmem:[#allocation61_spill] sm:$0xff]  ;;  %v11237_v33 = vld [vmem:[#allocation48_spill] sm:$0xff]  ;;  %v11238_v39 = vld [vmem:[#allocation62_spill] sm:$0xff] }
 0x680   :  { %v11239_v32 = vld [vmem:[#allocation49_spill] sm:$0xff]  ;;  %v11240_v50 = vld [vmem:[#allocation63_spill] sm:$0xff]  ;;  %v11241_v29 = vld [vmem:[#allocation50_spill] sm:$0xff] }
 0x681   :  { %v11242_v53 = vld [vmem:[#allocation64_spill] sm:$0xff]  ;;  %v11243_v54 = vld [vmem:[#allocation51_spill] sm:$0xff]  ;;  %v11244_v63 = vld [vmem:[#allocation65_spill] sm:$0xff] }
 0x682   :  { %5746 = vmatpush1.bf16.msra.mxu0 %v11207_v52  ;;  %5795 = vmatpush1.bf16.msra.mxu1 %v11208_v0  ;;  %v11245_v13 = vld [vmem:[#allocation52_spill] sm:$0xff]  ;;  %v11246_v21 = vld [vmem:[#allocation66_spill] sm:$0xff]  ;;  %v11247_v56 = vld [vmem:[#allocation53_spill] sm:$0xff]  ;;  %v11255_v52 = vmov 0.0  }
 0x683   :  { %5747 = vmatprep.subr.bf16.mxu0 %v11174_v57  ;;  %5796 = vmatprep.subr.bf16.mxu1 %v11174_v57  ;;  %v11248_v14 = vld [vmem:[#allocation67_spill] sm:$0xff]  ;;  %v11249_v59 = vld [vmem:[#allocation54_spill] sm:$0xff]  ;;  %v11250_v22 = vld [vmem:[#allocation68_spill] sm:$0xff] }
 0x684   :  { %v5977_v43 = vld [vmem:[#allocation3] sm:$0xcc]  ;;  %v11251_v44 = vld [vmem:[#allocation55_spill] sm:$0xff]  ;;  %v11254_v61 = vld [vmem:[#allocation70_spill] sm:$0xff] }
 0x685   :  { %v11252_v28 = vld [vmem:[#allocation69_spill] sm:$0xff]  ;;  %v6659_v46 = vcombine.high %v5977_v43, %v5977_v43  ;;  %v11253_v49 = vld [vmem:[#allocation56_spill] sm:$0xff]  ;;  %v11256_v0 = vld [vmem:[#allocation71_spill] sm:$0xff] }
 0x686   :  { %5748 = vmatpush1.bf16.msra.mxu0 %v11209_v20  ;;  %5797 = vmatpush1.bf16.msra.mxu1 %v11210_v25  ;;  %v11257_v20 = vld [vmem:[#allocation72_spill] sm:$0xff]  ;;  %v11258_v25 = vld [vmem:[#allocation73_spill] sm:$0xff] }
 0x687   :  { %5749 = vmatprep.subr.bf16.mxu0 %v11174_v57  ;;  %5798 = vmatprep.subr.bf16.mxu1 %v11174_v57  ;;  %v5984_v35 = vrot.slane %v6659_v46, 2  ;;  %v11269_v18 = vld [vmem:[#allocation84_spill] sm:$0xff] }
 0x688   :  { %v7556_v17 = vld [vmem:[%s11081_s7 + $0x20] sm:$0xff]   ;;  %v7563_v19 = vld [vmem:[%s11081_s7 + $0x18] sm:$0xff]  }
 0x68a   :  { %5750 = vmatpush1.bf16.msra.mxu0 %v11211_v55  ;;  %5799 = vmatpush1.bf16.msra.mxu1 %v11212_v58  ;;  %v11259_v55 = vld [vmem:[#allocation74_spill] sm:$0xff]  ;;  %v11260_v58 = vld [vmem:[#allocation75_spill] sm:$0xff] }
 0x68b   :  { %5751 = vmatprep.subr.bf16.mxu0 %v11174_v57  ;;  %5800 = vmatprep.subr.bf16.mxu1 %v11174_v57 }
 0x68e   :  { %5752 = vmatpush1.bf16.msra.mxu0 %v11213_v3  ;;  %5801 = vmatpush1.bf16.msra.mxu1 %v11214_v11  ;;  %v11261_v3 = vld [vmem:[#allocation76_spill] sm:$0xff]  ;;  %v11262_v11 = vld [vmem:[#allocation77_spill] sm:$0xff] }
 0x68f   :  { %5753 = vmatprep.subr.bf16.mxu0 %v11174_v57  ;;  %5802 = vmatprep.subr.bf16.mxu1 %v11174_v57 }
 0x692   :  { %5754 = vmatpush1.bf16.msra.mxu0 %v11215_v60  ;;  %5803 = vmatpush1.bf16.msra.mxu1 %v11216_v9  ;;  %v11263_v60 = vld [vmem:[#allocation78_spill] sm:$0xff]  ;;  %v11264_v9 = vld [vmem:[#allocation79_spill] sm:$0xff] }
 0x693   :  { %5755 = vmatprep.subr.bf16.mxu0 %v11174_v57  ;;  %5804 = vmatprep.subr.bf16.mxu1 %v11174_v57 }
 0x696   :  { %5756 = vmatpush1.bf16.msra.mxu0 %v11217_v45  ;;  %5805 = vmatpush1.bf16.msra.mxu1 %v11218_v37  ;;  %v11265_v45 = vld [vmem:[#allocation80_spill] sm:$0xff]  ;;  %v11266_v37 = vld [vmem:[#allocation81_spill] sm:$0xff] }
 0x697   :  { %5757 = vmatprep.subr.bf16.mxu0 %v11174_v57  ;;  %5806 = vmatprep.subr.bf16.mxu1 %v11174_v57 }
 0x69a   :  { %5758 = vmatpush1.bf16.msra.mxu0 %v11219_v6  ;;  %5807 = vmatpush1.bf16.msra.mxu1 %v11220_v23  ;;  %v11267_v6 = vld [vmem:[#allocation82_spill] sm:$0xff]  ;;  %v6658_v23 = vcombine.low %v5977_v43, %v5977_v43 }
 0x69b   :  { %5759 = vmatprep.subr.bf16.mxu0 %v11174_v57  ;;  %5808 = vmatprep.subr.bf16.mxu1 %v11174_v57  ;;  %v7562_v43 = vld [vmem:[%s11081_s7 + $0x10] sm:$0xff]  }
 0x69e   :  { %5760 = vmatpush1.bf16.msra.mxu0 %v11221_v38  ;;  %5809 = vmatpush1.bf16.msra.mxu1 %v11222_v10  ;;  %v11268_v38 = vld [vmem:[#allocation83_spill] sm:$0xff]  ;;  %v5983_v10 = vrot.slane %v6658_v23, 2 }
 0x69f   :  { %5761 = vmatprep.subr.bf16.mxu0 %v11174_v57  ;;  %5810 = vmatprep.subr.bf16.mxu1 %v11174_v57 }
 0x6a2   :  { %5762 = vmatpush1.bf16.msra.mxu0 %v11223_v5  ;;  %5811 = vmatpush1.bf16.msra.mxu1 %v11224_v16  ;;  %v7557_v5 = vld [vmem:[%s11081_s7 + $0x28] sm:$0xff]   ;;  %v7559_v16 = vld [vmem:[%s11081_s7 + $0x38] sm:$0xff]  }
 0x6a3   :  { %5763 = vmatprep.subr.bf16.mxu0 %v11174_v57  ;;  %5812 = vmatprep.subr.bf16.mxu1 %v11174_v57 }
 0x6a6   :  { %5764 = vmatpush1.bf16.msra.mxu0 %v11225_v30  ;;  %5813 = vmatpush1.bf16.msra.mxu1 %v11226_v41 }
 0x6a7   :  { %5853 = vmatprep.subr.bf16.mxu0 %v11174_v57  ;;  %5921 = vmatprep.subr.bf16.mxu1 %v11174_v57 }
 0x6a9   :  { %5770 = vmatmul.mubr.bf16.vlgmr.msra.gmra.mrb[84].mxu0 %v6646_v42  ;;  %5819 = vmatmul.mubr.bf16.vlgmr.msra.gmra.mrb[124].mxu1 %v6649_v31 }
 0x6aa   :  { %5854 = vmatpush1.bf16.msra.mxu0 %v11227_v2  ;;  %5922 = vmatpush1.bf16.msra.mxu1 %v11228_v8 }
 0x6ab   :  { %5855 = vmatprep.subr.bf16.mxu0 %v11174_v57  ;;  %5923 = vmatprep.subr.bf16.mxu1 %v11174_v57 }
 0x6ac   :  { %6654 = vmatprep.mubr.msk.bf16.mxu0 %vm5733_vm11, %v5848_v51  ;;  %6657 = vmatprep.mubr.msk.bf16.mxu1 %vm5733_vm11, %v5916_v1 }
 0x6ae   :  { %5856 = vmatpush1.bf16.msra.mxu0 %v11229_v62  ;;  %5924 = vmatpush1.bf16.msra.mxu1 %v11230_v34 }
 0x6af   :  { %5857 = vmatprep.subr.bf16.mxu0 %v11174_v57  ;;  %5925 = vmatprep.subr.bf16.mxu1 %v11174_v57 }
 0x6b2   :  { %5858 = vmatpush1.bf16.msra.mxu0 %v11231_v7  ;;  %5926 = vmatpush1.bf16.msra.mxu1 %v11232_v12 }
 0x6b3   :  { %5859 = vmatprep.subr.bf16.mxu0 %v11174_v57  ;;  %5927 = vmatprep.subr.bf16.mxu1 %v11174_v57 }
 0x6b6   :  { %5860 = vmatpush1.bf16.msra.mxu0 %v11233_v4  ;;  %5928 = vmatpush1.bf16.msra.mxu1 %v11234_v47 }
 0x6b7   :  { %5861 = vmatprep.subr.bf16.mxu0 %v11174_v57  ;;  %5929 = vmatprep.subr.bf16.mxu1 %v11174_v57 }
 0x6ba   :  { %5862 = vmatpush1.bf16.msra.mxu0 %v11235_v27  ;;  %5930 = vmatpush1.bf16.msra.mxu1 %v11236_v48 }
 0x6bb   :  { %5863 = vmatprep.subr.bf16.mxu0 %v11174_v57  ;;  %5931 = vmatprep.subr.bf16.mxu1 %v11174_v57 }
 0x6be   :  { %5864 = vmatpush1.bf16.msra.mxu0 %v11237_v33  ;;  %5932 = vmatpush1.bf16.msra.mxu1 %v11238_v39 }
 0x6bf   :  { %5865 = vmatprep.subr.bf16.mxu0 %v11174_v57  ;;  %5933 = vmatprep.subr.bf16.mxu1 %v11174_v57 }
 0x6c2   :  { %5866 = vmatpush1.bf16.msra.mxu0 %v11239_v32  ;;  %5934 = vmatpush1.bf16.msra.mxu1 %v11240_v50  ;;  %v6661_v32 = vld [vmem:[%s11080_s6] ss:$0 sm:$0xff] }
 0x6c3   :  { %5867 = vmatprep.subr.bf16.mxu0 %v11174_v57  ;;  %5935 = vmatprep.subr.bf16.mxu1 %v11174_v57 }
 0x6c6   :  { %5868 = vmatpush1.bf16.msra.mxu0 %v11241_v29  ;;  %5936 = vmatpush1.bf16.msra.mxu1 %v11242_v53 }
 0x6c7   :  { %5869 = vmatprep.subr.bf16.mxu0 %v11174_v57  ;;  %5937 = vmatprep.subr.bf16.mxu1 %v11174_v57 }
 0x6ca   :  { %5870 = vmatpush1.bf16.msra.mxu0 %v11243_v54  ;;  %5938 = vmatpush1.bf16.msra.mxu1 %v11244_v63 }
 0x6cb   :  { %5871 = vmatprep.subr.bf16.mxu0 %v11174_v57  ;;  %5939 = vmatprep.subr.bf16.mxu1 %v11174_v57 }
 0x6ce   :  { %5872 = vmatpush1.bf16.msra.mxu0 %v11245_v13  ;;  %5940 = vmatpush1.bf16.msra.mxu1 %v11246_v21 }
 0x6cf   :  { %5873 = vmatprep.subr.bf16.mxu0 %v11174_v57  ;;  %5941 = vmatprep.subr.bf16.mxu1 %v11174_v57 }
 0x6d2   :  { %5874 = vmatpush1.bf16.msra.mxu0 %v11247_v56  ;;  %5942 = vmatpush1.bf16.msra.mxu1 %v11248_v14  ;;  %v7560_v14 = vld [vmem:[%s11081_s7] sm:$0xff]  }
 0x6d3   :  { %5875 = vmatprep.subr.bf16.mxu0 %v11174_v57  ;;  %5943 = vmatprep.subr.bf16.mxu1 %v11174_v57 }
 0x6d6   :  { %5876 = vmatpush1.bf16.msra.mxu0 %v11249_v59  ;;  %5944 = vmatpush1.bf16.msra.mxu1 %v11250_v22  ;;  %v7561_v22 = vld [vmem:[%s11081_s7 + $0x8] sm:$0xff]  }
 0x6d7   :  { %5877 = vmatprep.subr.bf16.mxu0 %v11174_v57  ;;  %5945 = vmatprep.subr.bf16.mxu1 %v11174_v57 }
 0x6da   :  { %5878 = vmatpush1.bf16.msra.mxu0 %v11251_v44  ;;  %5946 = vmatpush1.bf16.msra.mxu1 %v11252_v28 }
 0x6db   :  { %5879 = vmatprep.subr.bf16.mxu0 %v11174_v57  ;;  %5947 = vmatprep.subr.bf16.mxu1 %v11174_v57 }
 0x6de   :  { %5880 = vmatpush1.bf16.msra.mxu0 %v11253_v49  ;;  %5948 = vmatpush1.bf16.msra.mxu1 %v11254_v61  ;;  %v6681_v49 = vld [vmem:[%s11082_s8] ss:$0 sm:$0xff] }
 0x6df   :  { %5989 = vmatprep.subr.bf16.mxu0 %v11174_v57  ;;  %7288 = vmatprep.subr.bf16.mxu1 %v11255_v52 }
 0x6e1   :  { %5886 = vmatmul.mubr.bf16.vlgmr.msra.gmra.mrb[88].mxu0 %v5847_v24  ;;  %5954 = vmatmul.mubr.bf16.vlgmr.msra.gmra.mrb[128].mxu1 %v5915_v26 }
 0x6e2   :  { %5990 = vmatpush1.bf16.msra.mxu0 %v11256_v0  ;;  %6660 = vmatprep.mubr.msk.bf16.mxu0 %vm5733_vm11, %v5984_v35 }
 0x6e3   :  { %5991 = vmatprep.subr.bf16.mxu0 %v11174_v57  ;;  %7296 = vmatprep.mubr.msk.bf16.mxu1 %vm7593_vm0, %v11255_v52 }
 0x6e4   :  { %7289 = vmatpush3.bf16.msra.mxu1 %v7556_v17 }
 0x6e5   :  { %7290 = vmatprep.subr.bf16.mxu1 %v11255_v52 }
 0x6e6   :  { %5992 = vmatpush1.bf16.msra.mxu0 %v11257_v20 }
 0x6e7   :  { %5993 = vmatprep.subr.bf16.mxu0 %v11174_v57 }
 0x6e8   :  { %7291 = vmatpush3.bf16.msra.mxu1 %v7557_v5 }
 0x6e9   :  { %7292 = vmatprep.subr.bf16.mxu1 %v11255_v52 }
 0x6ea   :  { %5994 = vmatpush1.bf16.msra.mxu0 %v11258_v25 }
 0x6eb   :  { %5995 = vmatprep.subr.bf16.mxu0 %v11174_v57 }
 0x6ee   :  { %5996 = vmatpush1.bf16.msra.mxu0 %v11259_v55 }
 0x6ef   :  { %5997 = vmatprep.subr.bf16.mxu0 %v11174_v57 }
 0x6f2   :  { %5998 = vmatpush1.bf16.msra.mxu0 %v11260_v58 }
 0x6f3   :  { %5999 = vmatprep.subr.bf16.mxu0 %v11174_v57 }
 0x6f6   :  { %6000 = vmatpush1.bf16.msra.mxu0 %v11261_v3 }
 0x6f7   :  { %6001 = vmatprep.subr.bf16.mxu0 %v11174_v57 }
 0x6fa   :  { %6002 = vmatpush1.bf16.msra.mxu0 %v11262_v11 }
 0x6fb   :  { %6003 = vmatprep.subr.bf16.mxu0 %v11174_v57 }
 0x6fe   :  { %6004 = vmatpush1.bf16.msra.mxu0 %v11263_v60 }
 0x6ff   :  { %6005 = vmatprep.subr.bf16.mxu0 %v11174_v57 }
 0x702   :  { %6006 = vmatpush1.bf16.msra.mxu0 %v11264_v9 }
 0x703   :  { %6007 = vmatprep.subr.bf16.mxu0 %v11174_v57 }
 0x706   :  { %6008 = vmatpush1.bf16.msra.mxu0 %v11265_v45 }
 0x707   :  { %6009 = vmatprep.subr.bf16.mxu0 %v11174_v57 }
 0x70a   :  { %6010 = vmatpush1.bf16.msra.mxu0 %v11266_v37 }
 0x70b   :  { %6011 = vmatprep.subr.bf16.mxu0 %v11174_v57 }
 0x70e   :  { %6012 = vmatpush1.bf16.msra.mxu0 %v11267_v6 }
 0x70f   :  { %6013 = vmatprep.subr.bf16.mxu0 %v11174_v57 }
 0x712   :  { %6014 = vmatpush1.bf16.msra.mxu0 %v11268_v38 }
 0x713   :  { %6015 = vmatprep.subr.bf16.mxu0 %v11174_v57  ;;  %v7558_v57 = vld [vmem:[%s11081_s7 + $0x30] sm:$0xff]   ;;  %s7564_s7 = scalar_lea.vmem %s6222_s22, 32 }
 0x714   :  { %7293 = vmatpush3.bf16.msra.mxu1 %v7558_v57  ;;  %p7565_p0 = scmp.ne.s32.totalorder %s6222_s22, %s7564_s7  ;;  %p7570_p2 = scmp.lt.s32.totalorder %s7564_s7, %s7564_s7 }
 0x715   :  { %7294 = vmatprep.subr.bf16.mxu1 %v11255_v52 }
 0x716   :  { %6016 = vmatpush1.bf16.msra.mxu0 %v11269_v18  ;;  %p7571_p3 = por %p7570_p2, %p7569_p1 }
 0x718   :  { %7295 = vmatpush3.bf16.msra.mxu1 %v7559_v16  ;;  %p7572_p4 = pnand %p7571_p3, %p7565_p0 }
 0x719   :  { %6022 = vmatmul.mubr.bf16.vlgmr.msra.gmra.mrb[92].mxu0 %v5983_v10  ;;  %7300 = vmatprep.subr.bf16.mxu1 %v11255_v52 }
 0x77c   :  { %v5771_v15 = vpop.f32.mrb[84].mxu0  ;;  %v5820_v40 = vpop.f32.mrb[124].mxu1 }
 0x77d   :  { %v5773_v42 = vpop.f32.mrb[85].mxu0  ;;  %v5821_v31 = vadd.f32 %v5820_v40, %v5771_v15  ;;  %v5822_v30 = vpop.f32.mrb[125].mxu1 }
 0x77e   :  { %v5774_v41 = vpop.f32.mrb[86].mxu0  ;;  %v5823_v51 = vpop.f32.mrb[126].mxu1 }
 0x77f   :  { %v5775_v1 = vpop.f32.mrb[87].mxu0  ;;  %v5824_v2 = vpop.f32.mrb[127].mxu1 }
 0x7b4   :  { %v5887_v8 = vpop.f32.mrb[88].mxu0  ;;  %v5955_v62 = vpop.f32.mrb[128].mxu1 }
 0x7b5   :  { %v5893_v34 = vadd.f32 %v5887_v8, %v5821_v31  ;;  %v5889_v7 = vpop.f32.mrb[89].mxu0  ;;  %v5957_v12 = vpop.f32.mrb[129].mxu1 }
 0x7b6   :  { %v5890_v4 = vpop.f32.mrb[90].mxu0  ;;  %v5958_v47 = vpop.f32.mrb[130].mxu1 }
 0x7b7   :  { %v5961_v27 = vadd.f32 %v5955_v62, %v5893_v34  ;;  %v5891_v48 = vpop.f32.mrb[91].mxu0  ;;  %v5959_v33 = vpop.f32.mrb[131].mxu1 }
 0x7ec   :  { %v6023_v39 = vpop.f32.mrb[92].mxu0 }
 0x7ed   :  { %v6029_v50 = vadd.f32 %v6023_v39, %v5961_v27  ;;  %v6025_v29 = vpop.f32.mrb[93].mxu0 }
 0x7ee   :  { %v6026_v53 = vpop.f32.mrb[94].mxu0 }
 0x7ef   :  { %v6037_v54 = vadd.f32 %v6661_v32, %v6029_v50  ;;  %v6027_v63 = vpop.f32.mrb[95].mxu0 }
 0x7f1   :  { %v6038_v13 = vmax.f32 %v6037_v54, 0.0 }
 0x7f3   :  { %v6039_v21 = vpack.c.bf16 %v6038_v13, %v6038_v13 }
 0x7f5   :  { %6041 = vst.msk [vmem:[#allocation4] sm:$0x3] %vm6040_vm12, %v6039_v21 }
 0x7fc   :  { %v6670_v56 = vld.sshfl [vmem:[#allocation4] sm:$0x2 pattern:$0x76325410]  ;;  %v6042_v36 = vld [vmem:[#allocation4] sm:$0x1] }
 0x7fd   :  { %v6069_v59 = vrot.slane %v6670_v56, 1 }
 0x7ff   :  { %7297 = vmatmul.mubr.msk.bf16.vlgmr.msra.gmra.mrb[132].mxu1 %vm6094_vm13, %v6069_v59 }
 0x800   :  { %7301 = vmatpush3.bf16.msra.mxu1 %v7560_v14  ;;  %7308 = vmatprep.mubr.msk.bf16.mxu1 %vm7593_vm0, %v11255_v52 }
 0x801   :  { %7302 = vmatprep.subr.bf16.mxu1 %v11255_v52 }
 0x804   :  { %7303 = vmatpush3.bf16.msra.mxu1 %v7561_v22 }
 0x805   :  { %7304 = vmatprep.subr.bf16.mxu1 %v11255_v52 }
 0x808   :  { %7305 = vmatpush3.bf16.msra.mxu1 %v7562_v43 }
 0x809   :  { %7306 = vmatprep.subr.bf16.mxu1 %v11255_v52 }
 0x80c   :  { %7307 = vmatpush3.bf16.msra.mxu1 %v7563_v19 }
 0x80f   :  { %7309 = vmatmul.mubr.msk.bf16.vlgmr.msra.gmra.mrb[136].mxu1 %vm6094_vm13, %v6042_v36 }
 0x8d2   :  { %v6132_v44 = vpop.f32.mrb[132].mxu1 }
 0x8d3   :  { %v7298_v28 = vpop.f32.mrb[133].mxu1 }
 0x8d4   :  { %v6135_v46 = vpop.f32.mrb[134].mxu1 }
 0x8d5   :  { %v7299_v24 = vpop.f32.mrb[135].mxu1 }
 0x8e2   :  { %v6199_v26 = vpop.f32.mrb[136].mxu1 }
 0x8e3   :  { %v6200_v61 = vadd.f32 %v6199_v26, %v6132_v44  ;;  %v7310_v35 = vpop.f32.mrb[137].mxu1 }
 0x8e4   :  { %v6202_v0 = vpop.f32.mrb[138].mxu1 }
 0x8e5   :  { %v6212_v52 = vadd.f32 %v6681_v49, %v6200_v61  ;;  %v7311_v20 = vpop.f32.mrb[139].mxu1 }
 0x8e7   :  { %6214 = vst.msk [vmem:[#allocation8] sm:$0x3] %vm6213_vm14, %v6212_v52 }
 0x8e8   :  { %7575 = shalt.err (!%p7572_p4)
}
 0x8e9   :  { %s7576_s8 = scalar_lea.hbm %s11083_s9, 32 }
 0x8ea   :  { %p7577_p5 = scmp.ne.s32.totalorder %s11083_s9, %s7576_s8  ;;  %p7580_p6 = scmp.lt.u32.totalorder %s7576_s8, %s11083_s9 }
 0x8ec   :  { %p7582_p7 = pnand %p7580_p6, %p7577_p5 }
 0x8ee   :  { %7585 = shalt.err (!%p7582_p7)
}
 0x8ef   :  { %6224 = dma.vmem_to_hbm [thread:$0]  %s6222_s22, 32, %s11083_s9, [#allocation9]  }
 0x8f0   :  { %7590 = dma.done.wait [#allocation9], 32  }
 0x8f1   :  { %7591 = vsyncadd [#allocation9], 4294967264 }
 0x8f2   :  { %6228 = vsyncpa [#allocation9], 1 }
 0x8f3   :  { %6229 = vsyncmov [#allocation7] }
 0x8f6   :  { %s6230_s28 = vpop.sfrf %6229 }
 0x8f7   :  { %p6682_p8 = scmp.ne.s32.totalorder %s6230_s28, 0 }
 0x8f9   :  { %6234 = shalt.err (%p6682_p8)  }
 0x8fa   :  { %6236 = vsyncmov [#allocation7 + $0x1] }
 0x8fd   :  { %s6237_s29 = vpop.sfrf %6236 }
 0x8fe   :  { %p6683_p9 = scmp.ne.s32.totalorder %s6237_s29, 0 }
 0x900   :  { %6241 = shalt.err (%p6683_p9)  }

</bundles_post_ra>
